<compile_context>
chip_gen: v7x
topology: tpu7x:2x2x1
jax: 0.10.0
libtpu: 0.0.40
codegen_flags: <defaults>
</compile_context>

<pallas_src>
import functools

import jax
import jax.numpy as jnp
from jax import lax
from jax.experimental import pallas as pl
from jax.experimental.pallas import tpu as pltpu

# ----------------------------- constants (ARGS / indices) --------------------
PAD_INDEX = 0          # question / position padding index
RPAD_INDEX = 3         # response padding index (response embedding has 2+2 rows)

SEQ_SIZE = 8           # ARGS.seq_size
HIDDEN = 32            # hidden_dim
NUM_HEAD = 4
QUESTION_NUM = 10
NUM_ENC_LAYERS = 2
NUM_DEC_LAYERS = 2
LN_EPS = 1e-8


# ----------------------------- fused SAINT kernel ----------------------------
def _saint_kernel(enc_in_ref, dec_in_ref, pad_ref,
                  qkv_w_ref, qkv_b_ref, wo_ref, ff1_ref, ff2_ref, vec_ref,
                  pred_w_ref, pred_b_ref, out_ref,
                  *, num_head, eps, n_enc, n_dec):
    Bt, L, H = enc_in_ref.shape
    dk = H // num_head
    rows = Bt * L
    epsf = jnp.float32(eps)

    # Additive attention-mask bias, built once per tile from the (Bt,1,L) pad
    # keep-row (1 keep / 0 pad) and a causal iota mask; shared by all layers
    # and heads of this batch tile.
    qpos = lax.broadcasted_iota(jnp.int32, (1, L, L), 1)
    kpos = lax.broadcasted_iota(jnp.int32, (1, L, L), 2)
    causal = (kpos <= qpos).astype(jnp.float32)              # (1, L, L)
    keep = pad_ref[...] * causal                              # (Bt, L, L)
    bias = (keep - jnp.float32(1.0)) * jnp.float32(1e9)       # 0 keep / -1e9 mask

    def layer_norm(x, g, b):                                  # x:(rows,H) g,b:(1,H)
        mu = jnp.mean(x, axis=-1, keepdims=True)
        var = jnp.mean((x - mu) ** 2, axis=-1, keepdims=True)
        return (x - mu) * lax.rsqrt(var + epsf) * g + b

    def block(q3, k3, layer, self_attn):
        # q3 = query stream, k3 = key/value stream, both (Bt, L, H) f32.
        vec = vec_ref[layer]                                  # (7, H)
        bo, ln1g, ln1b = vec[0:1], vec[1:2], vec[2:3]
        b1, b2 = vec[3:4], vec[4:5]
        ln2g, ln2b = vec[5:6], vec[6:7]

        q2 = q3.reshape(rows, H)
        k2 = k3.reshape(rows, H)

        # Fused QKV projection: one (rows, H) x (H, 3H) MXU matmul per stream.
        # The 1/sqrt(dk) attention scale is pre-folded into the Q columns.
        wqkv = qkv_w_ref[layer]                               # (H, 3H)
        bqkv = qkv_b_ref[layer]                               # (1, 3H)
        qkv_q = (jnp.dot(q2, wqkv, preferred_element_type=jnp.float32) + bqkv
                 ).reshape(Bt, L, 3 * H)
        if self_attn:
            qkv_k = qkv_q
        else:
            qkv_k = (jnp.dot(k2, wqkv, preferred_element_type=jnp.float32)
                     + bqkv).reshape(Bt, L, 3 * H)

        # Per-head attention, batched over the batch tile (3-D einsums).  The
        # per-head output projection is accumulated directly with
        # sublane-aligned row-slices of wo (no lane-axis concatenate).
        wo = wo_ref[layer]                                    # (H, H)
        attn = jnp.zeros((rows, H), jnp.float32)
        for h in range(num_head):
            Qh = qkv_q[:, :, h * dk:(h + 1) * dk]             # (Bt, L, dk)
            Kh = qkv_k[:, :, H + h * dk:H + (h + 1) * dk]
            Vh = qkv_k[:, :, 2 * H + h * dk:2 * H + (h + 1) * dk]
            s = jnp.einsum('bqd,bkd->bqk', Qh, Kh,
                           preferred_element_type=jnp.float32) + bias
            s = s - jnp.max(s, axis=-1, keepdims=True)
            e = jnp.exp(s)
            inv = pl.reciprocal(jnp.sum(e, axis=-1, keepdims=True), approx=True)
            oh = jnp.einsum('bqk,bkd->bqd', e * inv, Vh,
                            preferred_element_type=jnp.float32)  # (Bt, L, dk)
            attn = attn + jnp.dot(oh.reshape(rows, dk),
                                  wo[h * dk:(h + 1) * dk, :],
                                  preferred_element_type=jnp.float32)
        attn = attn + bo

        # Residual uses the key/value stream (matches PyTorch: LN(key + attn)).
        y = layer_norm(k2 + attn, ln1g, ln1b)

        ff = jnp.dot(y, ff1_ref[layer], preferred_element_type=jnp.float32) + b1
        ff = jnp.maximum(ff, jnp.float32(0.0))
        ff = jnp.dot(ff, ff2_ref[layer], preferred_element_type=jnp.float32) + b2

        out = layer_norm(y + ff, ln2g, ln2b)
        return out.reshape(Bt, L, H)

    # ---- encoder stack (layers [0, n_enc)) ----
    x = enc_in_ref[...].astype(jnp.float32)
    for l in range(n_enc):
        x = block(x, x, l, True)
    enc_out = x

    # ---- decoder stack (layers [n_enc, n_enc + n_dec)) ----
    d = dec_in_ref[...].astype(jnp.float32)
    for l in range(n_dec):
        if l == 0:
            d = block(d, d, n_enc + l, True)
        else:
            d = block(d, enc_out, n_enc + l, False)

    # ---- final 1-unit prediction on the last timestep ----
    last = d[:, L - 1, :]                                     # (Bt, H)
    pw = pred_w_ref[...]                                      # (1, H)
    pred = jnp.sum(last * pw, axis=-1, keepdims=True) + pred_b_ref[...]
    out_ref[...] = pred.astype(out_ref.dtype)                 # (Bt, 1)


def _choose_bt(batch):
    """Batch-tile size.  Large tiles amortize the ~0.35 us per-grid-step cost
    and turn the QKV/FFN matmuls into thousand-row MXU ops; keep >= 2 grid
    steps when the batch allows (v7x dual TensorCore) and cap the tile so the
    f32, lane-padded intermediates stay well inside v7x's 64 MiB VMEM."""
    if batch <= 32:
        return batch
    half = -(-batch // 2)
    bt = ((half + 31) // 32) * 32            # rows = Bt * L multiple of 256
    return min(bt, 256)


def saint_fused_forward(enc_in, dec_in, pad_keep, params, num_head=NUM_HEAD):
    B, L, H = enc_in.shape
    Bt = _choose_bt(B)
    Bp = pl.cdiv(B, Bt) * Bt
    if Bp != B:
        pad = Bp - B
        enc_in = jnp.pad(enc_in, ((0, pad), (0, 0), (0, 0)))
        dec_in = jnp.pad(dec_in, ((0, pad), (0, 0), (0, 0)))
        pad_keep = jnp.pad(pad_keep, ((0, pad), (0, 0), (0, 0)))

    # bf16 transport for the streamed activations; the kernel upcasts to f32
    # immediately after the load (all softmax / LN / accumulate math is f32).
    enc_in = enc_in.astype(jnp.bfloat16)
    dec_in = dec_in.astype(jnp.bfloat16)

    kern = functools.partial(_saint_kernel, num_head=num_head, eps=LN_EPS,
                             n_enc=NUM_ENC_LAYERS, n_dec=NUM_DEC_LAYERS)

    act_spec = pl.BlockSpec((Bt, L, H), lambda b: (b, 0, 0))
    pad_spec = pl.BlockSpec((Bt, 1, L), lambda b: (b, 0, 0))

    def full_spec(arr):
        nd = arr.ndim
        return pl.BlockSpec(arr.shape, lambda b, _nd=nd: (0,) * _nd)

    weights = (params["qkv_w"], params["qkv_b"], params["wo_w"],
               params["ff1_w"], params["ff2_w"], params["vec_b"],
               params["pred_w"], params["pred_b"])

    out = pl.pallas_call(
        kern,
        out_shape=jax.ShapeDtypeStruct((Bp, 1), jnp.float32),
        grid=(Bp // Bt,),
        in_specs=[act_spec, act_spec, pad_spec] + [full_spec(w) for w in weights],
        out_specs=pl.BlockSpec((Bt, 1), lambda b: (b, 0)),
        compiler_params=pltpu.CompilerParams(
            dimension_semantics=("parallel",),
            vmem_limit_bytes=48 * 1024 * 1024),
    )(enc_in, dec_in, pad_keep, *weights)

    return out[:B]                                            # (B, 1)


# ----------------------------- parameter init / packing ----------------------
def _init_linear(key, fan_in, fan_out):
    kw, kb = jax.random.split(key)
    w = jax.random.normal(kw, (fan_in, fan_out), jnp.float32) * 0.05
    b = jax.random.normal(kb, (1, fan_out), jnp.float32) * 0.05
    return w, b


def _init_block_params(key, H=HIDDEN):
    keys = jax.random.split(key, 6)
    wq, bq = _init_linear(keys[0], H, H)
    wk, bk = _init_linear(keys[1], H, H)
    wv, bv = _init_linear(keys[2], H, H)
    wo, bo = _init_linear(keys[3], H, H)
    w1, b1 = _init_linear(keys[4], H, H)
    w2, b2 = _init_linear(keys[5], H, H)
    ln1g = jnp.ones((1, H), jnp.float32)
    ln1b = jnp.zeros((1, H), jnp.float32)
    ln2g = jnp.ones((1, H), jnp.float32)
    ln2b = jnp.zeros((1, H), jnp.float32)
    return (wq, bq, wk, bk, wv, bv, wo, bo,
            ln1g, ln1b, w1, b1, w2, b2, ln2g, ln2b)


def _pack_blocks(blocks, num_head=NUM_HEAD):
    """Pack per-block params into per-matrix slabs indexed by layer.
    QKV is fused into one (H, 3H) weight / (1, 3H) bias per layer, with the
    1/sqrt(dk) attention scale folded into the Q columns."""
    H = blocks[0][0].shape[0]
    dk = H // num_head
    scale = jnp.float32(1.0 / float(dk) ** 0.5)
    qkv_w, qkv_b, wo_w, ff1_w, ff2_w, vec_b = [], [], [], [], [], []
    for (wq, bq, wk, bk, wv, bv, wo, bo,
         ln1g, ln1b, w1, b1, w2, b2, ln2g, ln2b) in blocks:
        qkv_w.append(jnp.concatenate([wq * scale, wk, wv], axis=1))   # (H, 3H)
        qkv_b.append(jnp.concatenate([bq * scale, bk, bv], axis=1))   # (1, 3H)
        wo_w.append(wo)
        ff1_w.append(w1)
        ff2_w.append(w2)
        vec_b.append(jnp.stack(
            [bo.reshape(H), ln1g.reshape(H), ln1b.reshape(H),
             b1.reshape(H), b2.reshape(H),
             ln2g.reshape(H), ln2b.reshape(H)], axis=0))              # (7, H)
    return (jnp.stack(qkv_w), jnp.stack(qkv_b), jnp.stack(wo_w),
            jnp.stack(ff1_w), jnp.stack(ff2_w), jnp.stack(vec_b))


def init_saint_params(key):
    keys = jax.random.split(key, 6)
    pos_emb = jax.random.normal(keys[0], (SEQ_SIZE + 2, HIDDEN), jnp.float32) * 0.05
    pos_emb = pos_emb.at[PAD_INDEX].set(0.0)                  # padding_idx
    q_emb = jax.random.normal(keys[1], (QUESTION_NUM + 1, HIDDEN), jnp.float32) * 0.05
    q_emb = q_emb.at[PAD_INDEX].set(0.0)
    r_emb = jax.random.normal(keys[2], (2 + 2, HIDDEN), jnp.float32) * 0.05
    r_emb = r_emb.at[RPAD_INDEX].set(0.0)

    enc_blocks = [_init_block_params(k)
                  for k in jax.random.split(keys[3], NUM_ENC_LAYERS)]
    dec_blocks = [_init_block_params(k)
                  for k in jax.random.split(keys[4], NUM_DEC_LAYERS)]
    # Encoder layers occupy slab indices [0, n_enc); decoder [n_enc, n_enc+n_dec).
    qkv_w, qkv_b, wo_w, ff1_w, ff2_w, vec_b = _pack_blocks(enc_blocks + dec_blocks)

    pred_w = (jax.random.normal(keys[5], (HIDDEN, 1), jnp.float32) * 0.05
              ).reshape(1, HIDDEN)
    pred_b = jnp.zeros((1, 1), jnp.float32)
    return dict(pos_emb=pos_emb, q_emb=q_emb, r_emb=r_emb,
                qkv_w=qkv_w, qkv_b=qkv_b, wo_w=wo_w, ff1_w=ff1_w, ff2_w=ff2_w,
                vec_b=vec_b, pred_w=pred_w, pred_b=pred_b)


# ----------------------------- SAINT forward (glue + fused kernel) -----------
def _encoder_position_index(question_id, seq_len):
    # [0]*(L-n) + [1..n]  ->  max(0, j - (L-n) + 1)
    n = jnp.sum(question_id != PAD_INDEX, axis=-1)            # (B,)
    j = jnp.arange(seq_len)[None, :]
    return jnp.maximum(0, j - (seq_len - n)[:, None] + 1).astype(jnp.int32)


def _decoder_position_index(response_id, seq_len):
    # [0]*min(L-n, L-1) + [L+1] + [1..n-1]
    n = jnp.sum(response_id != RPAD_INDEX, axis=-1)           # (B,)
    z = jnp.minimum(seq_len - n, seq_len - 1)[:, None]
    j = jnp.arange(seq_len)[None, :]
    pos = jnp.where(j < z, 0, jnp.where(j == z, seq_len + 1, j - z))
    return pos.astype(jnp.int32)


def saint_forward(interaction_id, target_id, params):
    L = SEQ_SIZE
    gt = (interaction_id > QUESTION_NUM).astype(jnp.int32)

    question_id = interaction_id - QUESTION_NUM * gt
    question_id = jnp.concatenate([question_id[:, 1:], target_id], axis=-1)
    question_vector = params["q_emb"][question_id]
    position_index = _encoder_position_index(question_id, L)
    position_vector = params["pos_emb"][position_index]

    response_id = jnp.where(interaction_id == PAD_INDEX, RPAD_INDEX, gt)
    response_vector = params["r_emb"][response_id]
    response_position_index = _decoder_position_index(response_id, L)
    response_position_vector = params["pos_emb"][response_position_index]

    x = question_vector + position_vector                     # encoder input
    decoder_input = response_vector + response_position_vector

    # (B, 1, L) pad keep-row (1 keep / 0 pad); the causal part of the mask is
    # built inside the kernel, so only 8 values/sample are streamed.
    pad_keep = (question_id != PAD_INDEX).astype(jnp.float32)[:, None, :]

    return saint_fused_forward(x, decoder_input, pad_keep, params)  # (B, 1)


# ----------------------------- main -------------------------------------------
if __name__ == "__main__":
    key = jax.random.PRNGKey(0)
    k_params, k_int, k_tgt = jax.random.split(key, 3)

    params = init_saint_params(k_params)

    B = 2
    vals = jax.random.randint(k_int, (B, SEQ_SIZE), 1, 2 * QUESTION_NUM + 1)
    pad_counts = jnp.array([3, 1])                            # leading pads
    col = jnp.arange(SEQ_SIZE)[None, :]
    interaction_id = jnp.where(col < pad_counts[:, None], 0, vals).astype(jnp.int32)
    target_id = jax.random.randint(k_tgt, (B, 1), 1, QUESTION_NUM + 1).astype(jnp.int32)

    out = saint_forward(interaction_id, target_id, params)
    out = jax.block_until_ready(out)
    assert out.shape == (B, 1) and out.dtype == jnp.float32
    assert bool(jnp.all(jnp.isfinite(out)))
    print("KERNEL_OK")
</pallas_src>

<mosaic_0001>
module attributes {stable_mosaic.version = 11 : i64} {
  func.func @_saint_kernel(%arg0: i32, %arg1: memref<2x8x32xbf16, #tpu.memory_space<vmem>>, %arg2: memref<2x8x32xbf16, #tpu.memory_space<vmem>>, %arg3: memref<2x1x8xf32, #tpu.memory_space<vmem>>, %arg4: memref<4x32x96xf32, #tpu.memory_space<vmem>>, %arg5: memref<4x1x96xf32, #tpu.memory_space<vmem>>, %arg6: memref<4x32x32xf32, #tpu.memory_space<vmem>>, %arg7: memref<4x32x32xf32, #tpu.memory_space<vmem>>, %arg8: memref<4x32x32xf32, #tpu.memory_space<vmem>>, %arg9: memref<4x7x32xf32, #tpu.memory_space<vmem>>, %arg10: memref<1x32xf32, #tpu.memory_space<vmem>>, %arg11: memref<1x1xf32, #tpu.memory_space<vmem>>, %arg12: memref<2x1xf32, #tpu.memory_space<vmem>>) attributes {dimension_semantics = [#tpu.dimension_semantics<parallel>], iteration_bounds = array<i64: 1>, scalar_prefetch = 0 : i64, scratch_operands = 0 : i64, tpu.core_type = #tpu.core_type<tc>, window_params = [{transform_indices = @transform_0, window_bounds = array<i64: 2, 8, 32>}, {transform_indices = @transform_1, window_bounds = array<i64: 2, 8, 32>}, {transform_indices = @transform_2, window_bounds = array<i64: 2, 1, 8>}, {pipeline_mode = #tpu.pipeline_mode<synchronous>, transform_indices = @transform_3, window_bounds = array<i64: 4, 32, 96>}, {pipeline_mode = #tpu.pipeline_mode<synchronous>, transform_indices = @transform_4, window_bounds = array<i64: 4, 1, 96>}, {pipeline_mode = #tpu.pipeline_mode<synchronous>, transform_indices = @transform_5, window_bounds = array<i64: 4, 32, 32>}, {pipeline_mode = #tpu.pipeline_mode<synchronous>, transform_indices = @transform_6, window_bounds = array<i64: 4, 32, 32>}, {pipeline_mode = #tpu.pipeline_mode<synchronous>, transform_indices = @transform_7, window_bounds = array<i64: 4, 32, 32>}, {pipeline_mode = #tpu.pipeline_mode<synchronous>, transform_indices = @transform_8, window_bounds = array<i64: 4, 7, 32>}, {pipeline_mode = #tpu.pipeline_mode<synchronous>, transform_indices = @transform_9, window_bounds = array<i64: 1, 32>}, {pipeline_mode = #tpu.pipeline_mode<synchronous>, transform_indices = @transform_10, window_bounds = array<i64: 1, 1>}, {transform_indices = @transform_11, window_bounds = array<i64: 2, 1>}]} {
    %0 = tpu.iota {dimensions = array<i32: 1>} : vector<1x8x8xi32>
    %1 = tpu.iota {dimensions = array<i32: 2>} : vector<1x8x8xi32>
    %2 = arith.cmpi sle, %1, %0 : vector<1x8x8xi32>
    %3 = arith.extui %2 : vector<1x8x8xi1> to vector<1x8x8xi32>
    %4 = arith.sitofp %3 : vector<1x8x8xi32> to vector<1x8x8xf32>
    %c0 = arith.constant 0 : index
    %c0_0 = arith.constant 0 : index
    %c0_1 = arith.constant 0 : index
    %5 = vector.load %arg3[%c0, %c0_0, %c0_1] : memref<2x1x8xf32, #tpu.memory_space<vmem>>, vector<2x1x8xf32>
    %6 = vector.broadcast %5 : vector<2x1x8xf32> to vector<2x8x8xf32>
    %7 = vector.broadcast %4 : vector<1x8x8xf32> to vector<2x8x8xf32>
    %8 = arith.mulf %6, %7 : vector<2x8x8xf32>
    %cst = arith.constant 1.000000e+00 : f32
    %9 = vector.broadcast %cst : f32 to vector<2x8x8xf32>
    %10 = arith.subf %8, %9 : vector<2x8x8xf32>
    %cst_2 = arith.constant 1.000000e+09 : f32
    %11 = vector.broadcast %cst_2 : f32 to vector<2x8x8xf32>
    %12 = arith.mulf %10, %11 : vector<2x8x8xf32>
    %c0_3 = arith.constant 0 : index
    %c0_4 = arith.constant 0 : index
    %c0_5 = arith.constant 0 : index
    %13 = vector.load %arg1[%c0_3, %c0_4, %c0_5] : memref<2x8x32xbf16, #tpu.memory_space<vmem>>, vector<2x8x32xbf16>
    %14 = arith.extf %13 : vector<2x8x32xbf16> to vector<2x8x32xf32>
    %c0_6 = arith.constant 0 : index
    %c0_7 = arith.constant 0 : index
    %c0_8 = arith.constant 0 : index
    %15 = vector.load %arg9[%c0_6, %c0_7, %c0_8] : memref<4x7x32xf32, #tpu.memory_space<vmem>>, vector<1x7x32xf32>
    %16 = vector.shape_cast %15 : vector<1x7x32xf32> to vector<7x32xf32>
    %17 = vector.extract_strided_slice %16 {offsets = [0, 0], sizes = [1, 32], strides = [1, 1]} : vector<7x32xf32> to vector<1x32xf32>
    %18 = vector.extract_strided_slice %16 {offsets = [1, 0], sizes = [1, 32], strides = [1, 1]} : vector<7x32xf32> to vector<1x32xf32>
    %19 = vector.extract_strided_slice %16 {offsets = [2, 0], sizes = [1, 32], strides = [1, 1]} : vector<7x32xf32> to vector<1x32xf32>
    %20 = vector.extract_strided_slice %16 {offsets = [3, 0], sizes = [1, 32], strides = [1, 1]} : vector<7x32xf32> to vector<1x32xf32>
    %21 = vector.extract_strided_slice %16 {offsets = [4, 0], sizes = [1, 32], strides = [1, 1]} : vector<7x32xf32> to vector<1x32xf32>
    %22 = vector.extract_strided_slice %16 {offsets = [5, 0], sizes = [1, 32], strides = [1, 1]} : vector<7x32xf32> to vector<1x32xf32>
    %23 = vector.extract_strided_slice %16 {offsets = [6, 0], sizes = [1, 32], strides = [1, 1]} : vector<7x32xf32> to vector<1x32xf32>
    %24 = vector.shape_cast %14 : vector<2x8x32xf32> to vector<16x32xf32>
    %25 = vector.shape_cast %14 : vector<2x8x32xf32> to vector<16x32xf32>
    %c0_9 = arith.constant 0 : index
    %c0_10 = arith.constant 0 : index
    %c0_11 = arith.constant 0 : index
    %26 = vector.load %arg4[%c0_9, %c0_10, %c0_11] : memref<4x32x96xf32, #tpu.memory_space<vmem>>, vector<1x32x96xf32>
    %27 = vector.shape_cast %26 : vector<1x32x96xf32> to vector<32x96xf32>
    %c0_12 = arith.constant 0 : index
    %c0_13 = arith.constant 0 : index
    %c0_14 = arith.constant 0 : index
    %28 = vector.load %arg5[%c0_12, %c0_13, %c0_14] : memref<4x1x96xf32, #tpu.memory_space<vmem>>, vector<1x1x96xf32>
    %29 = vector.shape_cast %28 : vector<1x1x96xf32> to vector<1x96xf32>
    %cst_15 = arith.constant dense<0.000000e+00> : vector<16x96xf32>
    %30 = tpu.matmul %24, %27, %cst_15 {dimension_numbers = #tpu.dot_dimension_numbers<[1], [0], [0], [1], [0, 0, 1, 1], [], []>} : vector<16x32xf32>, vector<32x96xf32>, vector<16x96xf32> -> vector<16x96xf32>
    %31 = vector.broadcast %29 : vector<1x96xf32> to vector<16x96xf32>
    %32 = arith.addf %30, %31 : vector<16x96xf32>
    %33 = vector.shape_cast %32 : vector<16x96xf32> to vector<2x8x96xf32>
    %c0_16 = arith.constant 0 : index
    %c0_17 = arith.constant 0 : index
    %c0_18 = arith.constant 0 : index
    %34 = vector.load %arg6[%c0_16, %c0_17, %c0_18] : memref<4x32x32xf32, #tpu.memory_space<vmem>>, vector<1x32x32xf32>
    %35 = vector.shape_cast %34 : vector<1x32x32xf32> to vector<32x32xf32>
    %cst_19 = arith.constant 0.000000e+00 : f32
    %36 = vector.broadcast %cst_19 : f32 to vector<16x32xf32>
    %37 = vector.extract_strided_slice %33 {offsets = [0, 0, 0], sizes = [2, 8, 8], strides = [1, 1, 1]} : vector<2x8x96xf32> to vector<2x8x8xf32>
    %38 = vector.extract_strided_slice %33 {offsets = [0, 0, 32], sizes = [2, 8, 8], strides = [1, 1, 1]} : vector<2x8x96xf32> to vector<2x8x8xf32>
    %39 = vector.extract_strided_slice %33 {offsets = [0, 0, 64], sizes = [2, 8, 8], strides = [1, 1, 1]} : vector<2x8x96xf32> to vector<2x8x8xf32>
    "tpu.trace_start"() <{level = 10 : i32, message = "bqd,bkd->bqk"}> : () -> ()
    %cst_20 = arith.constant dense<0.000000e+00> : vector<2x8x8xf32>
    %40 = tpu.matmul %37, %38, %cst_20 {dimension_numbers = #tpu.dot_dimension_numbers<[2], [2], [1], [1], [0, 0, 0, 1, 1, 1], [0], [0]>} : vector<2x8x8xf32>, vector<2x8x8xf32>, vector<2x8x8xf32> -> vector<2x8x8xf32>
    "tpu.trace_stop"() : () -> ()
    %41 = arith.addf %40, %12 : vector<2x8x8xf32>
    %cst_21 = arith.constant dense<0xFF800000> : vector<2x8xf32>
    %42 = vector.multi_reduction <maximumf>, %41, %cst_21 [2] : vector<2x8x8xf32> to vector<2x8xf32>
    %43 = vector.shape_cast %42 : vector<2x8xf32> to vector<2x8x1xf32>
    %44 = vector.broadcast %43 : vector<2x8x1xf32> to vector<2x8x8xf32>
    %45 = arith.subf %41, %44 : vector<2x8x8xf32>
    %46 = math.exp %45 : vector<2x8x8xf32>
    %cst_22 = arith.constant dense<0.000000e+00> : vector<2x8xf32>
    %47 = vector.multi_reduction <add>, %46, %cst_22 [2] : vector<2x8x8xf32> to vector<2x8xf32>
    %48 = vector.shape_cast %47 : vector<2x8xf32> to vector<2x8x1xf32>
    %49 = tpu.reciprocal %48 {approx = true} : vector<2x8x1xf32> -> vector<2x8x1xf32>
    %50 = vector.broadcast %49 : vector<2x8x1xf32> to vector<2x8x8xf32>
    %51 = arith.mulf %46, %50 : vector<2x8x8xf32>
    "tpu.trace_start"() <{level = 10 : i32, message = "bqk,bkd->bqd"}> : () -> ()
    %cst_23 = arith.constant dense<0.000000e+00> : vector<2x8x8xf32>
    %52 = tpu.matmul %51, %39, %cst_23 {dimension_numbers = #tpu.dot_dimension_numbers<[2], [1], [1], [2], [0, 0, 0, 1, 1, 2], [0], [0]>} : vector<2x8x8xf32>, vector<2x8x8xf32>, vector<2x8x8xf32> -> vector<2x8x8xf32>
    "tpu.trace_stop"() : () -> ()
    %53 = vector.shape_cast %52 : vector<2x8x8xf32> to vector<16x8xf32>
    %54 = vector.extract_strided_slice %35 {offsets = [0, 0], sizes = [8, 32], strides = [1, 1]} : vector<32x32xf32> to vector<8x32xf32>
    %cst_24 = arith.constant dense<0.000000e+00> : vector<16x32xf32>
    %55 = tpu.matmul %53, %54, %cst_24 {dimension_numbers = #tpu.dot_dimension_numbers<[1], [0], [0], [1], [0, 0, 1, 1], [], []>} : vector<16x8xf32>, vector<8x32xf32>, vector<16x32xf32> -> vector<16x32xf32>
    %56 = arith.addf %36, %55 : vector<16x32xf32>
    %57 = vector.extract_strided_slice %33 {offsets = [0, 0, 8], sizes = [2, 8, 8], strides = [1, 1, 1]} : vector<2x8x96xf32> to vector<2x8x8xf32>
    %58 = vector.extract_strided_slice %33 {offsets = [0, 0, 40], sizes = [2, 8, 8], strides = [1, 1, 1]} : vector<2x8x96xf32> to vector<2x8x8xf32>
    %59 = vector.extract_strided_slice %33 {offsets = [0, 0, 72], sizes = [2, 8, 8], strides = [1, 1, 1]} : vector<2x8x96xf32> to vector<2x8x8xf32>
    "tpu.trace_start"() <{level = 10 : i32, message = "bqd,bkd->bqk"}> : () -> ()
    %cst_25 = arith.constant dense<0.000000e+00> : vector<2x8x8xf32>
    %60 = tpu.matmul %57, %58, %cst_25 {dimension_numbers = #tpu.dot_dimension_numbers<[2], [2], [1], [1], [0, 0, 0, 1, 1, 1], [0], [0]>} : vector<2x8x8xf32>, vector<2x8x8xf32>, vector<2x8x8xf32> -> vector<2x8x8xf32>
    "tpu.trace_stop"() : () -> ()
    %61 = arith.addf %60, %12 : vector<2x8x8xf32>
    %cst_26 = arith.constant dense<0xFF800000> : vector<2x8xf32>
    %62 = vector.multi_reduction <maximumf>, %61, %cst_26 [2] : vector<2x8x8xf32> to vector<2x8xf32>
    %63 = vector.shape_cast %62 : vector<2x8xf32> to vector<2x8x1xf32>
    %64 = vector.broadcast %63 : vector<2x8x1xf32> to vector<2x8x8xf32>
    %65 = arith.subf %61, %64 : vector<2x8x8xf32>
    %66 = math.exp %65 : vector<2x8x8xf32>
    %cst_27 = arith.constant dense<0.000000e+00> : vector<2x8xf32>
    %67 = vector.multi_reduction <add>, %66, %cst_27 [2] : vector<2x8x8xf32> to vector<2x8xf32>
    %68 = vector.shape_cast %67 : vector<2x8xf32> to vector<2x8x1xf32>
    %69 = tpu.reciprocal %68 {approx = true} : vector<2x8x1xf32> -> vector<2x8x1xf32>
    %70 = vector.broadcast %69 : vector<2x8x1xf32> to vector<2x8x8xf32>
    %71 = arith.mulf %66, %70 : vector<2x8x8xf32>
    "tpu.trace_start"() <{level = 10 : i32, message = "bqk,bkd->bqd"}> : () -> ()
    %cst_28 = arith.constant dense<0.000000e+00> : vector<2x8x8xf32>
    %72 = tpu.matmul %71, %59, %cst_28 {dimension_numbers = #tpu.dot_dimension_numbers<[2], [1], [1], [2], [0, 0, 0, 1, 1, 2], [0], [0]>} : vector<2x8x8xf32>, vector<2x8x8xf32>, vector<2x8x8xf32> -> vector<2x8x8xf32>
    "tpu.trace_stop"() : () -> ()
    %73 = vector.shape_cast %72 : vector<2x8x8xf32> to vector<16x8xf32>
    %74 = vector.extract_strided_slice %35 {offsets = [8, 0], sizes = [8, 32], strides = [1, 1]} : vector<32x32xf32> to vector<8x32xf32>
    %cst_29 = arith.constant dense<0.000000e+00> : vector<16x32xf32>
    %75 = tpu.matmul %73, %74, %cst_29 {dimension_numbers = #tpu.dot_dimension_numbers<[1], [0], [0], [1], [0, 0, 1, 1], [], []>} : vector<16x8xf32>, vector<8x32xf32>, vector<16x32xf32> -> vector<16x32xf32>
    %76 = arith.addf %56, %75 : vector<16x32xf32>
    %77 = vector.extract_strided_slice %33 {offsets = [0, 0, 16], sizes = [2, 8, 8], strides = [1, 1, 1]} : vector<2x8x96xf32> to vector<2x8x8xf32>
    %78 = vector.extract_strided_slice %33 {offsets = [0, 0, 48], sizes = [2, 8, 8], strides = [1, 1, 1]} : vector<2x8x96xf32> to vector<2x8x8xf32>
    %79 = vector.extract_strided_slice %33 {offsets = [0, 0, 80], sizes = [2, 8, 8], strides = [1, 1, 1]} : vector<2x8x96xf32> to vector<2x8x8xf32>
    "tpu.trace_start"() <{level = 10 : i32, message = "bqd,bkd->bqk"}> : () -> ()
    %cst_30 = arith.constant dense<0.000000e+00> : vector<2x8x8xf32>
    %80 = tpu.matmul %77, %78, %cst_30 {dimension_numbers = #tpu.dot_dimension_numbers<[2], [2], [1], [1], [0, 0, 0, 1, 1, 1], [0], [0]>} : vector<2x8x8xf32>, vector<2x8x8xf32>, vector<2x8x8xf32> -> vector<2x8x8xf32>
    "tpu.trace_stop"() : () -> ()
    %81 = arith.addf %80, %12 : vector<2x8x8xf32>
    %cst_31 = arith.constant dense<0xFF800000> : vector<2x8xf32>
    %82 = vector.multi_reduction <maximumf>, %81, %cst_31 [2] : vector<2x8x8xf32> to vector<2x8xf32>
    %83 = vector.shape_cast %82 : vector<2x8xf32> to vector<2x8x1xf32>
    %84 = vector.broadcast %83 : vector<2x8x1xf32> to vector<2x8x8xf32>
    %85 = arith.subf %81, %84 : vector<2x8x8xf32>
    %86 = math.exp %85 : vector<2x8x8xf32>
    %cst_32 = arith.constant dense<0.000000e+00> : vector<2x8xf32>
    %87 = vector.multi_reduction <add>, %86, %cst_32 [2] : vector<2x8x8xf32> to vector<2x8xf32>
    %88 = vector.shape_cast %87 : vector<2x8xf32> to vector<2x8x1xf32>
    %89 = tpu.reciprocal %88 {approx = true} : vector<2x8x1xf32> -> vector<2x8x1xf32>
    %90 = vector.broadcast %89 : vector<2x8x1xf32> to vector<2x8x8xf32>
    %91 = arith.mulf %86, %90 : vector<2x8x8xf32>
    "tpu.trace_start"() <{level = 10 : i32, message = "bqk,bkd->bqd"}> : () -> ()
    %cst_33 = arith.constant dense<0.000000e+00> : vector<2x8x8xf32>
    %92 = tpu.matmul %91, %79, %cst_33 {dimension_numbers = #tpu.dot_dimension_numbers<[2], [1], [1], [2], [0, 0, 0, 1, 1, 2], [0], [0]>} : vector<2x8x8xf32>, vector<2x8x8xf32>, vector<2x8x8xf32> -> vector<2x8x8xf32>
    "tpu.trace_stop"() : () -> ()
    %93 = vector.shape_cast %92 : vector<2x8x8xf32> to vector<16x8xf32>
    %94 = vector.extract_strided_slice %35 {offsets = [16, 0], sizes = [8, 32], strides = [1, 1]} : vector<32x32xf32> to vector<8x32xf32>
    %cst_34 = arith.constant dense<0.000000e+00> : vector<16x32xf32>
    %95 = tpu.matmul %93, %94, %cst_34 {dimension_numbers = #tpu.dot_dimension_numbers<[1], [0], [0], [1], [0, 0, 1, 1], [], []>} : vector<16x8xf32>, vector<8x32xf32>, vector<16x32xf32> -> vector<16x32xf32>
    %96 = arith.addf %76, %95 : vector<16x32xf32>
    %97 = vector.extract_strided_slice %33 {offsets = [0, 0, 24], sizes = [2, 8, 8], strides = [1, 1, 1]} : vector<2x8x96xf32> to vector<2x8x8xf32>
    %98 = vector.extract_strided_slice %33 {offsets = [0, 0, 56], sizes = [2, 8, 8], strides = [1, 1, 1]} : vector<2x8x96xf32> to vector<2x8x8xf32>
    %99 = vector.extract_strided_slice %33 {offsets = [0, 0, 88], sizes = [2, 8, 8], strides = [1, 1, 1]} : vector<2x8x96xf32> to vector<2x8x8xf32>
    "tpu.trace_start"() <{level = 10 : i32, message = "bqd,bkd->bqk"}> : () -> ()
    %cst_35 = arith.constant dense<0.000000e+00> : vector<2x8x8xf32>
    %100 = tpu.matmul %97, %98, %cst_35 {dimension_numbers = #tpu.dot_dimension_numbers<[2], [2], [1], [1], [0, 0, 0, 1, 1, 1], [0], [0]>} : vector<2x8x8xf32>, vector<2x8x8xf32>, vector<2x8x8xf32> -> vector<2x8x8xf32>
    "tpu.trace_stop"() : () -> ()
    %101 = arith.addf %100, %12 : vector<2x8x8xf32>
    %cst_36 = arith.constant dense<0xFF800000> : vector<2x8xf32>
    %102 = vector.multi_reduction <maximumf>, %101, %cst_36 [2] : vector<2x8x8xf32> to vector<2x8xf32>
    %103 = vector.shape_cast %102 : vector<2x8xf32> to vector<2x8x1xf32>
    %104 = vector.broadcast %103 : vector<2x8x1xf32> to vector<2x8x8xf32>
    %105 = arith.subf %101, %104 : vector<2x8x8xf32>
    %106 = math.exp %105 : vector<2x8x8xf32>
    %cst_37 = arith.constant dense<0.000000e+00> : vector<2x8xf32>
    %107 = vector.multi_reduction <add>, %106, %cst_37 [2] : vector<2x8x8xf32> to vector<2x8xf32>
    %108 = vector.shape_cast %107 : vector<2x8xf32> to vector<2x8x1xf32>
    %109 = tpu.reciprocal %108 {approx = true} : vector<2x8x1xf32> -> vector<2x8x1xf32>
    %110 = vector.broadcast %109 : vector<2x8x1xf32> to vector<2x8x8xf32>
    %111 = arith.mulf %106, %110 : vector<2x8x8xf32>
    "tpu.trace_start"() <{level = 10 : i32, message = "bqk,bkd->bqd"}> : () -> ()
    %cst_38 = arith.constant dense<0.000000e+00> : vector<2x8x8xf32>
    %112 = tpu.matmul %111, %99, %cst_38 {dimension_numbers = #tpu.dot_dimension_numbers<[2], [1], [1], [2], [0, 0, 0, 1, 1, 2], [0], [0]>} : vector<2x8x8xf32>, vector<2x8x8xf32>, vector<2x8x8xf32> -> vector<2x8x8xf32>
    "tpu.trace_stop"() : () -> ()
    %113 = vector.shape_cast %112 : vector<2x8x8xf32> to vector<16x8xf32>
    %114 = vector.extract_strided_slice %35 {offsets = [24, 0], sizes = [8, 32], strides = [1, 1]} : vector<32x32xf32> to vector<8x32xf32>
    %cst_39 = arith.constant dense<0.000000e+00> : vector<16x32xf32>
    %115 = tpu.matmul %113, %114, %cst_39 {dimension_numbers = #tpu.dot_dimension_numbers<[1], [0], [0], [1], [0, 0, 1, 1], [], []>} : vector<16x8xf32>, vector<8x32xf32>, vector<16x32xf32> -> vector<16x32xf32>
    %116 = arith.addf %96, %115 : vector<16x32xf32>
    %117 = vector.broadcast %17 : vector<1x32xf32> to vector<16x32xf32>
    %118 = arith.addf %116, %117 : vector<16x32xf32>
    %119 = arith.addf %25, %118 : vector<16x32xf32>
    %cst_40 = arith.constant dense<0.000000e+00> : vector<16xf32>
    %120 = vector.multi_reduction <add>, %119, %cst_40 [1] : vector<16x32xf32> to vector<16xf32>
    %121 = vector.shape_cast %120 : vector<16xf32> to vector<16x1xf32>
    %cst_41 = arith.constant 3.200000e+01 : f32
    %122 = vector.broadcast %cst_41 : f32 to vector<16x1xf32>
    %123 = arith.divf %121, %122 : vector<16x1xf32>
    %124 = vector.broadcast %123 : vector<16x1xf32> to vector<16x32xf32>
    %125 = arith.subf %119, %124 : vector<16x32xf32>
    %126 = arith.mulf %125, %125 : vector<16x32xf32>
    %cst_42 = arith.constant dense<0.000000e+00> : vector<16xf32>
    %127 = vector.multi_reduction <add>, %126, %cst_42 [1] : vector<16x32xf32> to vector<16xf32>
    %128 = vector.shape_cast %127 : vector<16xf32> to vector<16x1xf32>
    %cst_43 = arith.constant 3.200000e+01 : f32
    %129 = vector.broadcast %cst_43 : f32 to vector<16x1xf32>
    %130 = arith.divf %128, %129 : vector<16x1xf32>
    %131 = vector.broadcast %123 : vector<16x1xf32> to vector<16x32xf32>
    %132 = arith.subf %119, %131 : vector<16x32xf32>
    %cst_44 = arith.constant 9.99999993E-9 : f32
    %133 = vector.broadcast %cst_44 : f32 to vector<16x1xf32>
    %134 = arith.addf %130, %133 : vector<16x1xf32>
    %135 = math.rsqrt %134 : vector<16x1xf32>
    %136 = vector.broadcast %135 : vector<16x1xf32> to vector<16x32xf32>
    %137 = arith.mulf %132, %136 : vector<16x32xf32>
    %138 = vector.broadcast %18 : vector<1x32xf32> to vector<16x32xf32>
    %139 = arith.mulf %137, %138 : vector<16x32xf32>
    %140 = vector.broadcast %19 : vector<1x32xf32> to vector<16x32xf32>
    %141 = arith.addf %139, %140 : vector<16x32xf32>
    %c0_45 = arith.constant 0 : index
    %c0_46 = arith.constant 0 : index
    %c0_47 = arith.constant 0 : index
    %142 = vector.load %arg7[%c0_45, %c0_46, %c0_47] : memref<4x32x32xf32, #tpu.memory_space<vmem>>, vector<1x32x32xf32>
    %143 = vector.shape_cast %142 : vector<1x32x32xf32> to vector<32x32xf32>
    %cst_48 = arith.constant dense<0.000000e+00> : vector<16x32xf32>
    %144 = tpu.matmul %141, %143, %cst_48 {dimension_numbers = #tpu.dot_dimension_numbers<[1], [0], [0], [1], [0, 0, 1, 1], [], []>} : vector<16x32xf32>, vector<32x32xf32>, vector<16x32xf32> -> vector<16x32xf32>
    %145 = vector.broadcast %20 : vector<1x32xf32> to vector<16x32xf32>
    %146 = arith.addf %144, %145 : vector<16x32xf32>
    %cst_49 = arith.constant 0.000000e+00 : f32
    %147 = vector.broadcast %cst_49 : f32 to vector<16x32xf32>
    %148 = arith.maximumf %146, %147 : vector<16x32xf32>
    %c0_50 = arith.constant 0 : index
    %c0_51 = arith.constant 0 : index
    %c0_52 = arith.constant 0 : index
    %149 = vector.load %arg8[%c0_50, %c0_51, %c0_52] : memref<4x32x32xf32, #tpu.memory_space<vmem>>, vector<1x32x32xf32>
    %150 = vector.shape_cast %149 : vector<1x32x32xf32> to vector<32x32xf32>
    %cst_53 = arith.constant dense<0.000000e+00> : vector<16x32xf32>
    %151 = tpu.matmul %148, %150, %cst_53 {dimension_numbers = #tpu.dot_dimension_numbers<[1], [0], [0], [1], [0, 0, 1, 1], [], []>} : vector<16x32xf32>, vector<32x32xf32>, vector<16x32xf32> -> vector<16x32xf32>
    %152 = vector.broadcast %21 : vector<1x32xf32> to vector<16x32xf32>
    %153 = arith.addf %151, %152 : vector<16x32xf32>
    %154 = arith.addf %141, %153 : vector<16x32xf32>
    %cst_54 = arith.constant dense<0.000000e+00> : vector<16xf32>
    %155 = vector.multi_reduction <add>, %154, %cst_54 [1] : vector<16x32xf32> to vector<16xf32>
    %156 = vector.shape_cast %155 : vector<16xf32> to vector<16x1xf32>
    %cst_55 = arith.constant 3.200000e+01 : f32
    %157 = vector.broadcast %cst_55 : f32 to vector<16x1xf32>
    %158 = arith.divf %156, %157 : vector<16x1xf32>
    %159 = vector.broadcast %158 : vector<16x1xf32> to vector<16x32xf32>
    %160 = arith.subf %154, %159 : vector<16x32xf32>
    %161 = arith.mulf %160, %160 : vector<16x32xf32>
    %cst_56 = arith.constant dense<0.000000e+00> : vector<16xf32>
    %162 = vector.multi_reduction <add>, %161, %cst_56 [1] : vector<16x32xf32> to vector<16xf32>
    %163 = vector.shape_cast %162 : vector<16xf32> to vector<16x1xf32>
    %cst_57 = arith.constant 3.200000e+01 : f32
    %164 = vector.broadcast %cst_57 : f32 to vector<16x1xf32>
    %165 = arith.divf %163, %164 : vector<16x1xf32>
    %166 = vector.broadcast %158 : vector<16x1xf32> to vector<16x32xf32>
    %167 = arith.subf %154, %166 : vector<16x32xf32>
    %cst_58 = arith.constant 9.99999993E-9 : f32
    %168 = vector.broadcast %cst_58 : f32 to vector<16x1xf32>
    %169 = arith.addf %165, %168 : vector<16x1xf32>
    %170 = math.rsqrt %169 : vector<16x1xf32>
    %171 = vector.broadcast %170 : vector<16x1xf32> to vector<16x32xf32>
    %172 = arith.mulf %167, %171 : vector<16x32xf32>
    %173 = vector.broadcast %22 : vector<1x32xf32> to vector<16x32xf32>
    %174 = arith.mulf %172, %173 : vector<16x32xf32>
    %175 = vector.broadcast %23 : vector<1x32xf32> to vector<16x32xf32>
    %176 = arith.addf %174, %175 : vector<16x32xf32>
    %177 = vector.shape_cast %176 : vector<16x32xf32> to vector<2x8x32xf32>
    %c1 = arith.constant 1 : index
    %c0_59 = arith.constant 0 : index
    %c0_60 = arith.constant 0 : index
    %178 = vector.load %arg9[%c1, %c0_59, %c0_60] : memref<4x7x32xf32, #tpu.memory_space<vmem>>, vector<1x7x32xf32>
    %179 = vector.shape_cast %178 : vector<1x7x32xf32> to vector<7x32xf32>
    %180 = vector.extract_strided_slice %179 {offsets = [0, 0], sizes = [1, 32], strides = [1, 1]} : vector<7x32xf32> to vector<1x32xf32>
    %181 = vector.extract_strided_slice %179 {offsets = [1, 0], sizes = [1, 32], strides = [1, 1]} : vector<7x32xf32> to vector<1x32xf32>
    %182 = vector.extract_strided_slice %179 {offsets = [2, 0], sizes = [1, 32], strides = [1, 1]} : vector<7x32xf32> to vector<1x32xf32>
    %183 = vector.extract_strided_slice %179 {offsets = [3, 0], sizes = [1, 32], strides = [1, 1]} : vector<7x32xf32> to vector<1x32xf32>
    %184 = vector.extract_strided_slice %179 {offsets = [4, 0], sizes = [1, 32], strides = [1, 1]} : vector<7x32xf32> to vector<1x32xf32>
    %185 = vector.extract_strided_slice %179 {offsets = [5, 0], sizes = [1, 32], strides = [1, 1]} : vector<7x32xf32> to vector<1x32xf32>
    %186 = vector.extract_strided_slice %179 {offsets = [6, 0], sizes = [1, 32], strides = [1, 1]} : vector<7x32xf32> to vector<1x32xf32>
    %187 = vector.shape_cast %177 : vector<2x8x32xf32> to vector<16x32xf32>
    %188 = vector.shape_cast %177 : vector<2x8x32xf32> to vector<16x32xf32>
    %c1_61 = arith.constant 1 : index
    %c0_62 = arith.constant 0 : index
    %c0_63 = arith.constant 0 : index
    %189 = vector.load %arg4[%c1_61, %c0_62, %c0_63] : memref<4x32x96xf32, #tpu.memory_space<vmem>>, vector<1x32x96xf32>
    %190 = vector.shape_cast %189 : vector<1x32x96xf32> to vector<32x96xf32>
    %c1_64 = arith.constant 1 : index
    %c0_65 = arith.constant 0 : index
    %c0_66 = arith.constant 0 : index
    %191 = vector.load %arg5[%c1_64, %c0_65, %c0_66] : memref<4x1x96xf32, #tpu.memory_space<vmem>>, vector<1x1x96xf32>
    %192 = vector.shape_cast %191 : vector<1x1x96xf32> to vector<1x96xf32>
    %cst_67 = arith.constant dense<0.000000e+00> : vector<16x96xf32>
    %193 = tpu.matmul %187, %190, %cst_67 {dimension_numbers = #tpu.dot_dimension_numbers<[1], [0], [0], [1], [0, 0, 1, 1], [], []>} : vector<16x32xf32>, vector<32x96xf32>, vector<16x96xf32> -> vector<16x96xf32>
    %194 = vector.broadcast %192 : vector<1x96xf32> to vector<16x96xf32>
    %195 = arith.addf %193, %194 : vector<16x96xf32>
    %196 = vector.shape_cast %195 : vector<16x96xf32> to vector<2x8x96xf32>
    %c1_68 = arith.constant 1 : index
    %c0_69 = arith.constant 0 : index
    %c0_70 = arith.constant 0 : index
    %197 = vector.load %arg6[%c1_68, %c0_69, %c0_70] : memref<4x32x32xf32, #tpu.memory_space<vmem>>, vector<1x32x32xf32>
    %198 = vector.shape_cast %197 : vector<1x32x32xf32> to vector<32x32xf32>
    %cst_71 = arith.constant 0.000000e+00 : f32
    %199 = vector.broadcast %cst_71 : f32 to vector<16x32xf32>
    %200 = vector.extract_strided_slice %196 {offsets = [0, 0, 0], sizes = [2, 8, 8], strides = [1, 1, 1]} : vector<2x8x96xf32> to vector<2x8x8xf32>
    %201 = vector.extract_strided_slice %196 {offsets = [0, 0, 32], sizes = [2, 8, 8], strides = [1, 1, 1]} : vector<2x8x96xf32> to vector<2x8x8xf32>
    %202 = vector.extract_strided_slice %196 {offsets = [0, 0, 64], sizes = [2, 8, 8], strides = [1, 1, 1]} : vector<2x8x96xf32> to vector<2x8x8xf32>
    "tpu.trace_start"() <{level = 10 : i32, message = "bqd,bkd->bqk"}> : () -> ()
    %cst_72 = arith.constant dense<0.000000e+00> : vector<2x8x8xf32>
    %203 = tpu.matmul %200, %201, %cst_72 {dimension_numbers = #tpu.dot_dimension_numbers<[2], [2], [1], [1], [0, 0, 0, 1, 1, 1], [0], [0]>} : vector<2x8x8xf32>, vector<2x8x8xf32>, vector<2x8x8xf32> -> vector<2x8x8xf32>
    "tpu.trace_stop"() : () -> ()
    %204 = arith.addf %203, %12 : vector<2x8x8xf32>
    %cst_73 = arith.constant dense<0xFF800000> : vector<2x8xf32>
    %205 = vector.multi_reduction <maximumf>, %204, %cst_73 [2] : vector<2x8x8xf32> to vector<2x8xf32>
    %206 = vector.shape_cast %205 : vector<2x8xf32> to vector<2x8x1xf32>
    %207 = vector.broadcast %206 : vector<2x8x1xf32> to vector<2x8x8xf32>
    %208 = arith.subf %204, %207 : vector<2x8x8xf32>
    %209 = math.exp %208 : vector<2x8x8xf32>
    %cst_74 = arith.constant dense<0.000000e+00> : vector<2x8xf32>
    %210 = vector.multi_reduction <add>, %209, %cst_74 [2] : vector<2x8x8xf32> to vector<2x8xf32>
    %211 = vector.shape_cast %210 : vector<2x8xf32> to vector<2x8x1xf32>
    %212 = tpu.reciprocal %211 {approx = true} : vector<2x8x1xf32> -> vector<2x8x1xf32>
    %213 = vector.broadcast %212 : vector<2x8x1xf32> to vector<2x8x8xf32>
    %214 = arith.mulf %209, %213 : vector<2x8x8xf32>
    "tpu.trace_start"() <{level = 10 : i32, message = "bqk,bkd->bqd"}> : () -> ()
    %cst_75 = arith.constant dense<0.000000e+00> : vector<2x8x8xf32>
    %215 = tpu.matmul %214, %202, %cst_75 {dimension_numbers = #tpu.dot_dimension_numbers<[2], [1], [1], [2], [0, 0, 0, 1, 1, 2], [0], [0]>} : vector<2x8x8xf32>, vector<2x8x8xf32>, vector<2x8x8xf32> -> vector<2x8x8xf32>
    "tpu.trace_stop"() : () -> ()
    %216 = vector.shape_cast %215 : vector<2x8x8xf32> to vector<16x8xf32>
    %217 = vector.extract_strided_slice %198 {offsets = [0, 0], sizes = [8, 32], strides = [1, 1]} : vector<32x32xf32> to vector<8x32xf32>
    %cst_76 = arith.constant dense<0.000000e+00> : vector<16x32xf32>
    %218 = tpu.matmul %216, %217, %cst_76 {dimension_numbers = #tpu.dot_dimension_numbers<[1], [0], [0], [1], [0, 0, 1, 1], [], []>} : vector<16x8xf32>, vector<8x32xf32>, vector<16x32xf32> -> vector<16x32xf32>
    %219 = arith.addf %199, %218 : vector<16x32xf32>
    %220 = vector.extract_strided_slice %196 {offsets = [0, 0, 8], sizes = [2, 8, 8], strides = [1, 1, 1]} : vector<2x8x96xf32> to vector<2x8x8xf32>
    %221 = vector.extract_strided_slice %196 {offsets = [0, 0, 40], sizes = [2, 8, 8], strides = [1, 1, 1]} : vector<2x8x96xf32> to vector<2x8x8xf32>
    %222 = vector.extract_strided_slice %196 {offsets = [0, 0, 72], sizes = [2, 8, 8], strides = [1, 1, 1]} : vector<2x8x96xf32> to vector<2x8x8xf32>
    "tpu.trace_start"() <{level = 10 : i32, message = "bqd,bkd->bqk"}> : () -> ()
    %cst_77 = arith.constant dense<0.000000e+00> : vector<2x8x8xf32>
    %223 = tpu.matmul %220, %221, %cst_77 {dimension_numbers = #tpu.dot_dimension_numbers<[2], [2], [1], [1], [0, 0, 0, 1, 1, 1], [0], [0]>} : vector<2x8x8xf32>, vector<2x8x8xf32>, vector<2x8x8xf32> -> vector<2x8x8xf32>
    "tpu.trace_stop"() : () -> ()
    %224 = arith.addf %223, %12 : vector<2x8x8xf32>
    %cst_78 = arith.constant dense<0xFF800000> : vector<2x8xf32>
    %225 = vector.multi_reduction <maximumf>, %224, %cst_78 [2] : vector<2x8x8xf32> to vector<2x8xf32>
    %226 = vector.shape_cast %225 : vector<2x8xf32> to vector<2x8x1xf32>
    %227 = vector.broadcast %226 : vector<2x8x1xf32> to vector<2x8x8xf32>
    %228 = arith.subf %224, %227 : vector<2x8x8xf32>
    %229 = math.exp %228 : vector<2x8x8xf32>
    %cst_79 = arith.constant dense<0.000000e+00> : vector<2x8xf32>
    %230 = vector.multi_reduction <add>, %229, %cst_79 [2] : vector<2x8x8xf32> to vector<2x8xf32>
    %231 = vector.shape_cast %230 : vector<2x8xf32> to vector<2x8x1xf32>
    %232 = tpu.reciprocal %231 {approx = true} : vector<2x8x1xf32> -> vector<2x8x1xf32>
    %233 = vector.broadcast %232 : vector<2x8x1xf32> to vector<2x8x8xf32>
    %234 = arith.mulf %229, %233 : vector<2x8x8xf32>
    "tpu.trace_start"() <{level = 10 : i32, message = "bqk,bkd->bqd"}> : () -> ()
    %cst_80 = arith.constant dense<0.000000e+00> : vector<2x8x8xf32>
    %235 = tpu.matmul %234, %222, %cst_80 {dimension_numbers = #tpu.dot_dimension_numbers<[2], [1], [1], [2], [0, 0, 0, 1, 1, 2], [0], [0]>} : vector<2x8x8xf32>, vector<2x8x8xf32>, vector<2x8x8xf32> -> vector<2x8x8xf32>
    "tpu.trace_stop"() : () -> ()
    %236 = vector.shape_cast %235 : vector<2x8x8xf32> to vector<16x8xf32>
    %237 = vector.extract_strided_slice %198 {offsets = [8, 0], sizes = [8, 32], strides = [1, 1]} : vector<32x32xf32> to vector<8x32xf32>
    %cst_81 = arith.constant dense<0.000000e+00> : vector<16x32xf32>
    %238 = tpu.matmul %236, %237, %cst_81 {dimension_numbers = #tpu.dot_dimension_numbers<[1], [0], [0], [1], [0, 0, 1, 1], [], []>} : vector<16x8xf32>, vector<8x32xf32>, vector<16x32xf32> -> vector<16x32xf32>
    %239 = arith.addf %219, %238 : vector<16x32xf32>
    %240 = vector.extract_strided_slice %196 {offsets = [0, 0, 16], sizes = [2, 8, 8], strides = [1, 1, 1]} : vector<2x8x96xf32> to vector<2x8x8xf32>
    %241 = vector.extract_strided_slice %196 {offsets = [0, 0, 48], sizes = [2, 8, 8], strides = [1, 1, 1]} : vector<2x8x96xf32> to vector<2x8x8xf32>
    %242 = vector.extract_strided_slice %196 {offsets = [0, 0, 80], sizes = [2, 8, 8], strides = [1, 1, 1]} : vector<2x8x96xf32> to vector<2x8x8xf32>
    "tpu.trace_start"() <{level = 10 : i32, message = "bqd,bkd->bqk"}> : () -> ()
    %cst_82 = arith.constant dense<0.000000e+00> : vector<2x8x8xf32>
    %243 = tpu.matmul %240, %241, %cst_82 {dimension_numbers = #tpu.dot_dimension_numbers<[2], [2], [1], [1], [0, 0, 0, 1, 1, 1], [0], [0]>} : vector<2x8x8xf32>, vector<2x8x8xf32>, vector<2x8x8xf32> -> vector<2x8x8xf32>
    "tpu.trace_stop"() : () -> ()
    %244 = arith.addf %243, %12 : vector<2x8x8xf32>
    %cst_83 = arith.constant dense<0xFF800000> : vector<2x8xf32>
    %245 = vector.multi_reduction <maximumf>, %244, %cst_83 [2] : vector<2x8x8xf32> to vector<2x8xf32>
    %246 = vector.shape_cast %245 : vector<2x8xf32> to vector<2x8x1xf32>
    %247 = vector.broadcast %246 : vector<2x8x1xf32> to vector<2x8x8xf32>
    %248 = arith.subf %244, %247 : vector<2x8x8xf32>
    %249 = math.exp %248 : vector<2x8x8xf32>
    %cst_84 = arith.constant dense<0.000000e+00> : vector<2x8xf32>
    %250 = vector.multi_reduction <add>, %249, %cst_84 [2] : vector<2x8x8xf32> to vector<2x8xf32>
    %251 = vector.shape_cast %250 : vector<2x8xf32> to vector<2x8x1xf32>
    %252 = tpu.reciprocal %251 {approx = true} : vector<2x8x1xf32> -> vector<2x8x1xf32>
    %253 = vector.broadcast %252 : vector<2x8x1xf32> to vector<2x8x8xf32>
    %254 = arith.mulf %249, %253 : vector<2x8x8xf32>
    "tpu.trace_start"() <{level = 10 : i32, message = "bqk,bkd->bqd"}> : () -> ()
    %cst_85 = arith.constant dense<0.000000e+00> : vector<2x8x8xf32>
    %255 = tpu.matmul %254, %242, %cst_85 {dimension_numbers = #tpu.dot_dimension_numbers<[2], [1], [1], [2], [0, 0, 0, 1, 1, 2], [0], [0]>} : vector<2x8x8xf32>, vector<2x8x8xf32>, vector<2x8x8xf32> -> vector<2x8x8xf32>
    "tpu.trace_stop"() : () -> ()
    %256 = vector.shape_cast %255 : vector<2x8x8xf32> to vector<16x8xf32>
    %257 = vector.extract_strided_slice %198 {offsets = [16, 0], sizes = [8, 32], strides = [1, 1]} : vector<32x32xf32> to vector<8x32xf32>
    %cst_86 = arith.constant dense<0.000000e+00> : vector<16x32xf32>
    %258 = tpu.matmul %256, %257, %cst_86 {dimension_numbers = #tpu.dot_dimension_numbers<[1], [0], [0], [1], [0, 0, 1, 1], [], []>} : vector<16x8xf32>, vector<8x32xf32>, vector<16x32xf32> -> vector<16x32xf32>
    %259 = arith.addf %239, %258 : vector<16x32xf32>
    %260 = vector.extract_strided_slice %196 {offsets = [0, 0, 24], sizes = [2, 8, 8], strides = [1, 1, 1]} : vector<2x8x96xf32> to vector<2x8x8xf32>
    %261 = vector.extract_strided_slice %196 {offsets = [0, 0, 56], sizes = [2, 8, 8], strides = [1, 1, 1]} : vector<2x8x96xf32> to vector<2x8x8xf32>
    %262 = vector.extract_strided_slice %196 {offsets = [0, 0, 88], sizes = [2, 8, 8], strides = [1, 1, 1]} : vector<2x8x96xf32> to vector<2x8x8xf32>
    "tpu.trace_start"() <{level = 10 : i32, message = "bqd,bkd->bqk"}> : () -> ()
    %cst_87 = arith.constant dense<0.000000e+00> : vector<2x8x8xf32>
    %263 = tpu.matmul %260, %261, %cst_87 {dimension_numbers = #tpu.dot_dimension_numbers<[2], [2], [1], [1], [0, 0, 0, 1, 1, 1], [0], [0]>} : vector<2x8x8xf32>, vector<2x8x8xf32>, vector<2x8x8xf32> -> vector<2x8x8xf32>
    "tpu.trace_stop"() : () -> ()
    %264 = arith.addf %263, %12 : vector<2x8x8xf32>
    %cst_88 = arith.constant dense<0xFF800000> : vector<2x8xf32>
    %265 = vector.multi_reduction <maximumf>, %264, %cst_88 [2] : vector<2x8x8xf32> to vector<2x8xf32>
    %266 = vector.shape_cast %265 : vector<2x8xf32> to vector<2x8x1xf32>
    %267 = vector.broadcast %266 : vector<2x8x1xf32> to vector<2x8x8xf32>
    %268 = arith.subf %264, %267 : vector<2x8x8xf32>
    %269 = math.exp %268 : vector<2x8x8xf32>
    %cst_89 = arith.constant dense<0.000000e+00> : vector<2x8xf32>
    %270 = vector.multi_reduction <add>, %269, %cst_89 [2] : vector<2x8x8xf32> to vector<2x8xf32>
    %271 = vector.shape_cast %270 : vector<2x8xf32> to vector<2x8x1xf32>
    %272 = tpu.reciprocal %271 {approx = true} : vector<2x8x1xf32> -> vector<2x8x1xf32>
    %273 = vector.broadcast %272 : vector<2x8x1xf32> to vector<2x8x8xf32>
    %274 = arith.mulf %269, %273 : vector<2x8x8xf32>
    "tpu.trace_start"() <{level = 10 : i32, message = "bqk,bkd->bqd"}> : () -> ()
    %cst_90 = arith.constant dense<0.000000e+00> : vector<2x8x8xf32>
    %275 = tpu.matmul %274, %262, %cst_90 {dimension_numbers = #tpu.dot_dimension_numbers<[2], [1], [1], [2], [0, 0, 0, 1, 1, 2], [0], [0]>} : vector<2x8x8xf32>, vector<2x8x8xf32>, vector<2x8x8xf32> -> vector<2x8x8xf32>
    "tpu.trace_stop"() : () -> ()
    %276 = vector.shape_cast %275 : vector<2x8x8xf32> to vector<16x8xf32>
    %277 = vector.extract_strided_slice %198 {offsets = [24, 0], sizes = [8, 32], strides = [1, 1]} : vector<32x32xf32> to vector<8x32xf32>
    %cst_91 = arith.constant dense<0.000000e+00> : vector<16x32xf32>
    %278 = tpu.matmul %276, %277, %cst_91 {dimension_numbers = #tpu.dot_dimension_numbers<[1], [0], [0], [1], [0, 0, 1, 1], [], []>} : vector<16x8xf32>, vector<8x32xf32>, vector<16x32xf32> -> vector<16x32xf32>
    %279 = arith.addf %259, %278 : vector<16x32xf32>
    %280 = vector.broadcast %180 : vector<1x32xf32> to vector<16x32xf32>
    %281 = arith.addf %279, %280 : vector<16x32xf32>
    %282 = arith.addf %188, %281 : vector<16x32xf32>
    %cst_92 = arith.constant dense<0.000000e+00> : vector<16xf32>
    %283 = vector.multi_reduction <add>, %282, %cst_92 [1] : vector<16x32xf32> to vector<16xf32>
    %284 = vector.shape_cast %283 : vector<16xf32> to vector<16x1xf32>
    %cst_93 = arith.constant 3.200000e+01 : f32
    %285 = vector.broadcast %cst_93 : f32 to vector<16x1xf32>
    %286 = arith.divf %284, %285 : vector<16x1xf32>
    %287 = vector.broadcast %286 : vector<16x1xf32> to vector<16x32xf32>
    %288 = arith.subf %282, %287 : vector<16x32xf32>
    %289 = arith.mulf %288, %288 : vector<16x32xf32>
    %cst_94 = arith.constant dense<0.000000e+00> : vector<16xf32>
    %290 = vector.multi_reduction <add>, %289, %cst_94 [1] : vector<16x32xf32> to vector<16xf32>
    %291 = vector.shape_cast %290 : vector<16xf32> to vector<16x1xf32>
    %cst_95 = arith.constant 3.200000e+01 : f32
    %292 = vector.broadcast %cst_95 : f32 to vector<16x1xf32>
    %293 = arith.divf %291, %292 : vector<16x1xf32>
    %294 = vector.broadcast %286 : vector<16x1xf32> to vector<16x32xf32>
    %295 = arith.subf %282, %294 : vector<16x32xf32>
    %cst_96 = arith.constant 9.99999993E-9 : f32
    %296 = vector.broadcast %cst_96 : f32 to vector<16x1xf32>
    %297 = arith.addf %293, %296 : vector<16x1xf32>
    %298 = math.rsqrt %297 : vector<16x1xf32>
    %299 = vector.broadcast %298 : vector<16x1xf32> to vector<16x32xf32>
    %300 = arith.mulf %295, %299 : vector<16x32xf32>
    %301 = vector.broadcast %181 : vector<1x32xf32> to vector<16x32xf32>
    %302 = arith.mulf %300, %301 : vector<16x32xf32>
    %303 = vector.broadcast %182 : vector<1x32xf32> to vector<16x32xf32>
    %304 = arith.addf %302, %303 : vector<16x32xf32>
    %c1_97 = arith.constant 1 : index
    %c0_98 = arith.constant 0 : index
    %c0_99 = arith.constant 0 : index
    %305 = vector.load %arg7[%c1_97, %c0_98, %c0_99] : memref<4x32x32xf32, #tpu.memory_space<vmem>>, vector<1x32x32xf32>
    %306 = vector.shape_cast %305 : vector<1x32x32xf32> to vector<32x32xf32>
    %cst_100 = arith.constant dense<0.000000e+00> : vector<16x32xf32>
    %307 = tpu.matmul %304, %306, %cst_100 {dimension_numbers = #tpu.dot_dimension_numbers<[1], [0], [0], [1], [0, 0, 1, 1], [], []>} : vector<16x32xf32>, vector<32x32xf32>, vector<16x32xf32> -> vector<16x32xf32>
    %308 = vector.broadcast %183 : vector<1x32xf32> to vector<16x32xf32>
    %309 = arith.addf %307, %308 : vector<16x32xf32>
    %cst_101 = arith.constant 0.000000e+00 : f32
    %310 = vector.broadcast %cst_101 : f32 to vector<16x32xf32>
    %311 = arith.maximumf %309, %310 : vector<16x32xf32>
    %c1_102 = arith.constant 1 : index
    %c0_103 = arith.constant 0 : index
    %c0_104 = arith.constant 0 : index
    %312 = vector.load %arg8[%c1_102, %c0_103, %c0_104] : memref<4x32x32xf32, #tpu.memory_space<vmem>>, vector<1x32x32xf32>
    %313 = vector.shape_cast %312 : vector<1x32x32xf32> to vector<32x32xf32>
    %cst_105 = arith.constant dense<0.000000e+00> : vector<16x32xf32>
    %314 = tpu.matmul %311, %313, %cst_105 {dimension_numbers = #tpu.dot_dimension_numbers<[1], [0], [0], [1], [0, 0, 1, 1], [], []>} : vector<16x32xf32>, vector<32x32xf32>, vector<16x32xf32> -> vector<16x32xf32>
    %315 = vector.broadcast %184 : vector<1x32xf32> to vector<16x32xf32>
    %316 = arith.addf %314, %315 : vector<16x32xf32>
    %317 = arith.addf %304, %316 : vector<16x32xf32>
    %cst_106 = arith.constant dense<0.000000e+00> : vector<16xf32>
    %318 = vector.multi_reduction <add>, %317, %cst_106 [1] : vector<16x32xf32> to vector<16xf32>
    %319 = vector.shape_cast %318 : vector<16xf32> to vector<16x1xf32>
    %cst_107 = arith.constant 3.200000e+01 : f32
    %320 = vector.broadcast %cst_107 : f32 to vector<16x1xf32>
    %321 = arith.divf %319, %320 : vector<16x1xf32>
    %322 = vector.broadcast %321 : vector<16x1xf32> to vector<16x32xf32>
    %323 = arith.subf %317, %322 : vector<16x32xf32>
    %324 = arith.mulf %323, %323 : vector<16x32xf32>
    %cst_108 = arith.constant dense<0.000000e+00> : vector<16xf32>
    %325 = vector.multi_reduction <add>, %324, %cst_108 [1] : vector<16x32xf32> to vector<16xf32>
    %326 = vector.shape_cast %325 : vector<16xf32> to vector<16x1xf32>
    %cst_109 = arith.constant 3.200000e+01 : f32
    %327 = vector.broadcast %cst_109 : f32 to vector<16x1xf32>
    %328 = arith.divf %326, %327 : vector<16x1xf32>
    %329 = vector.broadcast %321 : vector<16x1xf32> to vector<16x32xf32>
    %330 = arith.subf %317, %329 : vector<16x32xf32>
    %cst_110 = arith.constant 9.99999993E-9 : f32
    %331 = vector.broadcast %cst_110 : f32 to vector<16x1xf32>
    %332 = arith.addf %328, %331 : vector<16x1xf32>
    %333 = math.rsqrt %332 : vector<16x1xf32>
    %334 = vector.broadcast %333 : vector<16x1xf32> to vector<16x32xf32>
    %335 = arith.mulf %330, %334 : vector<16x32xf32>
    %336 = vector.broadcast %185 : vector<1x32xf32> to vector<16x32xf32>
    %337 = arith.mulf %335, %336 : vector<16x32xf32>
    %338 = vector.broadcast %186 : vector<1x32xf32> to vector<16x32xf32>
    %339 = arith.addf %337, %338 : vector<16x32xf32>
    %340 = vector.shape_cast %339 : vector<16x32xf32> to vector<2x8x32xf32>
    %c0_111 = arith.constant 0 : index
    %c0_112 = arith.constant 0 : index
    %c0_113 = arith.constant 0 : index
    %341 = vector.load %arg2[%c0_111, %c0_112, %c0_113] : memref<2x8x32xbf16, #tpu.memory_space<vmem>>, vector<2x8x32xbf16>
    %342 = arith.extf %341 : vector<2x8x32xbf16> to vector<2x8x32xf32>
    %c2 = arith.constant 2 : index
    %c0_114 = arith.constant 0 : index
    %c0_115 = arith.constant 0 : index
    %343 = vector.load %arg9[%c2, %c0_114, %c0_115] : memref<4x7x32xf32, #tpu.memory_space<vmem>>, vector<1x7x32xf32>
    %344 = vector.shape_cast %343 : vector<1x7x32xf32> to vector<7x32xf32>
    %345 = vector.extract_strided_slice %344 {offsets = [0, 0], sizes = [1, 32], strides = [1, 1]} : vector<7x32xf32> to vector<1x32xf32>
    %346 = vector.extract_strided_slice %344 {offsets = [1, 0], sizes = [1, 32], strides = [1, 1]} : vector<7x32xf32> to vector<1x32xf32>
    %347 = vector.extract_strided_slice %344 {offsets = [2, 0], sizes = [1, 32], strides = [1, 1]} : vector<7x32xf32> to vector<1x32xf32>
    %348 = vector.extract_strided_slice %344 {offsets = [3, 0], sizes = [1, 32], strides = [1, 1]} : vector<7x32xf32> to vector<1x32xf32>
    %349 = vector.extract_strided_slice %344 {offsets = [4, 0], sizes = [1, 32], strides = [1, 1]} : vector<7x32xf32> to vector<1x32xf32>
    %350 = vector.extract_strided_slice %344 {offsets = [5, 0], sizes = [1, 32], strides = [1, 1]} : vector<7x32xf32> to vector<1x32xf32>
    %351 = vector.extract_strided_slice %344 {offsets = [6, 0], sizes = [1, 32], strides = [1, 1]} : vector<7x32xf32> to vector<1x32xf32>
    %352 = vector.shape_cast %342 : vector<2x8x32xf32> to vector<16x32xf32>
    %353 = vector.shape_cast %342 : vector<2x8x32xf32> to vector<16x32xf32>
    %c2_116 = arith.constant 2 : index
    %c0_117 = arith.constant 0 : index
    %c0_118 = arith.constant 0 : index
    %354 = vector.load %arg4[%c2_116, %c0_117, %c0_118] : memref<4x32x96xf32, #tpu.memory_space<vmem>>, vector<1x32x96xf32>
    %355 = vector.shape_cast %354 : vector<1x32x96xf32> to vector<32x96xf32>
    %c2_119 = arith.constant 2 : index
    %c0_120 = arith.constant 0 : index
    %c0_121 = arith.constant 0 : index
    %356 = vector.load %arg5[%c2_119, %c0_120, %c0_121] : memref<4x1x96xf32, #tpu.memory_space<vmem>>, vector<1x1x96xf32>
    %357 = vector.shape_cast %356 : vector<1x1x96xf32> to vector<1x96xf32>
    %cst_122 = arith.constant dense<0.000000e+00> : vector<16x96xf32>
    %358 = tpu.matmul %352, %355, %cst_122 {dimension_numbers = #tpu.dot_dimension_numbers<[1], [0], [0], [1], [0, 0, 1, 1], [], []>} : vector<16x32xf32>, vector<32x96xf32>, vector<16x96xf32> -> vector<16x96xf32>
    %359 = vector.broadcast %357 : vector<1x96xf32> to vector<16x96xf32>
    %360 = arith.addf %358, %359 : vector<16x96xf32>
    %361 = vector.shape_cast %360 : vector<16x96xf32> to vector<2x8x96xf32>
    %c2_123 = arith.constant 2 : index
    %c0_124 = arith.constant 0 : index
    %c0_125 = arith.constant 0 : index
    %362 = vector.load %arg6[%c2_123, %c0_124, %c0_125] : memref<4x32x32xf32, #tpu.memory_space<vmem>>, vector<1x32x32xf32>
    %363 = vector.shape_cast %362 : vector<1x32x32xf32> to vector<32x32xf32>
    %cst_126 = arith.constant 0.000000e+00 : f32
    %364 = vector.broadcast %cst_126 : f32 to vector<16x32xf32>
    %365 = vector.extract_strided_slice %361 {offsets = [0, 0, 0], sizes = [2, 8, 8], strides = [1, 1, 1]} : vector<2x8x96xf32> to vector<2x8x8xf32>
    %366 = vector.extract_strided_slice %361 {offsets = [0, 0, 32], sizes = [2, 8, 8], strides = [1, 1, 1]} : vector<2x8x96xf32> to vector<2x8x8xf32>
    %367 = vector.extract_strided_slice %361 {offsets = [0, 0, 64], sizes = [2, 8, 8], strides = [1, 1, 1]} : vector<2x8x96xf32> to vector<2x8x8xf32>
    "tpu.trace_start"() <{level = 10 : i32, message = "bqd,bkd->bqk"}> : () -> ()
    %cst_127 = arith.constant dense<0.000000e+00> : vector<2x8x8xf32>
    %368 = tpu.matmul %365, %366, %cst_127 {dimension_numbers = #tpu.dot_dimension_numbers<[2], [2], [1], [1], [0, 0, 0, 1, 1, 1], [0], [0]>} : vector<2x8x8xf32>, vector<2x8x8xf32>, vector<2x8x8xf32> -> vector<2x8x8xf32>
    "tpu.trace_stop"() : () -> ()
    %369 = arith.addf %368, %12 : vector<2x8x8xf32>
    %cst_128 = arith.constant dense<0xFF800000> : vector<2x8xf32>
    %370 = vector.multi_reduction <maximumf>, %369, %cst_128 [2] : vector<2x8x8xf32> to vector<2x8xf32>
    %371 = vector.shape_cast %370 : vector<2x8xf32> to vector<2x8x1xf32>
    %372 = vector.broadcast %371 : vector<2x8x1xf32> to vector<2x8x8xf32>
    %373 = arith.subf %369, %372 : vector<2x8x8xf32>
    %374 = math.exp %373 : vector<2x8x8xf32>
    %cst_129 = arith.constant dense<0.000000e+00> : vector<2x8xf32>
    %375 = vector.multi_reduction <add>, %374, %cst_129 [2] : vector<2x8x8xf32> to vector<2x8xf32>
    %376 = vector.shape_cast %375 : vector<2x8xf32> to vector<2x8x1xf32>
    %377 = tpu.reciprocal %376 {approx = true} : vector<2x8x1xf32> -> vector<2x8x1xf32>
    %378 = vector.broadcast %377 : vector<2x8x1xf32> to vector<2x8x8xf32>
    %379 = arith.mulf %374, %378 : vector<2x8x8xf32>
    "tpu.trace_start"() <{level = 10 : i32, message = "bqk,bkd->bqd"}> : () -> ()
    %cst_130 = arith.constant dense<0.000000e+00> : vector<2x8x8xf32>
    %380 = tpu.matmul %379, %367, %cst_130 {dimension_numbers = #tpu.dot_dimension_numbers<[2], [1], [1], [2], [0, 0, 0, 1, 1, 2], [0], [0]>} : vector<2x8x8xf32>, vector<2x8x8xf32>, vector<2x8x8xf32> -> vector<2x8x8xf32>
    "tpu.trace_stop"() : () -> ()
    %381 = vector.shape_cast %380 : vector<2x8x8xf32> to vector<16x8xf32>
    %382 = vector.extract_strided_slice %363 {offsets = [0, 0], sizes = [8, 32], strides = [1, 1]} : vector<32x32xf32> to vector<8x32xf32>
    %cst_131 = arith.constant dense<0.000000e+00> : vector<16x32xf32>
    %383 = tpu.matmul %381, %382, %cst_131 {dimension_numbers = #tpu.dot_dimension_numbers<[1], [0], [0], [1], [0, 0, 1, 1], [], []>} : vector<16x8xf32>, vector<8x32xf32>, vector<16x32xf32> -> vector<16x32xf32>
    %384 = arith.addf %364, %383 : vector<16x32xf32>
    %385 = vector.extract_strided_slice %361 {offsets = [0, 0, 8], sizes = [2, 8, 8], strides = [1, 1, 1]} : vector<2x8x96xf32> to vector<2x8x8xf32>
    %386 = vector.extract_strided_slice %361 {offsets = [0, 0, 40], sizes = [2, 8, 8], strides = [1, 1, 1]} : vector<2x8x96xf32> to vector<2x8x8xf32>
    %387 = vector.extract_strided_slice %361 {offsets = [0, 0, 72], sizes = [2, 8, 8], strides = [1, 1, 1]} : vector<2x8x96xf32> to vector<2x8x8xf32>
    "tpu.trace_start"() <{level = 10 : i32, message = "bqd,bkd->bqk"}> : () -> ()
    %cst_132 = arith.constant dense<0.000000e+00> : vector<2x8x8xf32>
    %388 = tpu.matmul %385, %386, %cst_132 {dimension_numbers = #tpu.dot_dimension_numbers<[2], [2], [1], [1], [0, 0, 0, 1, 1, 1], [0], [0]>} : vector<2x8x8xf32>, vector<2x8x8xf32>, vector<2x8x8xf32> -> vector<2x8x8xf32>
    "tpu.trace_stop"() : () -> ()
    %389 = arith.addf %388, %12 : vector<2x8x8xf32>
    %cst_133 = arith.constant dense<0xFF800000> : vector<2x8xf32>
    %390 = vector.multi_reduction <maximumf>, %389, %cst_133 [2] : vector<2x8x8xf32> to vector<2x8xf32>
    %391 = vector.shape_cast %390 : vector<2x8xf32> to vector<2x8x1xf32>
    %392 = vector.broadcast %391 : vector<2x8x1xf32> to vector<2x8x8xf32>
    %393 = arith.subf %389, %392 : vector<2x8x8xf32>
    %394 = math.exp %393 : vector<2x8x8xf32>
    %cst_134 = arith.constant dense<0.000000e+00> : vector<2x8xf32>
    %395 = vector.multi_reduction <add>, %394, %cst_134 [2] : vector<2x8x8xf32> to vector<2x8xf32>
    %396 = vector.shape_cast %395 : vector<2x8xf32> to vector<2x8x1xf32>
    %397 = tpu.reciprocal %396 {approx = true} : vector<2x8x1xf32> -> vector<2x8x1xf32>
    %398 = vector.broadcast %397 : vector<2x8x1xf32> to vector<2x8x8xf32>
    %399 = arith.mulf %394, %398 : vector<2x8x8xf32>
    "tpu.trace_start"() <{level = 10 : i32, message = "bqk,bkd->bqd"}> : () -> ()
    %cst_135 = arith.constant dense<0.000000e+00> : vector<2x8x8xf32>
    %400 = tpu.matmul %399, %387, %cst_135 {dimension_numbers = #tpu.dot_dimension_numbers<[2], [1], [1], [2], [0, 0, 0, 1, 1, 2], [0], [0]>} : vector<2x8x8xf32>, vector<2x8x8xf32>, vector<2x8x8xf32> -> vector<2x8x8xf32>
    "tpu.trace_stop"() : () -> ()
    %401 = vector.shape_cast %400 : vector<2x8x8xf32> to vector<16x8xf32>
    %402 = vector.extract_strided_slice %363 {offsets = [8, 0], sizes = [8, 32], strides = [1, 1]} : vector<32x32xf32> to vector<8x32xf32>
    %cst_136 = arith.constant dense<0.000000e+00> : vector<16x32xf32>
    %403 = tpu.matmul %401, %402, %cst_136 {dimension_numbers = #tpu.dot_dimension_numbers<[1], [0], [0], [1], [0, 0, 1, 1], [], []>} : vector<16x8xf32>, vector<8x32xf32>, vector<16x32xf32> -> vector<16x32xf32>
    %404 = arith.addf %384, %403 : vector<16x32xf32>
    %405 = vector.extract_strided_slice %361 {offsets = [0, 0, 16], sizes = [2, 8, 8], strides = [1, 1, 1]} : vector<2x8x96xf32> to vector<2x8x8xf32>
    %406 = vector.extract_strided_slice %361 {offsets = [0, 0, 48], sizes = [2, 8, 8], strides = [1, 1, 1]} : vector<2x8x96xf32> to vector<2x8x8xf32>
    %407 = vector.extract_strided_slice %361 {offsets = [0, 0, 80], sizes = [2, 8, 8], strides = [1, 1, 1]} : vector<2x8x96xf32> to vector<2x8x8xf32>
    "tpu.trace_start"() <{level = 10 : i32, message = "bqd,bkd->bqk"}> : () -> ()
    %cst_137 = arith.constant dense<0.000000e+00> : vector<2x8x8xf32>
    %408 = tpu.matmul %405, %406, %cst_137 {dimension_numbers = #tpu.dot_dimension_numbers<[2], [2], [1], [1], [0, 0, 0, 1, 1, 1], [0], [0]>} : vector<2x8x8xf32>, vector<2x8x8xf32>, vector<2x8x8xf32> -> vector<2x8x8xf32>
    "tpu.trace_stop"() : () -> ()
    %409 = arith.addf %408, %12 : vector<2x8x8xf32>
    %cst_138 = arith.constant dense<0xFF800000> : vector<2x8xf32>
    %410 = vector.multi_reduction <maximumf>, %409, %cst_138 [2] : vector<2x8x8xf32> to vector<2x8xf32>
    %411 = vector.shape_cast %410 : vector<2x8xf32> to vector<2x8x1xf32>
    %412 = vector.broadcast %411 : vector<2x8x1xf32> to vector<2x8x8xf32>
    %413 = arith.subf %409, %412 : vector<2x8x8xf32>
    %414 = math.exp %413 : vector<2x8x8xf32>
    %cst_139 = arith.constant dense<0.000000e+00> : vector<2x8xf32>
    %415 = vector.multi_reduction <add>, %414, %cst_139 [2] : vector<2x8x8xf32> to vector<2x8xf32>
    %416 = vector.shape_cast %415 : vector<2x8xf32> to vector<2x8x1xf32>
    %417 = tpu.reciprocal %416 {approx = true} : vector<2x8x1xf32> -> vector<2x8x1xf32>
    %418 = vector.broadcast %417 : vector<2x8x1xf32> to vector<2x8x8xf32>
    %419 = arith.mulf %414, %418 : vector<2x8x8xf32>
    "tpu.trace_start"() <{level = 10 : i32, message = "bqk,bkd->bqd"}> : () -> ()
    %cst_140 = arith.constant dense<0.000000e+00> : vector<2x8x8xf32>
    %420 = tpu.matmul %419, %407, %cst_140 {dimension_numbers = #tpu.dot_dimension_numbers<[2], [1], [1], [2], [0, 0, 0, 1, 1, 2], [0], [0]>} : vector<2x8x8xf32>, vector<2x8x8xf32>, vector<2x8x8xf32> -> vector<2x8x8xf32>
    "tpu.trace_stop"() : () -> ()
    %421 = vector.shape_cast %420 : vector<2x8x8xf32> to vector<16x8xf32>
    %422 = vector.extract_strided_slice %363 {offsets = [16, 0], sizes = [8, 32], strides = [1, 1]} : vector<32x32xf32> to vector<8x32xf32>
    %cst_141 = arith.constant dense<0.000000e+00> : vector<16x32xf32>
    %423 = tpu.matmul %421, %422, %cst_141 {dimension_numbers = #tpu.dot_dimension_numbers<[1], [0], [0], [1], [0, 0, 1, 1], [], []>} : vector<16x8xf32>, vector<8x32xf32>, vector<16x32xf32> -> vector<16x32xf32>
    %424 = arith.addf %404, %423 : vector<16x32xf32>
    %425 = vector.extract_strided_slice %361 {offsets = [0, 0, 24], sizes = [2, 8, 8], strides = [1, 1, 1]} : vector<2x8x96xf32> to vector<2x8x8xf32>
    %426 = vector.extract_strided_slice %361 {offsets = [0, 0, 56], sizes = [2, 8, 8], strides = [1, 1, 1]} : vector<2x8x96xf32> to vector<2x8x8xf32>
    %427 = vector.extract_strided_slice %361 {offsets = [0, 0, 88], sizes = [2, 8, 8], strides = [1, 1, 1]} : vector<2x8x96xf32> to vector<2x8x8xf32>
    "tpu.trace_start"() <{level = 10 : i32, message = "bqd,bkd->bqk"}> : () -> ()
    %cst_142 = arith.constant dense<0.000000e+00> : vector<2x8x8xf32>
    %428 = tpu.matmul %425, %426, %cst_142 {dimension_numbers = #tpu.dot_dimension_numbers<[2], [2], [1], [1], [0, 0, 0, 1, 1, 1], [0], [0]>} : vector<2x8x8xf32>, vector<2x8x8xf32>, vector<2x8x8xf32> -> vector<2x8x8xf32>
    "tpu.trace_stop"() : () -> ()
    %429 = arith.addf %428, %12 : vector<2x8x8xf32>
    %cst_143 = arith.constant dense<0xFF800000> : vector<2x8xf32>
    %430 = vector.multi_reduction <maximumf>, %429, %cst_143 [2] : vector<2x8x8xf32> to vector<2x8xf32>
    %431 = vector.shape_cast %430 : vector<2x8xf32> to vector<2x8x1xf32>
    %432 = vector.broadcast %431 : vector<2x8x1xf32> to vector<2x8x8xf32>
    %433 = arith.subf %429, %432 : vector<2x8x8xf32>
    %434 = math.exp %433 : vector<2x8x8xf32>
    %cst_144 = arith.constant dense<0.000000e+00> : vector<2x8xf32>
    %435 = vector.multi_reduction <add>, %434, %cst_144 [2] : vector<2x8x8xf32> to vector<2x8xf32>
    %436 = vector.shape_cast %435 : vector<2x8xf32> to vector<2x8x1xf32>
    %437 = tpu.reciprocal %436 {approx = true} : vector<2x8x1xf32> -> vector<2x8x1xf32>
    %438 = vector.broadcast %437 : vector<2x8x1xf32> to vector<2x8x8xf32>
    %439 = arith.mulf %434, %438 : vector<2x8x8xf32>
    "tpu.trace_start"() <{level = 10 : i32, message = "bqk,bkd->bqd"}> : () -> ()
    %cst_145 = arith.constant dense<0.000000e+00> : vector<2x8x8xf32>
    %440 = tpu.matmul %439, %427, %cst_145 {dimension_numbers = #tpu.dot_dimension_numbers<[2], [1], [1], [2], [0, 0, 0, 1, 1, 2], [0], [0]>} : vector<2x8x8xf32>, vector<2x8x8xf32>, vector<2x8x8xf32> -> vector<2x8x8xf32>
    "tpu.trace_stop"() : () -> ()
    %441 = vector.shape_cast %440 : vector<2x8x8xf32> to vector<16x8xf32>
    %442 = vector.extract_strided_slice %363 {offsets = [24, 0], sizes = [8, 32], strides = [1, 1]} : vector<32x32xf32> to vector<8x32xf32>
    %cst_146 = arith.constant dense<0.000000e+00> : vector<16x32xf32>
    %443 = tpu.matmul %441, %442, %cst_146 {dimension_numbers = #tpu.dot_dimension_numbers<[1], [0], [0], [1], [0, 0, 1, 1], [], []>} : vector<16x8xf32>, vector<8x32xf32>, vector<16x32xf32> -> vector<16x32xf32>
    %444 = arith.addf %424, %443 : vector<16x32xf32>
    %445 = vector.broadcast %345 : vector<1x32xf32> to vector<16x32xf32>
    %446 = arith.addf %444, %445 : vector<16x32xf32>
    %447 = arith.addf %353, %446 : vector<16x32xf32>
    %cst_147 = arith.constant dense<0.000000e+00> : vector<16xf32>
    %448 = vector.multi_reduction <add>, %447, %cst_147 [1] : vector<16x32xf32> to vector<16xf32>
    %449 = vector.shape_cast %448 : vector<16xf32> to vector<16x1xf32>
    %cst_148 = arith.constant 3.200000e+01 : f32
    %450 = vector.broadcast %cst_148 : f32 to vector<16x1xf32>
    %451 = arith.divf %449, %450 : vector<16x1xf32>
    %452 = vector.broadcast %451 : vector<16x1xf32> to vector<16x32xf32>
    %453 = arith.subf %447, %452 : vector<16x32xf32>
    %454 = arith.mulf %453, %453 : vector<16x32xf32>
    %cst_149 = arith.constant dense<0.000000e+00> : vector<16xf32>
    %455 = vector.multi_reduction <add>, %454, %cst_149 [1] : vector<16x32xf32> to vector<16xf32>
    %456 = vector.shape_cast %455 : vector<16xf32> to vector<16x1xf32>
    %cst_150 = arith.constant 3.200000e+01 : f32
    %457 = vector.broadcast %cst_150 : f32 to vector<16x1xf32>
    %458 = arith.divf %456, %457 : vector<16x1xf32>
    %459 = vector.broadcast %451 : vector<16x1xf32> to vector<16x32xf32>
    %460 = arith.subf %447, %459 : vector<16x32xf32>
    %cst_151 = arith.constant 9.99999993E-9 : f32
    %461 = vector.broadcast %cst_151 : f32 to vector<16x1xf32>
    %462 = arith.addf %458, %461 : vector<16x1xf32>
    %463 = math.rsqrt %462 : vector<16x1xf32>
    %464 = vector.broadcast %463 : vector<16x1xf32> to vector<16x32xf32>
    %465 = arith.mulf %460, %464 : vector<16x32xf32>
    %466 = vector.broadcast %346 : vector<1x32xf32> to vector<16x32xf32>
    %467 = arith.mulf %465, %466 : vector<16x32xf32>
    %468 = vector.broadcast %347 : vector<1x32xf32> to vector<16x32xf32>
    %469 = arith.addf %467, %468 : vector<16x32xf32>
    %c2_152 = arith.constant 2 : index
    %c0_153 = arith.constant 0 : index
    %c0_154 = arith.constant 0 : index
    %470 = vector.load %arg7[%c2_152, %c0_153, %c0_154] : memref<4x32x32xf32, #tpu.memory_space<vmem>>, vector<1x32x32xf32>
    %471 = vector.shape_cast %470 : vector<1x32x32xf32> to vector<32x32xf32>
    %cst_155 = arith.constant dense<0.000000e+00> : vector<16x32xf32>
    %472 = tpu.matmul %469, %471, %cst_155 {dimension_numbers = #tpu.dot_dimension_numbers<[1], [0], [0], [1], [0, 0, 1, 1], [], []>} : vector<16x32xf32>, vector<32x32xf32>, vector<16x32xf32> -> vector<16x32xf32>
    %473 = vector.broadcast %348 : vector<1x32xf32> to vector<16x32xf32>
    %474 = arith.addf %472, %473 : vector<16x32xf32>
    %cst_156 = arith.constant 0.000000e+00 : f32
    %475 = vector.broadcast %cst_156 : f32 to vector<16x32xf32>
    %476 = arith.maximumf %474, %475 : vector<16x32xf32>
    %c2_157 = arith.constant 2 : index
    %c0_158 = arith.constant 0 : index
    %c0_159 = arith.constant 0 : index
    %477 = vector.load %arg8[%c2_157, %c0_158, %c0_159] : memref<4x32x32xf32, #tpu.memory_space<vmem>>, vector<1x32x32xf32>
    %478 = vector.shape_cast %477 : vector<1x32x32xf32> to vector<32x32xf32>
    %cst_160 = arith.constant dense<0.000000e+00> : vector<16x32xf32>
    %479 = tpu.matmul %476, %478, %cst_160 {dimension_numbers = #tpu.dot_dimension_numbers<[1], [0], [0], [1], [0, 0, 1, 1], [], []>} : vector<16x32xf32>, vector<32x32xf32>, vector<16x32xf32> -> vector<16x32xf32>
    %480 = vector.broadcast %349 : vector<1x32xf32> to vector<16x32xf32>
    %481 = arith.addf %479, %480 : vector<16x32xf32>
    %482 = arith.addf %469, %481 : vector<16x32xf32>
    %cst_161 = arith.constant dense<0.000000e+00> : vector<16xf32>
    %483 = vector.multi_reduction <add>, %482, %cst_161 [1] : vector<16x32xf32> to vector<16xf32>
    %484 = vector.shape_cast %483 : vector<16xf32> to vector<16x1xf32>
    %cst_162 = arith.constant 3.200000e+01 : f32
    %485 = vector.broadcast %cst_162 : f32 to vector<16x1xf32>
    %486 = arith.divf %484, %485 : vector<16x1xf32>
    %487 = vector.broadcast %486 : vector<16x1xf32> to vector<16x32xf32>
    %488 = arith.subf %482, %487 : vector<16x32xf32>
    %489 = arith.mulf %488, %488 : vector<16x32xf32>
    %cst_163 = arith.constant dense<0.000000e+00> : vector<16xf32>
    %490 = vector.multi_reduction <add>, %489, %cst_163 [1] : vector<16x32xf32> to vector<16xf32>
    %491 = vector.shape_cast %490 : vector<16xf32> to vector<16x1xf32>
    %cst_164 = arith.constant 3.200000e+01 : f32
    %492 = vector.broadcast %cst_164 : f32 to vector<16x1xf32>
    %493 = arith.divf %491, %492 : vector<16x1xf32>
    %494 = vector.broadcast %486 : vector<16x1xf32> to vector<16x32xf32>
    %495 = arith.subf %482, %494 : vector<16x32xf32>
    %cst_165 = arith.constant 9.99999993E-9 : f32
    %496 = vector.broadcast %cst_165 : f32 to vector<16x1xf32>
    %497 = arith.addf %493, %496 : vector<16x1xf32>
    %498 = math.rsqrt %497 : vector<16x1xf32>
    %499 = vector.broadcast %498 : vector<16x1xf32> to vector<16x32xf32>
    %500 = arith.mulf %495, %499 : vector<16x32xf32>
    %501 = vector.broadcast %350 : vector<1x32xf32> to vector<16x32xf32>
    %502 = arith.mulf %500, %501 : vector<16x32xf32>
    %503 = vector.broadcast %351 : vector<1x32xf32> to vector<16x32xf32>
    %504 = arith.addf %502, %503 : vector<16x32xf32>
    %505 = vector.shape_cast %504 : vector<16x32xf32> to vector<2x8x32xf32>
    %c3 = arith.constant 3 : index
    %c0_166 = arith.constant 0 : index
    %c0_167 = arith.constant 0 : index
    %506 = vector.load %arg9[%c3, %c0_166, %c0_167] : memref<4x7x32xf32, #tpu.memory_space<vmem>>, vector<1x7x32xf32>
    %507 = vector.shape_cast %506 : vector<1x7x32xf32> to vector<7x32xf32>
    %508 = vector.extract_strided_slice %507 {offsets = [0, 0], sizes = [1, 32], strides = [1, 1]} : vector<7x32xf32> to vector<1x32xf32>
    %509 = vector.extract_strided_slice %507 {offsets = [1, 0], sizes = [1, 32], strides = [1, 1]} : vector<7x32xf32> to vector<1x32xf32>
    %510 = vector.extract_strided_slice %507 {offsets = [2, 0], sizes = [1, 32], strides = [1, 1]} : vector<7x32xf32> to vector<1x32xf32>
    %511 = vector.extract_strided_slice %507 {offsets = [3, 0], sizes = [1, 32], strides = [1, 1]} : vector<7x32xf32> to vector<1x32xf32>
    %512 = vector.extract_strided_slice %507 {offsets = [4, 0], sizes = [1, 32], strides = [1, 1]} : vector<7x32xf32> to vector<1x32xf32>
    %513 = vector.extract_strided_slice %507 {offsets = [5, 0], sizes = [1, 32], strides = [1, 1]} : vector<7x32xf32> to vector<1x32xf32>
    %514 = vector.extract_strided_slice %507 {offsets = [6, 0], sizes = [1, 32], strides = [1, 1]} : vector<7x32xf32> to vector<1x32xf32>
    %515 = vector.shape_cast %505 : vector<2x8x32xf32> to vector<16x32xf32>
    %516 = vector.shape_cast %340 : vector<2x8x32xf32> to vector<16x32xf32>
    %c3_168 = arith.constant 3 : index
    %c0_169 = arith.constant 0 : index
    %c0_170 = arith.constant 0 : index
    %517 = vector.load %arg4[%c3_168, %c0_169, %c0_170] : memref<4x32x96xf32, #tpu.memory_space<vmem>>, vector<1x32x96xf32>
    %518 = vector.shape_cast %517 : vector<1x32x96xf32> to vector<32x96xf32>
    %c3_171 = arith.constant 3 : index
    %c0_172 = arith.constant 0 : index
    %c0_173 = arith.constant 0 : index
    %519 = vector.load %arg5[%c3_171, %c0_172, %c0_173] : memref<4x1x96xf32, #tpu.memory_space<vmem>>, vector<1x1x96xf32>
    %520 = vector.shape_cast %519 : vector<1x1x96xf32> to vector<1x96xf32>
    %cst_174 = arith.constant dense<0.000000e+00> : vector<16x96xf32>
    %521 = tpu.matmul %515, %518, %cst_174 {dimension_numbers = #tpu.dot_dimension_numbers<[1], [0], [0], [1], [0, 0, 1, 1], [], []>} : vector<16x32xf32>, vector<32x96xf32>, vector<16x96xf32> -> vector<16x96xf32>
    %522 = vector.broadcast %520 : vector<1x96xf32> to vector<16x96xf32>
    %523 = arith.addf %521, %522 : vector<16x96xf32>
    %524 = vector.shape_cast %523 : vector<16x96xf32> to vector<2x8x96xf32>
    %cst_175 = arith.constant dense<0.000000e+00> : vector<16x96xf32>
    %525 = tpu.matmul %516, %518, %cst_175 {dimension_numbers = #tpu.dot_dimension_numbers<[1], [0], [0], [1], [0, 0, 1, 1], [], []>} : vector<16x32xf32>, vector<32x96xf32>, vector<16x96xf32> -> vector<16x96xf32>
    %526 = vector.broadcast %520 : vector<1x96xf32> to vector<16x96xf32>
    %527 = arith.addf %525, %526 : vector<16x96xf32>
    %528 = vector.shape_cast %527 : vector<16x96xf32> to vector<2x8x96xf32>
    %c3_176 = arith.constant 3 : index
    %c0_177 = arith.constant 0 : index
    %c0_178 = arith.constant 0 : index
    %529 = vector.load %arg6[%c3_176, %c0_177, %c0_178] : memref<4x32x32xf32, #tpu.memory_space<vmem>>, vector<1x32x32xf32>
    %530 = vector.shape_cast %529 : vector<1x32x32xf32> to vector<32x32xf32>
    %cst_179 = arith.constant 0.000000e+00 : f32
    %531 = vector.broadcast %cst_179 : f32 to vector<16x32xf32>
    %532 = vector.extract_strided_slice %524 {offsets = [0, 0, 0], sizes = [2, 8, 8], strides = [1, 1, 1]} : vector<2x8x96xf32> to vector<2x8x8xf32>
    %533 = vector.extract_strided_slice %528 {offsets = [0, 0, 32], sizes = [2, 8, 8], strides = [1, 1, 1]} : vector<2x8x96xf32> to vector<2x8x8xf32>
    %534 = vector.extract_strided_slice %528 {offsets = [0, 0, 64], sizes = [2, 8, 8], strides = [1, 1, 1]} : vector<2x8x96xf32> to vector<2x8x8xf32>
    "tpu.trace_start"() <{level = 10 : i32, message = "bqd,bkd->bqk"}> : () -> ()
    %cst_180 = arith.constant dense<0.000000e+00> : vector<2x8x8xf32>
    %535 = tpu.matmul %532, %533, %cst_180 {dimension_numbers = #tpu.dot_dimension_numbers<[2], [2], [1], [1], [0, 0, 0, 1, 1, 1], [0], [0]>} : vector<2x8x8xf32>, vector<2x8x8xf32>, vector<2x8x8xf32> -> vector<2x8x8xf32>
    "tpu.trace_stop"() : () -> ()
    %536 = arith.addf %535, %12 : vector<2x8x8xf32>
    %cst_181 = arith.constant dense<0xFF800000> : vector<2x8xf32>
    %537 = vector.multi_reduction <maximumf>, %536, %cst_181 [2] : vector<2x8x8xf32> to vector<2x8xf32>
    %538 = vector.shape_cast %537 : vector<2x8xf32> to vector<2x8x1xf32>
    %539 = vector.broadcast %538 : vector<2x8x1xf32> to vector<2x8x8xf32>
    %540 = arith.subf %536, %539 : vector<2x8x8xf32>
    %541 = math.exp %540 : vector<2x8x8xf32>
    %cst_182 = arith.constant dense<0.000000e+00> : vector<2x8xf32>
    %542 = vector.multi_reduction <add>, %541, %cst_182 [2] : vector<2x8x8xf32> to vector<2x8xf32>
    %543 = vector.shape_cast %542 : vector<2x8xf32> to vector<2x8x1xf32>
    %544 = tpu.reciprocal %543 {approx = true} : vector<2x8x1xf32> -> vector<2x8x1xf32>
    %545 = vector.broadcast %544 : vector<2x8x1xf32> to vector<2x8x8xf32>
    %546 = arith.mulf %541, %545 : vector<2x8x8xf32>
    "tpu.trace_start"() <{level = 10 : i32, message = "bqk,bkd->bqd"}> : () -> ()
    %cst_183 = arith.constant dense<0.000000e+00> : vector<2x8x8xf32>
    %547 = tpu.matmul %546, %534, %cst_183 {dimension_numbers = #tpu.dot_dimension_numbers<[2], [1], [1], [2], [0, 0, 0, 1, 1, 2], [0], [0]>} : vector<2x8x8xf32>, vector<2x8x8xf32>, vector<2x8x8xf32> -> vector<2x8x8xf32>
    "tpu.trace_stop"() : () -> ()
    %548 = vector.shape_cast %547 : vector<2x8x8xf32> to vector<16x8xf32>
    %549 = vector.extract_strided_slice %530 {offsets = [0, 0], sizes = [8, 32], strides = [1, 1]} : vector<32x32xf32> to vector<8x32xf32>
    %cst_184 = arith.constant dense<0.000000e+00> : vector<16x32xf32>
    %550 = tpu.matmul %548, %549, %cst_184 {dimension_numbers = #tpu.dot_dimension_numbers<[1], [0], [0], [1], [0, 0, 1, 1], [], []>} : vector<16x8xf32>, vector<8x32xf32>, vector<16x32xf32> -> vector<16x32xf32>
    %551 = arith.addf %531, %550 : vector<16x32xf32>
    %552 = vector.extract_strided_slice %524 {offsets = [0, 0, 8], sizes = [2, 8, 8], strides = [1, 1, 1]} : vector<2x8x96xf32> to vector<2x8x8xf32>
    %553 = vector.extract_strided_slice %528 {offsets = [0, 0, 40], sizes = [2, 8, 8], strides = [1, 1, 1]} : vector<2x8x96xf32> to vector<2x8x8xf32>
    %554 = vector.extract_strided_slice %528 {offsets = [0, 0, 72], sizes = [2, 8, 8], strides = [1, 1, 1]} : vector<2x8x96xf32> to vector<2x8x8xf32>
    "tpu.trace_start"() <{level = 10 : i32, message = "bqd,bkd->bqk"}> : () -> ()
    %cst_185 = arith.constant dense<0.000000e+00> : vector<2x8x8xf32>
    %555 = tpu.matmul %552, %553, %cst_185 {dimension_numbers = #tpu.dot_dimension_numbers<[2], [2], [1], [1], [0, 0, 0, 1, 1, 1], [0], [0]>} : vector<2x8x8xf32>, vector<2x8x8xf32>, vector<2x8x8xf32> -> vector<2x8x8xf32>
    "tpu.trace_stop"() : () -> ()
    %556 = arith.addf %555, %12 : vector<2x8x8xf32>
    %cst_186 = arith.constant dense<0xFF800000> : vector<2x8xf32>
    %557 = vector.multi_reduction <maximumf>, %556, %cst_186 [2] : vector<2x8x8xf32> to vector<2x8xf32>
    %558 = vector.shape_cast %557 : vector<2x8xf32> to vector<2x8x1xf32>
    %559 = vector.broadcast %558 : vector<2x8x1xf32> to vector<2x8x8xf32>
    %560 = arith.subf %556, %559 : vector<2x8x8xf32>
    %561 = math.exp %560 : vector<2x8x8xf32>
    %cst_187 = arith.constant dense<0.000000e+00> : vector<2x8xf32>
    %562 = vector.multi_reduction <add>, %561, %cst_187 [2] : vector<2x8x8xf32> to vector<2x8xf32>
    %563 = vector.shape_cast %562 : vector<2x8xf32> to vector<2x8x1xf32>
    %564 = tpu.reciprocal %563 {approx = true} : vector<2x8x1xf32> -> vector<2x8x1xf32>
    %565 = vector.broadcast %564 : vector<2x8x1xf32> to vector<2x8x8xf32>
    %566 = arith.mulf %561, %565 : vector<2x8x8xf32>
    "tpu.trace_start"() <{level = 10 : i32, message = "bqk,bkd->bqd"}> : () -> ()
    %cst_188 = arith.constant dense<0.000000e+00> : vector<2x8x8xf32>
    %567 = tpu.matmul %566, %554, %cst_188 {dimension_numbers = #tpu.dot_dimension_numbers<[2], [1], [1], [2], [0, 0, 0, 1, 1, 2], [0], [0]>} : vector<2x8x8xf32>, vector<2x8x8xf32>, vector<2x8x8xf32> -> vector<2x8x8xf32>
    "tpu.trace_stop"() : () -> ()
    %568 = vector.shape_cast %567 : vector<2x8x8xf32> to vector<16x8xf32>
    %569 = vector.extract_strided_slice %530 {offsets = [8, 0], sizes = [8, 32], strides = [1, 1]} : vector<32x32xf32> to vector<8x32xf32>
    %cst_189 = arith.constant dense<0.000000e+00> : vector<16x32xf32>
    %570 = tpu.matmul %568, %569, %cst_189 {dimension_numbers = #tpu.dot_dimension_numbers<[1], [0], [0], [1], [0, 0, 1, 1], [], []>} : vector<16x8xf32>, vector<8x32xf32>, vector<16x32xf32> -> vector<16x32xf32>
    %571 = arith.addf %551, %570 : vector<16x32xf32>
    %572 = vector.extract_strided_slice %524 {offsets = [0, 0, 16], sizes = [2, 8, 8], strides = [1, 1, 1]} : vector<2x8x96xf32> to vector<2x8x8xf32>
    %573 = vector.extract_strided_slice %528 {offsets = [0, 0, 48], sizes = [2, 8, 8], strides = [1, 1, 1]} : vector<2x8x96xf32> to vector<2x8x8xf32>
    %574 = vector.extract_strided_slice %528 {offsets = [0, 0, 80], sizes = [2, 8, 8], strides = [1, 1, 1]} : vector<2x8x96xf32> to vector<2x8x8xf32>
    "tpu.trace_start"() <{level = 10 : i32, message = "bqd,bkd->bqk"}> : () -> ()
    %cst_190 = arith.constant dense<0.000000e+00> : vector<2x8x8xf32>
    %575 = tpu.matmul %572, %573, %cst_190 {dimension_numbers = #tpu.dot_dimension_numbers<[2], [2], [1], [1], [0, 0, 0, 1, 1, 1], [0], [0]>} : vector<2x8x8xf32>, vector<2x8x8xf32>, vector<2x8x8xf32> -> vector<2x8x8xf32>
    "tpu.trace_stop"() : () -> ()
    %576 = arith.addf %575, %12 : vector<2x8x8xf32>
    %cst_191 = arith.constant dense<0xFF800000> : vector<2x8xf32>
    %577 = vector.multi_reduction <maximumf>, %576, %cst_191 [2] : vector<2x8x8xf32> to vector<2x8xf32>
    %578 = vector.shape_cast %577 : vector<2x8xf32> to vector<2x8x1xf32>
    %579 = vector.broadcast %578 : vector<2x8x1xf32> to vector<2x8x8xf32>
    %580 = arith.subf %576, %579 : vector<2x8x8xf32>
    %581 = math.exp %580 : vector<2x8x8xf32>
    %cst_192 = arith.constant dense<0.000000e+00> : vector<2x8xf32>
    %582 = vector.multi_reduction <add>, %581, %cst_192 [2] : vector<2x8x8xf32> to vector<2x8xf32>
    %583 = vector.shape_cast %582 : vector<2x8xf32> to vector<2x8x1xf32>
    %584 = tpu.reciprocal %583 {approx = true} : vector<2x8x1xf32> -> vector<2x8x1xf32>
    %585 = vector.broadcast %584 : vector<2x8x1xf32> to vector<2x8x8xf32>
    %586 = arith.mulf %581, %585 : vector<2x8x8xf32>
    "tpu.trace_start"() <{level = 10 : i32, message = "bqk,bkd->bqd"}> : () -> ()
    %cst_193 = arith.constant dense<0.000000e+00> : vector<2x8x8xf32>
    %587 = tpu.matmul %586, %574, %cst_193 {dimension_numbers = #tpu.dot_dimension_numbers<[2], [1], [1], [2], [0, 0, 0, 1, 1, 2], [0], [0]>} : vector<2x8x8xf32>, vector<2x8x8xf32>, vector<2x8x8xf32> -> vector<2x8x8xf32>
    "tpu.trace_stop"() : () -> ()
    %588 = vector.shape_cast %587 : vector<2x8x8xf32> to vector<16x8xf32>
    %589 = vector.extract_strided_slice %530 {offsets = [16, 0], sizes = [8, 32], strides = [1, 1]} : vector<32x32xf32> to vector<8x32xf32>
    %cst_194 = arith.constant dense<0.000000e+00> : vector<16x32xf32>
    %590 = tpu.matmul %588, %589, %cst_194 {dimension_numbers = #tpu.dot_dimension_numbers<[1], [0], [0], [1], [0, 0, 1, 1], [], []>} : vector<16x8xf32>, vector<8x32xf32>, vector<16x32xf32> -> vector<16x32xf32>
    %591 = arith.addf %571, %590 : vector<16x32xf32>
    %592 = vector.extract_strided_slice %524 {offsets = [0, 0, 24], sizes = [2, 8, 8], strides = [1, 1, 1]} : vector<2x8x96xf32> to vector<2x8x8xf32>
    %593 = vector.extract_strided_slice %528 {offsets = [0, 0, 56], sizes = [2, 8, 8], strides = [1, 1, 1]} : vector<2x8x96xf32> to vector<2x8x8xf32>
    %594 = vector.extract_strided_slice %528 {offsets = [0, 0, 88], sizes = [2, 8, 8], strides = [1, 1, 1]} : vector<2x8x96xf32> to vector<2x8x8xf32>
    "tpu.trace_start"() <{level = 10 : i32, message = "bqd,bkd->bqk"}> : () -> ()
    %cst_195 = arith.constant dense<0.000000e+00> : vector<2x8x8xf32>
    %595 = tpu.matmul %592, %593, %cst_195 {dimension_numbers = #tpu.dot_dimension_numbers<[2], [2], [1], [1], [0, 0, 0, 1, 1, 1], [0], [0]>} : vector<2x8x8xf32>, vector<2x8x8xf32>, vector<2x8x8xf32> -> vector<2x8x8xf32>
    "tpu.trace_stop"() : () -> ()
    %596 = arith.addf %595, %12 : vector<2x8x8xf32>
    %cst_196 = arith.constant dense<0xFF800000> : vector<2x8xf32>
    %597 = vector.multi_reduction <maximumf>, %596, %cst_196 [2] : vector<2x8x8xf32> to vector<2x8xf32>
    %598 = vector.shape_cast %597 : vector<2x8xf32> to vector<2x8x1xf32>
    %599 = vector.broadcast %598 : vector<2x8x1xf32> to vector<2x8x8xf32>
    %600 = arith.subf %596, %599 : vector<2x8x8xf32>
    %601 = math.exp %600 : vector<2x8x8xf32>
    %cst_197 = arith.constant dense<0.000000e+00> : vector<2x8xf32>
    %602 = vector.multi_reduction <add>, %601, %cst_197 [2] : vector<2x8x8xf32> to vector<2x8xf32>
    %603 = vector.shape_cast %602 : vector<2x8xf32> to vector<2x8x1xf32>
    %604 = tpu.reciprocal %603 {approx = true} : vector<2x8x1xf32> -> vector<2x8x1xf32>
    %605 = vector.broadcast %604 : vector<2x8x1xf32> to vector<2x8x8xf32>
    %606 = arith.mulf %601, %605 : vector<2x8x8xf32>
    "tpu.trace_start"() <{level = 10 : i32, message = "bqk,bkd->bqd"}> : () -> ()
    %cst_198 = arith.constant dense<0.000000e+00> : vector<2x8x8xf32>
    %607 = tpu.matmul %606, %594, %cst_198 {dimension_numbers = #tpu.dot_dimension_numbers<[2], [1], [1], [2], [0, 0, 0, 1, 1, 2], [0], [0]>} : vector<2x8x8xf32>, vector<2x8x8xf32>, vector<2x8x8xf32> -> vector<2x8x8xf32>
    "tpu.trace_stop"() : () -> ()
    %608 = vector.shape_cast %607 : vector<2x8x8xf32> to vector<16x8xf32>
    %609 = vector.extract_strided_slice %530 {offsets = [24, 0], sizes = [8, 32], strides = [1, 1]} : vector<32x32xf32> to vector<8x32xf32>
    %cst_199 = arith.constant dense<0.000000e+00> : vector<16x32xf32>
    %610 = tpu.matmul %608, %609, %cst_199 {dimension_numbers = #tpu.dot_dimension_numbers<[1], [0], [0], [1], [0, 0, 1, 1], [], []>} : vector<16x8xf32>, vector<8x32xf32>, vector<16x32xf32> -> vector<16x32xf32>
    %611 = arith.addf %591, %610 : vector<16x32xf32>
    %612 = vector.broadcast %508 : vector<1x32xf32> to vector<16x32xf32>
    %613 = arith.addf %611, %612 : vector<16x32xf32>
    %614 = arith.addf %516, %613 : vector<16x32xf32>
    %cst_200 = arith.constant dense<0.000000e+00> : vector<16xf32>
    %615 = vector.multi_reduction <add>, %614, %cst_200 [1] : vector<16x32xf32> to vector<16xf32>
    %616 = vector.shape_cast %615 : vector<16xf32> to vector<16x1xf32>
    %cst_201 = arith.constant 3.200000e+01 : f32
    %617 = vector.broadcast %cst_201 : f32 to vector<16x1xf32>
    %618 = arith.divf %616, %617 : vector<16x1xf32>
    %619 = vector.broadcast %618 : vector<16x1xf32> to vector<16x32xf32>
    %620 = arith.subf %614, %619 : vector<16x32xf32>
    %621 = arith.mulf %620, %620 : vector<16x32xf32>
    %cst_202 = arith.constant dense<0.000000e+00> : vector<16xf32>
    %622 = vector.multi_reduction <add>, %621, %cst_202 [1] : vector<16x32xf32> to vector<16xf32>
    %623 = vector.shape_cast %622 : vector<16xf32> to vector<16x1xf32>
    %cst_203 = arith.constant 3.200000e+01 : f32
    %624 = vector.broadcast %cst_203 : f32 to vector<16x1xf32>
    %625 = arith.divf %623, %624 : vector<16x1xf32>
    %626 = vector.broadcast %618 : vector<16x1xf32> to vector<16x32xf32>
    %627 = arith.subf %614, %626 : vector<16x32xf32>
    %cst_204 = arith.constant 9.99999993E-9 : f32
    %628 = vector.broadcast %cst_204 : f32 to vector<16x1xf32>
    %629 = arith.addf %625, %628 : vector<16x1xf32>
    %630 = math.rsqrt %629 : vector<16x1xf32>
    %631 = vector.broadcast %630 : vector<16x1xf32> to vector<16x32xf32>
    %632 = arith.mulf %627, %631 : vector<16x32xf32>
    %633 = vector.broadcast %509 : vector<1x32xf32> to vector<16x32xf32>
    %634 = arith.mulf %632, %633 : vector<16x32xf32>
    %635 = vector.broadcast %510 : vector<1x32xf32> to vector<16x32xf32>
    %636 = arith.addf %634, %635 : vector<16x32xf32>
    %c3_205 = arith.constant 3 : index
    %c0_206 = arith.constant 0 : index
    %c0_207 = arith.constant 0 : index
    %637 = vector.load %arg7[%c3_205, %c0_206, %c0_207] : memref<4x32x32xf32, #tpu.memory_space<vmem>>, vector<1x32x32xf32>
    %638 = vector.shape_cast %637 : vector<1x32x32xf32> to vector<32x32xf32>
    %cst_208 = arith.constant dense<0.000000e+00> : vector<16x32xf32>
    %639 = tpu.matmul %636, %638, %cst_208 {dimension_numbers = #tpu.dot_dimension_numbers<[1], [0], [0], [1], [0, 0, 1, 1], [], []>} : vector<16x32xf32>, vector<32x32xf32>, vector<16x32xf32> -> vector<16x32xf32>
    %640 = vector.broadcast %511 : vector<1x32xf32> to vector<16x32xf32>
    %641 = arith.addf %639, %640 : vector<16x32xf32>
    %cst_209 = arith.constant 0.000000e+00 : f32
    %642 = vector.broadcast %cst_209 : f32 to vector<16x32xf32>
    %643 = arith.maximumf %641, %642 : vector<16x32xf32>
    %c3_210 = arith.constant 3 : index
    %c0_211 = arith.constant 0 : index
    %c0_212 = arith.constant 0 : index
    %644 = vector.load %arg8[%c3_210, %c0_211, %c0_212] : memref<4x32x32xf32, #tpu.memory_space<vmem>>, vector<1x32x32xf32>
    %645 = vector.shape_cast %644 : vector<1x32x32xf32> to vector<32x32xf32>
    %cst_213 = arith.constant dense<0.000000e+00> : vector<16x32xf32>
    %646 = tpu.matmul %643, %645, %cst_213 {dimension_numbers = #tpu.dot_dimension_numbers<[1], [0], [0], [1], [0, 0, 1, 1], [], []>} : vector<16x32xf32>, vector<32x32xf32>, vector<16x32xf32> -> vector<16x32xf32>
    %647 = vector.broadcast %512 : vector<1x32xf32> to vector<16x32xf32>
    %648 = arith.addf %646, %647 : vector<16x32xf32>
    %649 = arith.addf %636, %648 : vector<16x32xf32>
    %cst_214 = arith.constant dense<0.000000e+00> : vector<16xf32>
    %650 = vector.multi_reduction <add>, %649, %cst_214 [1] : vector<16x32xf32> to vector<16xf32>
    %651 = vector.shape_cast %650 : vector<16xf32> to vector<16x1xf32>
    %cst_215 = arith.constant 3.200000e+01 : f32
    %652 = vector.broadcast %cst_215 : f32 to vector<16x1xf32>
    %653 = arith.divf %651, %652 : vector<16x1xf32>
    %654 = vector.broadcast %653 : vector<16x1xf32> to vector<16x32xf32>
    %655 = arith.subf %649, %654 : vector<16x32xf32>
    %656 = arith.mulf %655, %655 : vector<16x32xf32>
    %cst_216 = arith.constant dense<0.000000e+00> : vector<16xf32>
    %657 = vector.multi_reduction <add>, %656, %cst_216 [1] : vector<16x32xf32> to vector<16xf32>
    %658 = vector.shape_cast %657 : vector<16xf32> to vector<16x1xf32>
    %cst_217 = arith.constant 3.200000e+01 : f32
    %659 = vector.broadcast %cst_217 : f32 to vector<16x1xf32>
    %660 = arith.divf %658, %659 : vector<16x1xf32>
    %661 = vector.broadcast %653 : vector<16x1xf32> to vector<16x32xf32>
    %662 = arith.subf %649, %661 : vector<16x32xf32>
    %cst_218 = arith.constant 9.99999993E-9 : f32
    %663 = vector.broadcast %cst_218 : f32 to vector<16x1xf32>
    %664 = arith.addf %660, %663 : vector<16x1xf32>
    %665 = math.rsqrt %664 : vector<16x1xf32>
    %666 = vector.broadcast %665 : vector<16x1xf32> to vector<16x32xf32>
    %667 = arith.mulf %662, %666 : vector<16x32xf32>
    %668 = vector.broadcast %513 : vector<1x32xf32> to vector<16x32xf32>
    %669 = arith.mulf %667, %668 : vector<16x32xf32>
    %670 = vector.broadcast %514 : vector<1x32xf32> to vector<16x32xf32>
    %671 = arith.addf %669, %670 : vector<16x32xf32>
    %672 = vector.shape_cast %671 : vector<16x32xf32> to vector<2x8x32xf32>
    %673 = vector.extract_strided_slice %672 {offsets = [0, 7, 0], sizes = [2, 1, 32], strides = [1, 1, 1]} : vector<2x8x32xf32> to vector<2x1x32xf32>
    %674 = vector.shape_cast %673 : vector<2x1x32xf32> to vector<2x32xf32>
    %c0_219 = arith.constant 0 : index
    %c0_220 = arith.constant 0 : index
    %675 = vector.load %arg10[%c0_219, %c0_220] : memref<1x32xf32, #tpu.memory_space<vmem>>, vector<1x32xf32>
    %676 = vector.broadcast %675 : vector<1x32xf32> to vector<2x32xf32>
    %677 = arith.mulf %674, %676 : vector<2x32xf32>
    %cst_221 = arith.constant dense<0.000000e+00> : vector<2xf32>
    %678 = vector.multi_reduction <add>, %677, %cst_221 [1] : vector<2x32xf32> to vector<2xf32>
    %679 = vector.shape_cast %678 : vector<2xf32> to vector<2x1xf32>
    %c0_222 = arith.constant 0 : index
    %c0_223 = arith.constant 0 : index
    %680 = vector.load %arg11[%c0_222, %c0_223] : memref<1x1xf32, #tpu.memory_space<vmem>>, vector<1x1xf32>
    %681 = vector.broadcast %680 : vector<1x1xf32> to vector<2x1xf32>
    %682 = arith.addf %679, %681 : vector<2x1xf32>
    %c0_224 = arith.constant 0 : index
    %c0_225 = arith.constant 0 : index
    %683 = vector.load %arg12[%c0_224, %c0_225] : memref<2x1xf32, #tpu.memory_space<vmem>>, vector<2x1xf32>
    tpu.vector_store %arg12[%c0_224, %c0_225], %682 {strides = array<i32>} : memref<2x1xf32, #tpu.memory_space<vmem>>, vector<2x1xf32>,
    return
  }
  func.func @transform_0(%arg0: i32) -> (i32, i32, i32) {
    %c0_i32 = arith.constant 0 : i32
    %c0_i32_0 = arith.constant 0 : i32
    %c0_i32_1 = arith.constant 0 : i32
    return %arg0, %c0_i32, %c0_i32_0 : i32, i32, i32
  }
  func.func @transform_1(%arg0: i32) -> (i32, i32, i32) {
    %c0_i32 = arith.constant 0 : i32
    %c0_i32_0 = arith.constant 0 : i32
    %c0_i32_1 = arith.constant 0 : i32
    return %arg0, %c0_i32, %c0_i32_0 : i32, i32, i32
  }
  func.func @transform_2(%arg0: i32) -> (i32, i32, i32) {
    %c0_i32 = arith.constant 0 : i32
    %c0_i32_0 = arith.constant 0 : i32
    %c0_i32_1 = arith.constant 0 : i32
    return %arg0, %c0_i32, %c0_i32_0 : i32, i32, i32
  }
  func.func @transform_3(%arg0: i32) -> (i32, i32, i32) {
    %c0_i32 = arith.constant 0 : i32
    %c0_i32_0 = arith.constant 0 : i32
    %c0_i32_1 = arith.constant 0 : i32
    %c0_i32_2 = arith.constant 0 : i32
    return %c0_i32, %c0_i32_0, %c0_i32_1 : i32, i32, i32
  }
  func.func @transform_4(%arg0: i32) -> (i32, i32, i32) {
    %c0_i32 = arith.constant 0 : i32
    %c0_i32_0 = arith.constant 0 : i32
    %c0_i32_1 = arith.constant 0 : i32
    %c0_i32_2 = arith.constant 0 : i32
    return %c0_i32, %c0_i32_0, %c0_i32_1 : i32, i32, i32
  }
  func.func @transform_5(%arg0: i32) -> (i32, i32, i32) {
    %c0_i32 = arith.constant 0 : i32
    %c0_i32_0 = arith.constant 0 : i32
    %c0_i32_1 = arith.constant 0 : i32
    %c0_i32_2 = arith.constant 0 : i32
    return %c0_i32, %c0_i32_0, %c0_i32_1 : i32, i32, i32
  }
  func.func @transform_6(%arg0: i32) -> (i32, i32, i32) {
    %c0_i32 = arith.constant 0 : i32
    %c0_i32_0 = arith.constant 0 : i32
    %c0_i32_1 = arith.constant 0 : i32
    %c0_i32_2 = arith.constant 0 : i32
    return %c0_i32, %c0_i32_0, %c0_i32_1 : i32, i32, i32
  }
  func.func @transform_7(%arg0: i32) -> (i32, i32, i32) {
    %c0_i32 = arith.constant 0 : i32
    %c0_i32_0 = arith.constant 0 : i32
    %c0_i32_1 = arith.constant 0 : i32
    %c0_i32_2 = arith.constant 0 : i32
    return %c0_i32, %c0_i32_0, %c0_i32_1 : i32, i32, i32
  }
  func.func @transform_8(%arg0: i32) -> (i32, i32, i32) {
    %c0_i32 = arith.constant 0 : i32
    %c0_i32_0 = arith.constant 0 : i32
    %c0_i32_1 = arith.constant 0 : i32
    %c0_i32_2 = arith.constant 0 : i32
    return %c0_i32, %c0_i32_0, %c0_i32_1 : i32, i32, i32
  }
  func.func @transform_9(%arg0: i32) -> (i32, i32) {
    %c0_i32 = arith.constant 0 : i32
    %c0_i32_0 = arith.constant 0 : i32
    %c0_i32_1 = arith.constant 0 : i32
    return %c0_i32, %c0_i32_0 : i32, i32
  }
  func.func @transform_10(%arg0: i32) -> (i32, i32) {
    %c0_i32 = arith.constant 0 : i32
    %c0_i32_0 = arith.constant 0 : i32
    %c0_i32_1 = arith.constant 0 : i32
    return %c0_i32, %c0_i32_0 : i32, i32
  }
  func.func @transform_11(%arg0: i32) -> (i32, i32) {
    %c0_i32 = arith.constant 0 : i32
    %c0_i32_0 = arith.constant 0 : i32
    return %arg0, %c0_i32 : i32, i32
  }
}

</mosaic_0001>

<bundles_post_ra>
// kernel: tpu_custom_call.1
= control target key start
LH: loop header
LB: loop body
LE: loop exit
PB: predicated region body
PF: predicated region fallthrough
CT: control target
= control target key end

     0   :  { %s10750_s0 = inlined_call_operand.vmem [shape: bf16[2,8,32], index: 0, kind: input, shape index: {}]   ;;  %s10751_s1 = inlined_call_operand.vmem [shape: bf16[2,8,32], index: 1, kind: input, shape index: {}]   ;;  %s10752_s2 = inlined_call_operand.vmem [shape: f32[2,1,8], index: 2, kind: input, shape index: {}]   ;;  %s10753_s3 = inlined_call_operand.hbm [shape: f32[4,32,96], index: 3, kind: input, shape index: {}]   ;;  %s10754_s4 = inlined_call_operand.vmem [shape: f32[4,1,96], index: 4, kind: input, shape index: {}]   ;;  %s10755_s5 = inlined_call_operand.hbm [shape: f32[4,32,32], index: 5, kind: input, shape index: {}]   ;;  %s10756_s6 = inlined_call_operand.hbm [shape: f32[4,32,32], index: 6, kind: input, shape index: {}]   ;;  %s10757_s7 = inlined_call_operand.hbm [shape: f32[4,32,32], index: 7, kind: input, shape index: {}]   ;;  %s10758_s8 = inlined_call_operand.vmem [shape: f32[4,7,32], index: 8, kind: input, shape index: {}]   ;;  %s10759_s9 = inlined_call_operand.vmem [shape: f32[1,32], index: 9, kind: input, shape index: {}]   ;;  %s10760_s10 = inlined_call_operand.<no memory space> [shape: f32[1,1], index: 10, kind: input, shape index: {}]   ;;  %s10761_s11 = inlined_call_operand.vmem [shape: f32[2,1], index: 11, kind: output, shape index: {}]  }
   0x1   :  { %v16_v0 = vstv %s10760_s10 }
   0x2   :  { %17 = vst [vmem:[#allocation2] sm:$0x1] %v16_v0 }
   0x3   :  { %18 = vsyncpa [#allocation4], 0 }
   0x4   :  { %19 = vsyncpa [#allocation6], 0 }
   0x5   :  { %20 = vsyncpa [#allocation9], 0  ;;  %s9690_s19 = smov [#allocation5]   ;;  %s9691_s21 = smov [#allocation3]  }
   0x6   :  { %s46_s20 = sshll.u32 %s9690_s19, 4  ;;  %s32_s22 = sshll.u32 %s9691_s21, 4  ;;  %s47_s20 = int_to_ptr.vmem [resolvable:$true] %s46_s20  ;;  %s9772_s22 = int_to_ptr.vmem [resolvable:$true] %s32_s22 }
   0x7   :  { %s9596_s25 = scalar_lea.hbm %s10755_s5, 2048 }
   0x8   :  { %p9597_p0 = scmp.ne.s32.totalorder %s10755_s5, %s9596_s25  ;;  %p9600_p1 = scmp.lt.u32.totalorder %s9596_s25, %s10755_s5 }
   0xa   :  { %p9602_p2 = pnand %p9600_p1, %p9597_p0 }
   0xc   :  { %9605 = shalt.err (!%p9602_p2)
}
   0xd   :  { %s9606_s29 = scalar_lea.vmem %s47_s20, 2048  ;;  %p9611_p4 = scmp.lt.s32.totalorder %s47_s20, %s47_s20 }
   0xe   :  { %p9607_p3 = scmp.ne.s32.totalorder %s47_s20, %s9606_s29  ;;  %p9612_p5 = scmp.lt.s32.totalorder %s9606_s29, %s9606_s29 }
  0x10   :  { %p9613_p6 = por %p9612_p5, %p9611_p4 }
  0x12   :  { %p9614_p7 = pnand %p9613_p6, %p9607_p3 }
  0x14   :  { %9617 = shalt.err (!%p9614_p7)
}
  0x15   :  { %s9692_s30 = smov 128   ;;  %s9693_s12 = smov 8  }
  0x16   :  { %52 = dma.hbm_to_vmem [thread:$0]  %s10755_s5, 2048, %s47_s20, [#allocation6], %s9692_s30, %s9692_s30, %s9693_s12  }
  0x17   :  { %s9618_s17 = scalar_lea.hbm %s10753_s3, 2048 }
  0x18   :  { %p9619_p8 = scmp.ne.s32.totalorder %s10753_s3, %s9618_s17  ;;  %p9622_p9 = scmp.lt.u32.totalorder %s9618_s17, %s10753_s3 }
  0x1a   :  { %p9624_p10 = pnand %p9622_p9, %p9619_p8 }
  0x1c   :  { %9627 = shalt.err (!%p9624_p10)
}
  0x1d   :  { %s9628_s24 = scalar_lea.vmem %s9772_s22, 2048  ;;  %p9633_p12 = scmp.lt.s32.totalorder %s9772_s22, %s9772_s22 }
  0x1e   :  { %p9629_p11 = scmp.ne.s32.totalorder %s9772_s22, %s9628_s24  ;;  %p9634_p13 = scmp.lt.s32.totalorder %s9628_s24, %s9628_s24 }
  0x20   :  { %p9635_p0 = por %p9634_p13, %p9633_p12 }
  0x22   :  { %p9636_p1 = pnand %p9635_p0, %p9629_p11 }
  0x24   :  { %9639 = shalt.err (!%p9636_p1)
}
  0x25   :  { %38 = dma.hbm_to_vmem [thread:$0]  %s10753_s3, 2048, %s9772_s22, [#allocation4], %s9692_s30, %s9692_s30, %s9693_s12  }
  0x26   :  { %s9694_s25 = smov [#allocation7]   ;;  %s9695_s27 = smov [#allocation8]  }
  0x27   :  { %s58_s26 = sshll.u32 %s9694_s25, 4  ;;  %s70_s10 = sshll.u32 %s9695_s27, 4  ;;  %s59_s26 = int_to_ptr.vmem [resolvable:$true] %s58_s26  ;;  %s9809_s10 = int_to_ptr.vmem [resolvable:$true] %s70_s10 }
  0x28   :  { %s9640_s13 = scalar_lea.hbm %s10756_s6, 2048 }
  0x29   :  { %p9641_p2 = scmp.ne.s32.totalorder %s10756_s6, %s9640_s13  ;;  %p9644_p3 = scmp.lt.u32.totalorder %s9640_s13, %s10756_s6 }
  0x2b   :  { %p9646_p4 = pnand %p9644_p3, %p9641_p2 }
  0x2d   :  { %9649 = shalt.err (!%p9646_p4)
}
  0x2e   :  { %s9650_s3 = scalar_lea.vmem %s59_s26, 2048  ;;  %p9655_p6 = scmp.lt.s32.totalorder %s59_s26, %s59_s26 }
  0x2f   :  { %p9651_p5 = scmp.ne.s32.totalorder %s59_s26, %s9650_s3  ;;  %p9656_p7 = scmp.lt.s32.totalorder %s9650_s3, %s9650_s3 }
  0x31   :  { %p9657_p8 = por %p9656_p7, %p9655_p6 }
  0x33   :  { %p9658_p9 = pnand %p9657_p8, %p9651_p5 }
  0x35   :  { %9661 = shalt.err (!%p9658_p9)
}
  0x36   :  { %64 = dma.hbm_to_vmem [thread:$0]  %s10756_s6, 2048, %s59_s26, [#allocation6], %s9692_s30, %s9692_s30, %s9693_s12  }
  0x37   :  { %s9662_s23 = scalar_lea.hbm %s10757_s7, 2048 }
  0x38   :  { %p9663_p10 = scmp.ne.s32.totalorder %s10757_s7, %s9662_s23  ;;  %p9666_p11 = scmp.lt.u32.totalorder %s9662_s23, %s10757_s7 }
  0x3a   :  { %p9668_p12 = pnand %p9666_p11, %p9663_p10 }
  0x3c   :  { %9671 = shalt.err (!%p9668_p12)
}
  0x3d   :  { %s9672_s27 = scalar_lea.vmem %s9809_s10, 2048  ;;  %p9677_p0 = scmp.lt.s32.totalorder %s9809_s10, %s9809_s10 }
  0x3e   :  { %p9673_p13 = scmp.ne.s32.totalorder %s9809_s10, %s9672_s27  ;;  %p9678_p1 = scmp.lt.s32.totalorder %s9672_s27, %s9672_s27 }
  0x40   :  { %p9679_p2 = por %p9678_p1, %p9677_p0 }
  0x42   :  { %p9680_p3 = pnand %p9679_p2, %p9673_p13 }
  0x44   :  { %9683 = shalt.err (!%p9680_p3)
}
  0x45   :  { %76 = dma.hbm_to_vmem [thread:$0]  %s10757_s7, 2048, %s9809_s10, [#allocation9], %s9692_s30, %s9692_s30, %s9693_s12  }
  0x46   :  { %9684 = dma.done.wait [#allocation4], 2048  }
  0x47   :  { %9685 = vsyncadd [#allocation4], 4294965248 }
  0x48   :  { %9686 = dma.done.wait [#allocation6], 4096  }
  0x49   :  { %9687 = vsyncadd [#allocation6], 4294963200 }
  0x4a   :  { %9688 = dma.done.wait [#allocation9], 2048  }
  0x4b   :  { %9689 = vsyncadd [#allocation9], 4294965248  ;;  %v127_v1 = vld [vmem:[#allocation3] sm:$0xff]  ;;  %v128_v2 = vld [vmem:[#allocation3 + $0x8] sm:$0xff]  ;;  %vm138_vm0 = vcmask 261120   ;;  %v9696_v10 = vmov 0.0   ;;  %v95_v18 = vlaneseq }
  0x4c   :  { %v129_v3 = vld [vmem:[#allocation3 + $0x10] sm:$0xff]  ;;  %v9288_v4 = vpack.c.bf16 %v128_v2, %v127_v1  ;;  %v130_v5 = vld [vmem:[#allocation3 + $0x18] sm:$0xff]  ;;  %8756 = vmatprep.subr.mxu1 %v9696_v10  ;;  %vm9697_vm1 = vmmov 0   ;;  %s9698_s30 = smov 96   ;;  %vm227_vm2 = vcmask 64512   ;;  %s9700_s15 = smov 88  }
  0x4d   :  { %v9849_v6 = vld [vmem:[%s10750_s0] sm:$0xff]   ;;  %v9292_v7 = vpack.c.bf16 %v130_v5, %v129_v3  ;;  %8758 = vmatprep.mubr.msk.f32.mxu1 %vm9697_vm1, %v9696_v10  ;;  %v9888_v19 = vshrl.u32 %v95_v18, 7  ;;  %v98_v20 = vand.u32 127, %v95_v18  ;;  %s9701_s16 = smov 120   ;;  %s9702_s17 = smov 56   ;;  %vm8284_vm4 = vcmask 261127  }
  0x4e   :  { %v8485_v8 = vunpack.c.l.bf16 %v9849_v6  ;;  %9289 = vmatprep.subr.bf16.mxu0 %v9288_v4  ;;  %v8486_v9 = vunpack.c.h.bf16 %v9849_v6  ;;  %v8317_v11 = vld [vmem:[%s10754_s4] ss:$0 sm:$0xff]  ;;  %v8314_v24 = vld [vmem:[%s10752_s2 + $0x1] ss:$0 sm:$0xff]  ;;  %s9703_s3 = smov 112   ;;  %s9704_s22 = smov 80  }
  0x4f   :  { %9291 = vmatpush3.bf16.msra.mxu0 %v9288_v4  ;;  %vm99_vm3 = vcmp.le.s32.totalorder %v98_v20, %v9888_v19  ;;  %v8313_v22 = vld [vmem:[%s10752_s2] ss:$0 sm:$0xff]  ;;  %s9699_s2 = smov 64   ;;  %s9705_s18 = smov 48   ;;  %vm8288_vm5 = vcmask 253952   ;;  %vm8301_vm6 = vcmask 7175  }
  0x50   :  { %8753 = vmatprep.mubr.msk.f32.mxu0 %vm138_vm0, %v8485_v8  ;;  %9293 = vmatprep.subr.bf16.mxu0 %v9292_v7  ;;  %v8312_v21 = vsel %vm99_vm3, 1.0, %v9696_v10  ;;  %s9706_s19 = smov 72   ;;  %s9707_s21 = smov 104   ;;  %vm8303_vm7 = vcmask 0  }
  0x51   :  { %v116_v23 = vmul.f32 %v8313_v22, %v8312_v21  ;;  %v117_v26 = vmul.f32 %v8314_v24, %v8312_v21  ;;  %s9708_s23 = smov 40  }
  0x53   :  { %9295 = vmatpush3.bf16.msra.mxu0 %v9292_v7  ;;  %v8315_v25 = vadd.f32 -1.0, %v116_v23  ;;  %v8316_v28 = vadd.f32 -1.0, %v117_v26 }
  0x54   :  { %8776 = vmatprep.subr.mxu0 %v9696_v10 }
  0x55   :  { %v9898_v27 = vmul.f32 1e+09, %v8315_v25  ;;  %v9901_v32 = vmul.f32 1e+09, %v8316_v28 }
  0x56   :  { %8754 = vmatmul.mubr.msk.f32.vlgmr.msra.gmra.mrb[0].mxu0 %vm138_vm0, %v8486_v9 }
  0x57   :  { %8778 = vmatprep.mubr.msk.f32.mxu0 %vm9697_vm1, %v9696_v10 }
 0x129   :  { %v8755_v12 = vpop.f32.mrb[0].mxu0 }
 0x12a   :  { %v211_v13 = vpop.f32.mrb[1].mxu0  ;;  %v9872_v15 = vadd.f32 %v8755_v12, %v8317_v11 }
 0x12b   :  { %v9868_v14 = vadd.f32 %v8317_v11, %v211_v13 }
 0x12d   :  { %225 = vrot.lane.b32.xlu0 %v9868_v14, %s9698_s30 }
 0x131   :  { %303 = vrot.lane.b32.xlu0 %v9872_v15, %s9698_s30 }
 0x19f   :  { %v226_v16 = vpop.permute.xlu0 %225 }
 0x1a0   :  { %8757 = vmatpush3.xpose.msk.msra.mxu1 %vm227_vm2, %v226_v16 }
 0x1a1   :  { %8761 = vmatprep.subr.mxu1 %v9696_v10 }
 0x1a3   :  { %8759 = vmatmul.mubr.msk.f32.vlgmr.msra.gmra.mrb[0].mxu1 %vm227_vm2, %v9868_v14  ;;  %v304_v17 = vpop.permute.xlu0 %303 }
 0x1a4   :  { %8762 = vmatpush3.xpose.msk.msra.mxu1 %vm227_vm2, %v304_v17  ;;  %8763 = vmatprep.mubr.msk.f32.mxu1 %vm9697_vm1, %v9696_v10 }
 0x1a5   :  { %8766 = vmatprep.subr.mxu1 %v9696_v10 }
 0x1a7   :  { %8764 = vmatmul.mubr.msk.f32.vlgmr.msra.gmra.mrb[2].mxu1 %vm227_vm2, %v9872_v15 }
 0x1a8   :  { %8768 = vmatprep.mubr.msk.f32.mxu1 %vm9697_vm1, %v9696_v10 }
 0x276   :  { %v298_v29 = vpop.f32.mrb[0].mxu1 }
 0x277   :  { %v299_v30 = vadd.f32 %v298_v29, %v9898_v27  ;;  %v8760_v31 = vpop.f32.mrb[1].mxu1 }
 0x279   :  { %v379_v33 = vsel %vm227_vm2, %v299_v30, -inf }
 0x27a   :  { %v375_v34 = vpop.f32.mrb[2].mxu1  ;;  %380 = vmax.xlane.f32.xlu1 %v379_v33 }
 0x27b   :  { %v376_v35 = vadd.f32 %v375_v34, %v9901_v32  ;;  %v8765_v36 = vpop.f32.mrb[3].mxu1 }
 0x27d   :  { %v382_v37 = vsel %vm227_vm2, %v376_v35, -inf }
 0x27e   :  { %383 = vmax.xlane.f32.xlu1 %v382_v37 }
 0x28f   :  { %401 = vrot.lane.b32.xlu1 %v9868_v14, %s9699_s2 }
 0x293   :  { %477 = vrot.lane.b32.xlu1 %v9872_v15, %s9699_s2 }
 0x297   :  { %633 = vrot.lane.b32.xlu1 %v9872_v15, %s9700_s15 }
 0x307   :  { %v381_v38 = vpop.xlane.xlu1 %380 }
 0x308   :  { %v385_v39 = vsub.f32 %v299_v30, %v381_v38 }
 0x30a   :  { %v387_v40 = vmul.f32 1.442695, %v385_v39 }
 0x30b   :  { %v384_v41 = vpop.xlane.xlu1 %383 }
 0x30c   :  { %9435 = vpow2.f32 %v387_v40  ;;  %v386_v42 = vsub.f32 %v376_v35, %v384_v41  ;;  %v221_v40 = vld [vmem:[#allocation5 + $0x8] sm:$0xff]  ;;  %v220_v41 = vld [vmem:[#allocation5] sm:$0xff] }
 0x30e   :  { %v389_v43 = vmul.f32 1.442695, %v386_v42 }
 0x30f   :  { %v402_v44 = vpop.permute.xlu1 %401 }
 0x310   :  { %9437 = vpow2.f32 %v389_v43  ;;  %8767 = vmatpush3.msra.mxu1 %v402_v44 }
 0x311   :  { %8771 = vmatprep.subr.mxu1 %v9696_v10 }
 0x313   :  { %v478_v49 = vpop.permute.xlu1 %477 }
 0x316   :  { %v9436_v45 = vpop.eup %9435 }
 0x317   :  { %v391_v46 = vsel %vm227_vm2, %v9436_v45, 0.0  ;;  %v634_v50 = vpop.permute.xlu1 %633 }
 0x318   :  { %392 = vadd.xlane.f32.xlu0 %v391_v46 }
 0x31a   :  { %v9438_v47 = vpop.eup %9437 }
 0x31b   :  { %v394_v48 = vsel %vm227_vm2, %v9438_v47, 0.0 }
 0x31c   :  { %395 = vadd.xlane.f32.xlu1 %v394_v48 }
 0x32d   :  { %631 = vrot.lane.b32.xlu1 %v9872_v15, %s9701_s16 }
 0x32e   :  { %555 = vrot.lane.b32.xlu0 %v9868_v14, %s9700_s15 }
 0x331   :  { %553 = vrot.lane.b32.xlu1 %v9868_v14, %s9701_s16 }
 0x3a5   :  { %v393_v51 = vpop.xlane.xlu0 %392 }
 0x3a6   :  { %9439 = vrcp.f32 %v393_v51 }
 0x3a9   :  { %v556_v52 = vpop.permute.xlu0 %555  ;;  %v396_v53 = vpop.xlane.xlu1 %395 }
 0x3aa   :  { %9441 = vrcp.f32 %v396_v53  ;;  %8777 = vmatpush3.xpose.msk.msra.mxu0 %vm227_vm2, %v556_v52 }
 0x3ab   :  { %8786 = vmatprep.subr.mxu0 %v9696_v10 }
 0x3ad   :  { %v632_v54 = vpop.permute.xlu1 %631 }
 0x3b0   :  { %v9440_v55 = vpop.eup %9439 }
 0x3b1   :  { %v554_v56 = vpop.permute.xlu1 %553  ;;  %v399_v57 = vmul.f32 %v9440_v55, %v9436_v45 }
 0x3b2   :  { %8779 = vmatmul.mubr.msk.f32.vlgmr.msra.gmra.mrb[2].mxu0 %vm227_vm2, %v554_v56 }
 0x3b3   :  { %8769 = vmatmul.mubr.msk.f32.vlgmr.msra.gmra.mrb[4].mxu1 %vm227_vm2, %v399_v57  ;;  %8788 = vmatprep.mubr.msk.f32.mxu0 %vm9697_vm1, %v9696_v10 }
 0x3b4   :  { %v9442_v58 = vpop.eup %9441  ;;  %8772 = vmatpush3.msra.mxu1 %v478_v49  ;;  %8773 = vmatprep.mubr.msk.f32.mxu1 %vm9697_vm1, %v9696_v10 }
 0x3b5   :  { %v400_v59 = vmul.f32 %v9442_v58, %v9438_v47  ;;  %8781 = vmatprep.subr.mxu1 %v9696_v10 }
 0x3b7   :  { %8774 = vmatmul.mubr.msk.f32.vlgmr.msra.gmra.mrb[6].mxu1 %vm227_vm2, %v400_v59 }
 0x3b8   :  { %8783 = vmatprep.mubr.msk.f32.mxu1 %vm9697_vm1, %v9696_v10 }
 0x3bb   :  { %8782 = vmatpush3.xpose.msk.msra.mxu1 %vm227_vm2, %v634_v50 }
 0x3bc   :  { %8791 = vmatprep.subr.mxu1 %v9696_v10 }
 0x3be   :  { %8784 = vmatmul.mubr.msk.f32.vlgmr.msra.gmra.mrb[8].mxu1 %vm227_vm2, %v632_v54 }
 0x3bf   :  { %8793 = vmatprep.mubr.msk.f32.mxu1 %vm9697_vm1, %v9696_v10 }
 0x485   :  { %v627_v60 = vpop.f32.mrb[2].mxu0 }
 0x486   :  { %v9938_v61 = vpop.f32.mrb[4].mxu1  ;;  %v8780_v62 = vpop.f32.mrb[3].mxu0  ;;  %v628_v7 = vadd.f32 %v627_v60, %v9898_v27 }
 0x487   :  { %v8770_v63 = vpop.f32.mrb[5].mxu1 }
 0x488   :  { %v709_v11 = vsel %vm227_vm2, %v628_v7, -inf }
 0x48a   :  { %v9940_v0 = vpop.f32.mrb[6].mxu1 }
 0x48b   :  { %v8775_v1 = vpop.f32.mrb[7].mxu1 }
 0x491   :  { %v705_v2 = vpop.f32.mrb[8].mxu1 }
 0x492   :  { %v706_v3 = vadd.f32 %v705_v2, %v9901_v32  ;;  %v8785_v4 = vpop.f32.mrb[9].mxu1  ;;  %v222_v2 = vld [vmem:[#allocation5 + $0x10] sm:$0xff] }
 0x494   :  { %v712_v5 = vsel %vm227_vm2, %v706_v3, -inf }
 0x495   :  { %713 = vmax.xlane.f32.xlu1 %v712_v5 }
 0x4a6   :  { %807 = vrot.lane.b32.xlu1 %v9872_v15, %s9702_s17 }
 0x4aa   :  { %1045 = vrot.lane.b32.xlu1 %v9868_v14, %s9703_s3 }
 0x4ae   :  { %1125 = vrot.lane.b32.xlu1 %v9872_v15, %s9704_s22 }
 0x4b2   :  { %1123 = vrot.lane.b32.xlu1 %v9872_v15, %s9703_s3 }
 0x4d6   :  { %710 = vmax.xlane.f32.xlu1 %v709_v11 }
 0x522   :  { %v714_v12 = vpop.xlane.xlu1 %713 }
 0x523   :  { %v716_v13 = vsub.f32 %v706_v3, %v714_v12 }
 0x525   :  { %v719_v16 = vmul.f32 1.442695, %v716_v13 }
 0x526   :  { %v808_v17 = vpop.permute.xlu1 %807 }
 0x527   :  { %9443 = vpow2.f32 %v719_v16  ;;  %8792 = vmatpush3.msra.mxu1 %v808_v17 }
 0x528   :  { %8806 = vmatprep.subr.mxu1 %v9696_v10 }
 0x52a   :  { %v1046_v21 = vpop.permute.xlu1 %1045 }
 0x52e   :  { %v1126_v22 = vpop.permute.xlu1 %1125 }
 0x531   :  { %v9444_v18 = vpop.eup %9443 }
 0x532   :  { %v724_v20 = vsel %vm227_vm2, %v9444_v18, 0.0  ;;  %v1124_v23 = vpop.permute.xlu1 %1123 }
 0x533   :  { %725 = vadd.xlane.f32.xlu0 %v724_v20 }
 0x549   :  { %1047 = vrot.lane.b32.xlu0 %v9868_v14, %s9704_s22 }
 0x563   :  { %v711_v24 = vpop.xlane.xlu1 %710 }
 0x564   :  { %v715_v25 = vsub.f32 %v628_v7, %v711_v24 }
 0x566   :  { %v717_v26 = vmul.f32 1.442695, %v715_v25 }
 0x568   :  { %9445 = vpow2.f32 %v717_v26 }
 0x572   :  { %v9446_v28 = vpop.eup %9445 }
 0x573   :  { %v721_v29 = vsel %vm227_vm2, %v9446_v28, 0.0 }
 0x574   :  { %722 = vadd.xlane.f32.xlu0 %v721_v29 }
 0x58a   :  { %731 = vrot.lane.b32.xlu0 %v9868_v14, %s9702_s17 }
 0x58e   :  { %1299 = vrot.lane.b32.xlu0 %v9872_v15, %s9705_s18 }
 0x592   :  { %1460 = vrot.lane.b32.xlu0 %v9868_v14, %s9706_s19 }
 0x596   :  { %1538 = vrot.lane.b32.xlu0 %v9872_v15, %s9706_s19 }
 0x59a   :  { %1458 = vrot.lane.b32.xlu0 %v9868_v14, %s9707_s21 }
 0x5c0   :  { %v726_v30 = vpop.xlane.xlu0 %725 }
 0x5c1   :  { %9447 = vrcp.f32 %v726_v30 }
 0x5c4   :  { %v1048_v34 = vpop.permute.xlu0 %1047 }
 0x5cb   :  { %v9448_v31 = vpop.eup %9447 }
 0x5cc   :  { %v730_v33 = vmul.f32 %v9448_v31, %v9444_v18 }
 0x5ce   :  { %8794 = vmatmul.mubr.msk.f32.vlgmr.msra.gmra.mrb[10].mxu1 %vm227_vm2, %v730_v33 }
 0x5cf   :  { %8807 = vmatpush3.xpose.msk.msra.mxu1 %vm227_vm2, %v1048_v34  ;;  %8808 = vmatprep.mubr.msk.f32.mxu1 %vm9697_vm1, %v9696_v10 }
 0x5d0   :  { %8811 = vmatprep.subr.mxu1 %v9696_v10 }
 0x5d2   :  { %8809 = vmatmul.mubr.msk.f32.vlgmr.msra.gmra.mrb[12].mxu1 %vm227_vm2, %v1046_v21 }
 0x5d3   :  { %8812 = vmatpush3.xpose.msk.msra.mxu1 %vm227_vm2, %v1126_v22  ;;  %8813 = vmatprep.mubr.msk.f32.mxu1 %vm9697_vm1, %v9696_v10 }
 0x5d4   :  { %8821 = vmatprep.subr.mxu1 %v9696_v10 }
 0x5d6   :  { %8814 = vmatmul.mubr.msk.f32.vlgmr.msra.gmra.mrb[14].mxu1 %vm227_vm2, %v1124_v23 }
 0x5d7   :  { %8823 = vmatprep.mubr.msk.f32.mxu1 %vm9697_vm1, %v9696_v10 }
 0x601   :  { %v723_v35 = vpop.xlane.xlu0 %722 }
 0x602   :  { %9449 = vrcp.f32 %v723_v35 }
 0x605   :  { %v732_v36 = vpop.permute.xlu0 %731 }
 0x606   :  { %8787 = vmatpush3.msra.mxu0 %v732_v36 }
 0x607   :  { %8796 = vmatprep.subr.mxu0 %v221_v40 }
 0x609   :  { %v1300_v37 = vpop.permute.xlu0 %1299 }
 0x60a   :  { %8822 = vmatpush3.msra.mxu1 %v1300_v37 }
 0x60b   :  { %8831 = vmatprep.subr.mxu1 %v9696_v10 }
 0x60c   :  { %v9450_v38 = vpop.eup %9449 }
 0x60d   :  { %v729_v39 = vmul.f32 %v9450_v38, %v9446_v28  ;;  %v1461_v4 = vpop.permute.xlu0 %1460 }
 0x60f   :  { %8789 = vmatmul.mubr.msk.f32.vlgmr.msra.gmra.mrb[4].mxu0 %vm227_vm2, %v729_v39 }
 0x610   :  { %8797 = vmatpush3.msra.mxu0 %v221_v40 }
 0x611   :  { %8801 = vmatprep.subr.mxu0 %v220_v41  ;;  %v1539_v12 = vpop.permute.xlu0 %1538 }
 0x615   :  { %v1459_v16 = vpop.permute.xlu0 %1458 }
 0x6a1   :  { %v879_v42 = vpop.f32.mrb[10].mxu1 }
 0x6a2   :  { %v8795_v43 = vpop.f32.mrb[11].mxu1 }
 0x6a5   :  { %v1119_v44 = vpop.f32.mrb[12].mxu1 }
 0x6a6   :  { %v1120_v45 = vadd.f32 %v1119_v44, %v9898_v27  ;;  %v8810_v46 = vpop.f32.mrb[13].mxu1 }
 0x6a8   :  { %v1201_v47 = vsel %vm227_vm2, %v1120_v45, -inf }
 0x6a9   :  { %1202 = vmax.xlane.f32.xlu1 %v1201_v47  ;;  %v1197_v48 = vpop.f32.mrb[14].mxu1  ;;  %v223_v47 = vld [vmem:[#allocation5 + $0x18] sm:$0xff] }
 0x6aa   :  { %v1198_v49 = vadd.f32 %v1197_v48, %v9901_v32  ;;  %v8815_v50 = vpop.f32.mrb[15].mxu1 }
 0x6ac   :  { %v1204_v51 = vsel %vm227_vm2, %v1198_v49, -inf }
 0x6ad   :  { %1205 = vmax.xlane.f32.xlu1 %v1204_v51 }
 0x6e2   :  { %v803_v52 = vpop.f32.mrb[4].mxu0 }
 0x6e3   :  { %v8790_v53 = vpop.f32.mrb[5].mxu0  ;;  %8798 = vmatprep.mubr.msk.f32.mxu0 %vm227_vm2, %v803_v52 }
 0x6e4   :  { %8799 = vmatmul.mubr.msk.f32.vlgmr.msra.gmra.mrb[6].mxu0 %vm227_vm2, %v879_v42 }
 0x6e5   :  { %8803 = vmatprep.mubr.msk.f32.mxu0 %vm227_vm2, %v9938_v61  ;;  %8802 = vmatpush3.msra.mxu0 %v220_v41 }
 0x6e6   :  { %8816 = vmatprep.subr.mxu0 %v9696_v10 }
 0x6ec   :  { %8804 = vmatmul.mubr.msk.f32.vlgmr.msra.gmra.mrb[6].mxu0 %vm227_vm2, %v9940_v0 }
 0x6ed   :  { %8818 = vmatprep.mubr.msk.f32.mxu0 %vm9697_vm1, %v9696_v10 }
 0x736   :  { %v1203_v54 = vpop.xlane.xlu1 %1202 }
 0x737   :  { %v1207_v55 = vsub.f32 %v1120_v45, %v1203_v54 }
 0x739   :  { %v1209_v56 = vmul.f32 1.442695, %v1207_v55  ;;  %v10042_v55 = vld [vmem:[%s10758_s8] sm:$0x7f] }
 0x73a   :  { %v1206_v57 = vpop.xlane.xlu1 %1205 }
 0x73b   :  { %9451 = vpow2.f32 %v1209_v56  ;;  %v1208_v58 = vsub.f32 %v1198_v49, %v1206_v57 }
 0x73d   :  { %v1211_v59 = vmul.f32 1.442695, %v1208_v58 }
 0x73f   :  { %9453 = vpow2.f32 %v1211_v59 }
 0x745   :  { %v9452_v60 = vpop.eup %9451 }
 0x746   :  { %v1213_v61 = vsel %vm227_vm2, %v9452_v60, 0.0 }
 0x747   :  { %1214 = vadd.xlane.f32.xlu1 %v1213_v61 }
 0x749   :  { %v9454_v62 = vpop.eup %9453 }
 0x74a   :  { %v1216_v63 = vsel %vm227_vm2, %v9454_v62, 0.0 }
 0x74b   :  { %1217 = vadd.xlane.f32.xlu1 %v1216_v63 }
 0x75c   :  { %1223 = vrot.lane.b32.xlu1 %v9868_v14, %s9705_s18 }
 0x760   :  { %1536 = vrot.lane.b32.xlu1 %v9872_v15, %s9707_s21 }
 0x7d4   :  { %v1215_v0 = vpop.xlane.xlu1 %1214 }
 0x7d5   :  { %9455 = vrcp.f32 %v1215_v0 }
 0x7d8   :  { %v1218_v1 = vpop.xlane.xlu1 %1217 }
 0x7d9   :  { %9457 = vrcp.f32 %v1218_v1 }
 0x7dc   :  { %v1224_v3 = vpop.permute.xlu1 %1223 }
 0x7dd   :  { %8817 = vmatpush3.msra.mxu0 %v1224_v3 }
 0x7de   :  { %8826 = vmatprep.subr.mxu0 %v222_v2 }
 0x7df   :  { %v9456_v5 = vpop.eup %9455 }
 0x7e0   :  { %v1221_v7 = vmul.f32 %v9456_v5, %v9452_v60  ;;  %v1537_v22 = vpop.permute.xlu1 %1536 }
 0x7e2   :  { %8819 = vmatmul.mubr.msk.f32.vlgmr.msra.gmra.mrb[8].mxu0 %vm227_vm2, %v1221_v7 }
 0x7e3   :  { %v9458_v11 = vpop.eup %9457  ;;  %8827 = vmatpush3.msra.mxu0 %v222_v2 }
 0x7e4   :  { %v1222_v13 = vmul.f32 %v9458_v11, %v9454_v62  ;;  %8836 = vmatprep.subr.mxu0 %v9696_v10 }
 0x7e6   :  { %8824 = vmatmul.mubr.msk.f32.vlgmr.msra.gmra.mrb[16].mxu1 %vm227_vm2, %v1222_v13 }
 0x7e7   :  { %8832 = vmatpush3.xpose.msk.msra.mxu1 %vm227_vm2, %v1461_v4  ;;  %8833 = vmatprep.mubr.msk.f32.mxu1 %vm9697_vm1, %v9696_v10 }
 0x7e8   :  { %8841 = vmatprep.subr.mxu1 %v9696_v10 }
 0x7ea   :  { %8834 = vmatmul.mubr.msk.f32.vlgmr.msra.gmra.mrb[18].mxu1 %vm227_vm2, %v1459_v16 }
 0x7eb   :  { %8843 = vmatprep.mubr.msk.f32.mxu1 %vm9697_vm1, %v9696_v10 }
 0x8b5   :  { %v1295_v17 = vpop.f32.mrb[8].mxu0 }
 0x8b6   :  { %v8820_v18 = vpop.f32.mrb[9].mxu0  ;;  %8828 = vmatprep.mubr.msk.f32.mxu0 %vm227_vm2, %v1295_v17  ;;  %v1920_v17 = vld [vmem:[#allocation7 + $0x10] sm:$0xff] }
 0x8b7   :  { %v1921_v18 = vld [vmem:[#allocation7 + $0x18] sm:$0xff] }
 0x8b9   :  { %v1371_v20 = vpop.f32.mrb[16].mxu1 }
 0x8ba   :  { %v8825_v21 = vpop.f32.mrb[17].mxu1  ;;  %8829 = vmatmul.mubr.msk.f32.vlgmr.msra.gmra.mrb[6].mxu0 %vm227_vm2, %v1371_v20  ;;  %v9300_v20 = vpack.c.bf16 %v1921_v18, %v1920_v17  ;;  %v2143_v17 = vld [vmem:[#allocation3 + $0x30] sm:$0xff]  ;;  %v2144_v18 = vld [vmem:[#allocation3 + $0x38] sm:$0xff] }
 0x8bb   :  { %8837 = vmatpush3.xpose.msk.msra.mxu0 %vm227_vm2, %v1539_v12  ;;  %8838 = vmatprep.mubr.msk.f32.mxu0 %vm9697_vm1, %v9696_v10  ;;  %v2009_v21 = vld [vmem:[#allocation8] sm:$0xff] }
 0x8bc   :  { %8846 = vmatprep.subr.mxu0 %v9696_v10 }
 0x8bd   :  { %v1532_v23 = vpop.f32.mrb[18].mxu1 }
 0x8be   :  { %v1533_v24 = vadd.f32 %v1532_v23, %v9898_v27  ;;  %v8835_v25 = vpop.f32.mrb[19].mxu1  ;;  %8839 = vmatmul.mubr.msk.f32.vlgmr.msra.gmra.mrb[10].mxu0 %vm227_vm2, %v1537_v22  ;;  %v2010_v22 = vld [vmem:[#allocation8 + $0x8] sm:$0xff] }
 0x8bf   :  { %8848 = vmatprep.mubr.msk.f32.mxu0 %vm9697_vm1, %v9696_v10  ;;  %v9304_v23 = vpack.c.bf16 %v2010_v22, %v2009_v21 }
 0x8c0   :  { %v1614_v26 = vsel %vm227_vm2, %v1533_v24, -inf }
 0x8c1   :  { %1615 = vmax.xlane.f32.xlu0 %v1614_v26 }
 0x94e   :  { %v1616_v28 = vpop.xlane.xlu0 %1615 }
 0x94f   :  { %v1620_v29 = vsub.f32 %v1533_v24, %v1616_v28 }
 0x951   :  { %v1622_v30 = vmul.f32 1.442695, %v1620_v29 }
 0x953   :  { %9459 = vpow2.f32 %v1622_v30 }
 0x95d   :  { %v9460_v31 = vpop.eup %9459 }
 0x95e   :  { %v1626_v33 = vsel %vm227_vm2, %v9460_v31, 0.0 }
 0x95f   :  { %1627 = vadd.xlane.f32.xlu0 %v1626_v33  ;;  %v10058_v33 = vsub.s32 2, %v9888_v19 }
 0x991   :  { %v1610_v34 = vpop.f32.mrb[10].mxu0 }
 0x992   :  { %v1611_v35 = vadd.f32 %v1610_v34, %v9901_v32  ;;  %v8840_v36 = vpop.f32.mrb[11].mxu0 }
 0x994   :  { %v1617_v37 = vsel %vm227_vm2, %v1611_v35, -inf }
 0x995   :  { %1618 = vmax.xlane.f32.xlu1 %v1617_v37 }
 0x9a6   :  { %1636 = vrot.lane.b32.xlu1 %v9868_v14, %s9708_s23 }
 0x9ec   :  { %v1628_v38 = vpop.xlane.xlu0 %1627 }
 0x9ed   :  { %9461 = vrcp.f32 %v1628_v38 }
 0x9f7   :  { %v9462_v40 = vpop.eup %9461 }
 0x9f8   :  { %v1634_v44 = vmul.f32 %v9462_v40, %v9460_v31  ;;  %v10055_v31 = vsub.s32 1, %v9888_v19 }
 0x9fa   :  { %v1909_v34 = vrot.slane %v10042_v55, %v10055_v31 }
 0xa22   :  { %v1619_v39 = vpop.xlane.xlu1 %1618 }
 0xa23   :  { %v1621_v41 = vsub.f32 %v1611_v35, %v1619_v39  ;;  %v1915_v39 = vrot.slane %v10042_v55, %v10058_v33 }
 0xa25   :  { %v1624_v42 = vmul.f32 1.442695, %v1621_v41 }
 0xa26   :  { %v1637_v43 = vpop.permute.xlu1 %1636 }
 0xa27   :  { %9463 = vpow2.f32 %v1624_v42  ;;  %8842 = vmatpush3.msra.mxu1 %v1637_v43 }
 0xa28   :  { %8844 = vmatmul.mubr.msk.f32.vlgmr.msra.gmra.mrb[20].mxu1 %vm227_vm2, %v1634_v44  ;;  %v2011_v44 = vld [vmem:[#allocation8 + $0x10] sm:$0xff] }
 0xa31   :  { %v9464_v45 = vpop.eup %9463 }
 0xa32   :  { %v1629_v46 = vsel %vm227_vm2, %v9464_v45, 0.0 }
 0xa33   :  { %1630 = vadd.xlane.f32.xlu0 %v1629_v46 }
 0xa49   :  { %1712 = vrot.lane.b32.xlu0 %v9872_v15, %s9708_s23  ;;  %v10037_v15 = vsub.s32 0, %v9888_v19 }
 0xa4b   :  { %v1874_v56 = vrot.slane %v10042_v55, %v10037_v15 }
 0xac0   :  { %v1631_v14 = vpop.xlane.xlu0 %1630 }
 0xac1   :  { %9465 = vrcp.f32 %v1631_v14  ;;  %v10068_v14 = vsub.s32 3, %v9888_v19 }
 0xac4   :  { %v1713_v48 = vpop.permute.xlu0 %1712 }
 0xac5   :  { %8847 = vmatpush3.msra.mxu0 %v1713_v48 }
 0xac6   :  { %8851 = vmatprep.subr.mxu0 %v223_v47 }
 0xacb   :  { %v9466_v49 = vpop.eup %9465 }
 0xacc   :  { %v1635_v50 = vmul.f32 %v9466_v49, %v9464_v45  ;;  %v2012_v45 = vld [vmem:[#allocation8 + $0x18] sm:$0xff] }
 0xacd   :  { %v9308_v46 = vpack.c.bf16 %v2012_v45, %v2011_v44 }
 0xace   :  { %8849 = vmatmul.mubr.msk.f32.vlgmr.msra.gmra.mrb[12].mxu0 %vm227_vm2, %v1635_v50 }
 0xacf   :  { %8852 = vmatpush3.msra.mxu0 %v223_v47  ;;  %v1925_v47 = vrot.slane %v10042_v55, %v10068_v14 }
 0xad0   :  { %9305 = vmatprep.subr.bf16.mxu0 %v9304_v23 }
 0xafb   :  { %v1708_v51 = vpop.f32.mrb[20].mxu1 }
 0xafc   :  { %v8845_v52 = vpop.f32.mrb[21].mxu1  ;;  %8853 = vmatprep.mubr.msk.f32.mxu0 %vm227_vm2, %v1708_v51 }
 0xba1   :  { %v1784_v53 = vpop.f32.mrb[12].mxu0 }
 0xba2   :  { %v8850_v54 = vpop.f32.mrb[13].mxu0  ;;  %8854 = vmatmul.mubr.msk.f32.vlgmr.msra.gmra.mrb[6].mxu0 %vm227_vm2, %v1784_v53 }
 0xba3   :  { %9307 = vmatpush3.bf16.msra.mxu0 %v9304_v23  ;;  %v10077_v54 = vsub.s32 4, %v9888_v19 }
 0xba4   :  { %9309 = vmatprep.subr.bf16.mxu0 %v9308_v46 }
 0xba7   :  { %9311 = vmatpush3.bf16.msra.mxu0 %v9308_v46 }
 0xba8   :  { %8889 = vmatprep.subr.mxu0 %v9696_v10 }
 0xc75   :  { %v8855_v57 = vpop.f32.mrb[6].mxu0 }
 0xc76   :  { %v1876_v58 = vadd.f32 %v8855_v57, %v1874_v56  ;;  %v1860_v59 = vpop.f32.mrb[7].mxu0 }
 0xc77   :  { %v1875_v60 = vadd.f32 %v1874_v56, %v1860_v59  ;;  %v2016_v56 = vrot.slane %v10042_v55, %v10077_v54 }
 0xc78   :  { %v1878_v61 = vadd.f32 %v8486_v9, %v1876_v58  ;;  %v1919_v9 = vld [vmem:[#allocation7 + $0x8] sm:$0xff] }
 0xc79   :  { %v1877_v62 = vadd.f32 %v8485_v8, %v1875_v60  ;;  %v1918_v8 = vld [vmem:[#allocation7] sm:$0xff] }
 0xc7a   :  { %v1882_v63 = vsel %vm138_vm0, %v1878_v61, 0.0  ;;  %v9296_v16 = vpack.c.bf16 %v1919_v9, %v1918_v8  ;;  %v2141_v8 = vld [vmem:[#allocation3 + $0x20] sm:$0xff]  ;;  %v2142_v9 = vld [vmem:[#allocation3 + $0x28] sm:$0xff] }
 0xc7b   :  { %1883 = vadd.xlane.f32.xlu0 %v1882_v63  ;;  %v1879_v0 = vsel %vm138_vm0, %v1877_v62, 0.0 }
 0xc7c   :  { %1880 = vadd.xlane.f32.xlu1 %v1879_v0  ;;  %9297 = vmatprep.subr.bf16.mxu1 %v9296_v16 }
 0xc7d   :  { %9299 = vmatpush3.bf16.msra.mxu1 %v9296_v16  ;;  %v9312_v16 = vpack.c.bf16 %v2142_v9, %v2141_v8 }
 0xc7e   :  { %9301 = vmatprep.subr.bf16.mxu1 %v9300_v20 }
 0xc81   :  { %9303 = vmatpush3.bf16.msra.mxu1 %v9300_v20  ;;  %v9316_v20 = vpack.c.bf16 %v2144_v18, %v2143_v17 }
 0xc82   :  { %9313 = vmatprep.subr.bf16.mxu1 %v9312_v16 }
 0xd08   :  { %v1884_v1 = vpop.xlane.xlu0 %1883 }
 0xd09   :  { %v1887_v2 = vmul.f32 0.03125, %v1884_v1  ;;  %v1881_v3 = vpop.xlane.xlu1 %1880 }
 0xd0a   :  { %v1886_v4 = vmul.f32 0.03125, %v1881_v3 }
 0xd0b   :  { %v1889_v5 = vsub.f32 %v1878_v61, %v1887_v2 }
 0xd0c   :  { %v1888_v7 = vsub.f32 %v1877_v62, %v1886_v4 }
 0xd0d   :  { %v1891_v11 = vmul.f32 %v1889_v5, %v1889_v5 }
 0xd0e   :  { %v1890_v12 = vmul.f32 %v1888_v7, %v1888_v7 }
 0xd0f   :  { %v1895_v13 = vsel %vm138_vm0, %v1891_v11, 0.0 }
 0xd10   :  { %1896 = vadd.xlane.f32.xlu0 %v1895_v13  ;;  %v1892_v6 = vsel %vm138_vm0, %v1890_v12, 0.0 }
 0xd11   :  { %1893 = vadd.xlane.f32.xlu1 %v1892_v6 }
 0xd9d   :  { %v1897_v24 = vpop.xlane.xlu0 %1896 }
 0xd9e   :  { %v1899_v25 = vmul.f32 0.03125, %v1897_v24  ;;  %v1894_v26 = vpop.xlane.xlu1 %1893 }
 0xd9f   :  { %v1898_v28 = vmul.f32 0.03125, %v1894_v26 }
 0xda0   :  { %v1901_v29 = vadd.f32 1e-08, %v1899_v25 }
 0xda1   :  { %v1900_v30 = vadd.f32 1e-08, %v1898_v28  ;;  %v10087_v28 = vsub.s32 5, %v9888_v19 }
 0xda2   :  { %9467 = vrsqrt.f32 %v1901_v29  ;;  %v10090_v29 = vsub.s32 6, %v9888_v19  ;;  %v8358_v19 = vld [vmem:[%s10754_s4 + $0x1] ss:$0 sm:$0xff] }
 0xda3   :  { %9469 = vrsqrt.f32 %v1900_v30  ;;  %v2129_v30 = vrot.slane %v10042_v55, %v10087_v28 }
 0xdac   :  { %v9468_v35 = vpop.eup %9467 }
 0xdad   :  { %v9470_v36 = vpop.eup %9469  ;;  %v1905_v37 = vmul.f32 %v9468_v35, %v1889_v5 }
 0xdae   :  { %v1904_v38 = vmul.f32 %v9470_v36, %v1888_v7 }
 0xdaf   :  { %v1911_v40 = vmul.f32 %v1909_v34, %v1905_v37 }
 0xdb0   :  { %v1910_v41 = vmul.f32 %v1909_v34, %v1904_v38  ;;  %v2135_v38 = vrot.slane %v10042_v55, %v10090_v29 }
 0xdb1   :  { %v1917_v43 = vadd.f32 %v1915_v39, %v1911_v40 }
 0xdb2   :  { %v1916_v42 = vadd.f32 %v1915_v39, %v1910_v41 }
 0xdb4   :  { %8864 = vmatprep.mubr.msk.f32.mxu1 %vm138_vm0, %v1916_v42 }
 0xdb5   :  { %8865 = vmatmul.mubr.msk.f32.vlgmr.msra.gmra.mrb[22].mxu1 %vm138_vm0, %v1917_v43 }
 0xdb6   :  { %9315 = vmatpush3.bf16.msra.mxu1 %v9312_v16 }
 0xdb7   :  { %9317 = vmatprep.subr.bf16.mxu1 %v9316_v20 }
 0xdba   :  { %9319 = vmatpush3.bf16.msra.mxu1 %v9316_v20 }
 0xdbb   :  { %8894 = vmatprep.subr.mxu1 %v9696_v10 }
 0xe88   :  { %v8866_v48 = vpop.f32.mrb[22].mxu1 }
 0xe89   :  { %v2004_v49 = vadd.f32 %v8866_v48, %v1925_v47  ;;  %v1998_v50 = vpop.f32.mrb[23].mxu1 }
 0xe8a   :  { %v1999_v51 = vadd.f32 %v1998_v50, %v1925_v47 }
 0xe8b   :  { %v2008_v53 = vmax.f32 %v2004_v49, 0.0 }
 0xe8c   :  { %v2007_v52 = vmax.f32 %v1999_v51, 0.0 }
 0xe8e   :  { %8875 = vmatprep.mubr.msk.f32.mxu0 %vm138_vm0, %v2007_v52 }
 0xe8f   :  { %8876 = vmatmul.mubr.msk.f32.vlgmr.msra.gmra.mrb[14].mxu0 %vm138_vm0, %v2008_v53 }
 0xe90   :  { %8891 = vmatprep.mubr.msk.f32.mxu0 %vm9697_vm1, %v9696_v10 }
 0xf62   :  { %v8877_v57 = vpop.f32.mrb[14].mxu0 }
 0xf63   :  { %v2095_v58 = vadd.f32 %v8877_v57, %v2016_v56  ;;  %v2089_v59 = vpop.f32.mrb[15].mxu0 }
 0xf64   :  { %v2090_v60 = vadd.f32 %v2089_v59, %v2016_v56 }
 0xf65   :  { %v2099_v61 = vadd.f32 %v2095_v58, %v1917_v43 }
 0xf66   :  { %v2098_v62 = vadd.f32 %v2090_v60, %v1916_v42 }
 0xf67   :  { %v2103_v63 = vsel %vm138_vm0, %v2099_v61, 0.0 }
 0xf68   :  { %2104 = vadd.xlane.f32.xlu0 %v2103_v63  ;;  %v2100_v0 = vsel %vm138_vm0, %v2098_v62, 0.0 }
 0xf69   :  { %2101 = vadd.xlane.f32.xlu1 %v2100_v0 }
 0xff5   :  { %v2105_v1 = vpop.xlane.xlu0 %2104 }
 0xff6   :  { %v2107_v2 = vmul.f32 0.03125, %v2105_v1  ;;  %v2102_v3 = vpop.xlane.xlu1 %2101 }
 0xff7   :  { %v2106_v4 = vmul.f32 0.03125, %v2102_v3 }
 0xff8   :  { %v2109_v5 = vsub.f32 %v2099_v61, %v2107_v2 }
 0xff9   :  { %v2108_v7 = vsub.f32 %v2098_v62, %v2106_v4 }
 0xffa   :  { %v2111_v11 = vmul.f32 %v2109_v5, %v2109_v5 }
 0xffb   :  { %v2110_v12 = vmul.f32 %v2108_v7, %v2108_v7 }
 0xffc   :  { %v2115_v13 = vsel %vm138_vm0, %v2111_v11, 0.0 }
 0xffd   :  { %2116 = vadd.xlane.f32.xlu0 %v2115_v13  ;;  %v2112_v6 = vsel %vm138_vm0, %v2110_v12, 0.0 }
 0xffe   :  { %2113 = vadd.xlane.f32.xlu1 %v2112_v6 }
0x108a   :  { %v2117_v21 = vpop.xlane.xlu0 %2116 }
0x108b   :  { %v2119_v22 = vmul.f32 0.03125, %v2117_v21  ;;  %v2114_v23 = vpop.xlane.xlu1 %2113 }
0x108c   :  { %v2118_v24 = vmul.f32 0.03125, %v2114_v23 }
0x108d   :  { %v2121_v25 = vadd.f32 1e-08, %v2119_v22 }
0x108e   :  { %v2120_v26 = vadd.f32 1e-08, %v2118_v24 }
0x108f   :  { %9471 = vrsqrt.f32 %v2121_v25 }
0x1090   :  { %9473 = vrsqrt.f32 %v2120_v26 }
0x1099   :  { %v9472_v34 = vpop.eup %9471 }
0x109a   :  { %v9474_v35 = vpop.eup %9473  ;;  %v2125_v36 = vmul.f32 %v9472_v34, %v2109_v5 }
0x109b   :  { %v2124_v37 = vmul.f32 %v9474_v35, %v2108_v7 }
0x109c   :  { %v2131_v39 = vmul.f32 %v2129_v30, %v2125_v36 }
0x109d   :  { %v2130_v40 = vmul.f32 %v2129_v30, %v2124_v37 }
0x109e   :  { %v10098_v42 = vadd.f32 %v2135_v38, %v2131_v39 }
0x109f   :  { %v10096_v41 = vadd.f32 %v2135_v38, %v2130_v40 }
0x10a1   :  { %8886 = vmatprep.mubr.msk.f32.mxu1 %vm138_vm0, %v10096_v41 }
0x10a2   :  { %8887 = vmatmul.mubr.msk.f32.vlgmr.msra.gmra.mrb[24].mxu1 %vm138_vm0, %v10098_v42 }
0x10a3   :  { %8896 = vmatprep.mubr.msk.f32.mxu1 %vm9697_vm1, %v9696_v10 }
0x1175   :  { %v8888_v55 = vpop.f32.mrb[24].mxu1 }
0x1176   :  { %v10109_v43 = vadd.f32 %v8888_v55, %v8358_v19  ;;  %v2225_v44 = vpop.f32.mrb[25].mxu1 }
0x1177   :  { %v10111_v45 = vadd.f32 %v8358_v19, %v2225_v44 }
0x1178   :  { %2317 = vrot.lane.b32.xlu1 %v10109_v43, %s9698_s30 }
0x1179   :  { %2240 = vrot.lane.b32.xlu0 %v10111_v45, %s9698_s30 }
0x11ea   :  { %v2318_v46 = vpop.permute.xlu1 %2317 }
0x11eb   :  { %8895 = vmatpush3.xpose.msk.msra.mxu1 %vm227_vm2, %v2318_v46  ;;  %v2241_v47 = vpop.permute.xlu0 %2240 }
0x11ec   :  { %8890 = vmatpush3.xpose.msk.msra.mxu0 %vm227_vm2, %v2241_v47  ;;  %8904 = vmatprep.subr.mxu1 %v9696_v10 }
0x11ed   :  { %8899 = vmatprep.subr.mxu0 %v9696_v10 }
0x11ee   :  { %8897 = vmatmul.mubr.msk.f32.vlgmr.msra.gmra.mrb[26].mxu1 %vm227_vm2, %v10109_v43 }
0x11ef   :  { %8892 = vmatmul.mubr.msk.f32.vlgmr.msra.gmra.mrb[16].mxu0 %vm227_vm2, %v10111_v45  ;;  %8906 = vmatprep.mubr.msk.f32.mxu1 %vm9697_vm1, %v9696_v10 }
0x11f0   :  { %8901 = vmatprep.mubr.msk.f32.mxu0 %vm9697_vm1, %v9696_v10 }
0x12c1   :  { %v2389_v48 = vpop.f32.mrb[26].mxu1 }
0x12c2   :  { %v2390_v49 = vadd.f32 %v2389_v48, %v9901_v32  ;;  %v2312_v50 = vpop.f32.mrb[16].mxu0  ;;  %v8898_v51 = vpop.f32.mrb[27].mxu1 }
0x12c3   :  { %v8893_v52 = vpop.f32.mrb[17].mxu0  ;;  %v2313_v56 = vadd.f32 %v2312_v50, %v9898_v27 }
0x12c4   :  { %v2396_v53 = vsel %vm227_vm2, %v2390_v49, -inf }
0x12c5   :  { %2397 = vmax.xlane.f32.xlu1 %v2396_v53  ;;  %v2393_v57 = vsel %vm227_vm2, %v2313_v56, -inf }
0x12d6   :  { %2491 = vrot.lane.b32.xlu1 %v10109_v43, %s9699_s2 }
0x12da   :  { %2645 = vrot.lane.b32.xlu1 %v10109_v43, %s9701_s16 }
0x12fe   :  { %2394 = vmax.xlane.f32.xlu1 %v2393_v57 }
0x130f   :  { %2569 = vrot.lane.b32.xlu1 %v10111_v45, %s9700_s15 }
0x1313   :  { %2567 = vrot.lane.b32.xlu1 %v10111_v45, %s9701_s16 }
0x1317   :  { %3061 = vrot.lane.b32.xlu1 %v10111_v45, %s9704_s22 }
0x1352   :  { %v2398_v58 = vpop.xlane.xlu1 %2397 }
0x1353   :  { %v2400_v59 = vsub.f32 %v2390_v49, %v2398_v58 }
0x1355   :  { %v2403_v60 = vmul.f32 1.442695, %v2400_v59 }
0x1356   :  { %v2492_v61 = vpop.permute.xlu1 %2491 }
0x1357   :  { %9475 = vpow2.f32 %v2403_v60  ;;  %8905 = vmatpush3.msra.mxu1 %v2492_v61 }
0x1358   :  { %8914 = vmatprep.subr.mxu1 %v9696_v10 }
0x135a   :  { %v2646_v0 = vpop.permute.xlu1 %2645 }
0x1361   :  { %v9476_v62 = vpop.eup %9475 }
0x1362   :  { %v2408_v63 = vsel %vm227_vm2, %v9476_v62, 0.0 }
0x1363   :  { %2409 = vadd.xlane.f32.xlu0 %v2408_v63 }
0x1379   :  { %2647 = vrot.lane.b32.xlu0 %v10109_v43, %s9700_s15 }
0x138b   :  { %v2395_v1 = vpop.xlane.xlu1 %2394 }
0x138c   :  { %v2399_v2 = vsub.f32 %v2313_v56, %v2395_v1 }
0x138e   :  { %v2401_v3 = vmul.f32 1.442695, %v2399_v2 }
0x138f   :  { %v2570_v16 = vpop.permute.xlu1 %2569 }
0x1390   :  { %9477 = vpow2.f32 %v2401_v3 }
0x1393   :  { %v2568_v18 = vpop.permute.xlu1 %2567 }
0x1397   :  { %v3062_v46 = vpop.permute.xlu1 %3061 }
0x139a   :  { %v9478_v4 = vpop.eup %9477 }
0x139b   :  { %v2405_v5 = vsel %vm227_vm2, %v9478_v4, 0.0 }
0x139c   :  { %2406 = vadd.xlane.f32.xlu0 %v2405_v5 }
0x13b2   :  { %2415 = vrot.lane.b32.xlu0 %v10111_v45, %s9699_s2 }
0x13f0   :  { %v2410_v7 = vpop.xlane.xlu0 %2409 }
0x13f1   :  { %9479 = vrcp.f32 %v2410_v7 }
0x13f4   :  { %v2648_v13 = vpop.permute.xlu0 %2647 }
0x13fb   :  { %v9480_v11 = vpop.eup %9479 }
0x13fc   :  { %v2414_v12 = vmul.f32 %v9480_v11, %v9476_v62 }
0x13fe   :  { %8907 = vmatmul.mubr.msk.f32.vlgmr.msra.gmra.mrb[28].mxu1 %vm227_vm2, %v2414_v12 }
0x13ff   :  { %8915 = vmatpush3.xpose.msk.msra.mxu1 %vm227_vm2, %v2648_v13  ;;  %8916 = vmatprep.mubr.msk.f32.mxu1 %vm9697_vm1, %v9696_v10 }
0x1400   :  { %8924 = vmatprep.subr.mxu1 %v9696_v10 }
0x1402   :  { %8917 = vmatmul.mubr.msk.f32.vlgmr.msra.gmra.mrb[30].mxu1 %vm227_vm2, %v2646_v0 }
0x1403   :  { %8926 = vmatprep.mubr.msk.f32.mxu1 %vm9697_vm1, %v9696_v10 }
0x1429   :  { %v2407_v6 = vpop.xlane.xlu0 %2406 }
0x142a   :  { %9481 = vrcp.f32 %v2407_v6 }
0x142d   :  { %v2416_v8 = vpop.permute.xlu0 %2415 }
0x142e   :  { %8900 = vmatpush3.msra.mxu0 %v2416_v8  ;;  %v2236_v8 = vld [vmem:[#allocation5 + $0x28] sm:$0xff] }
0x142f   :  { %8909 = vmatprep.subr.mxu0 %v9696_v10 }
0x1434   :  { %v9482_v9 = vpop.eup %9481 }
0x1435   :  { %v2413_v17 = vmul.f32 %v9482_v9, %v9478_v4  ;;  %v2235_v9 = vld [vmem:[#allocation5 + $0x20] sm:$0xff] }
0x1437   :  { %8902 = vmatmul.mubr.msk.f32.vlgmr.msra.gmra.mrb[18].mxu0 %vm227_vm2, %v2413_v17 }
0x1438   :  { %8910 = vmatpush3.xpose.msk.msra.mxu0 %vm227_vm2, %v2570_v16  ;;  %8911 = vmatprep.mubr.msk.f32.mxu0 %vm9697_vm1, %v9696_v10 }
0x1439   :  { %8919 = vmatprep.subr.mxu0 %v9696_v10 }
0x143b   :  { %8912 = vmatmul.mubr.msk.f32.vlgmr.msra.gmra.mrb[20].mxu0 %vm227_vm2, %v2568_v18 }
0x143c   :  { %8921 = vmatprep.mubr.msk.f32.mxu0 %vm9697_vm1, %v9696_v10 }
0x14d1   :  { %v10167_v20 = vpop.f32.mrb[28].mxu1 }
0x14d2   :  { %v8908_v21 = vpop.f32.mrb[29].mxu1 }
0x14d5   :  { %v2719_v22 = vpop.f32.mrb[30].mxu1 }
0x14d6   :  { %v2720_v23 = vadd.f32 %v2719_v22, %v9901_v32  ;;  %v8918_v24 = vpop.f32.mrb[31].mxu1 }
0x14d8   :  { %v2726_v25 = vsel %vm227_vm2, %v2720_v23, -inf }
0x14d9   :  { %2727 = vmax.xlane.f32.xlu0 %v2726_v25 }
0x14ef   :  { %2821 = vrot.lane.b32.xlu0 %v10109_v43, %s9702_s17 }
0x14f3   :  { %3059 = vrot.lane.b32.xlu0 %v10111_v45, %s9703_s3 }
0x14f7   :  { %3137 = vrot.lane.b32.xlu0 %v10109_v43, %s9703_s3 }
0x150a   :  { %v10177_v26 = vpop.f32.mrb[18].mxu0 }
0x150b   :  { %v8903_v30 = vpop.f32.mrb[19].mxu0 }
0x150e   :  { %v2641_v34 = vpop.f32.mrb[20].mxu0 }
0x150f   :  { %v8913_v35 = vpop.f32.mrb[21].mxu0  ;;  %v2642_v55 = vadd.f32 %v2641_v34, %v9898_v27 }
0x1511   :  { %v2723_v44 = vsel %vm227_vm2, %v2642_v55, -inf }
0x1566   :  { %v2728_v36 = vpop.xlane.xlu0 %2727 }
0x1567   :  { %v2730_v37 = vsub.f32 %v2720_v23, %v2728_v36 }
0x1569   :  { %v2733_v38 = vmul.f32 1.442695, %v2730_v37 }
0x156a   :  { %v2822_v39 = vpop.permute.xlu0 %2821 }
0x156b   :  { %9483 = vpow2.f32 %v2733_v38  ;;  %8925 = vmatpush3.msra.mxu1 %v2822_v39  ;;  %v2237_v39 = vld [vmem:[#allocation5 + $0x30] sm:$0xff] }
0x156c   :  { %8939 = vmatprep.subr.mxu1 %v9696_v10 }
0x156e   :  { %v3060_v50 = vpop.permute.xlu0 %3059 }
0x1572   :  { %v3138_v52 = vpop.permute.xlu0 %3137 }
0x1575   :  { %v9484_v40 = vpop.eup %9483 }
0x1576   :  { %v2738_v19 = vsel %vm227_vm2, %v9484_v40, 0.0 }
0x1577   :  { %2739 = vadd.xlane.f32.xlu1 %v2738_v19 }
0x1588   :  { %3139 = vrot.lane.b32.xlu1 %v10109_v43, %s9704_s22 }
0x15ac   :  { %2724 = vmax.xlane.f32.xlu1 %v2723_v44 }
0x1604   :  { %v2740_v47 = vpop.xlane.xlu1 %2739 }
0x1605   :  { %9485 = vrcp.f32 %v2740_v47 }
0x1608   :  { %v3140_v51 = vpop.permute.xlu1 %3139 }
0x160f   :  { %v9486_v48 = vpop.eup %9485 }
0x1610   :  { %v2744_v49 = vmul.f32 %v9486_v48, %v9484_v40 }
0x1612   :  { %8927 = vmatmul.mubr.msk.f32.vlgmr.msra.gmra.mrb[32].mxu1 %vm227_vm2, %v2744_v49 }
0x1613   :  { %8940 = vmatpush3.xpose.msk.msra.mxu1 %vm227_vm2, %v3062_v46  ;;  %8941 = vmatprep.mubr.msk.f32.mxu1 %vm9697_vm1, %v9696_v10 }
0x1614   :  { %8944 = vmatprep.subr.mxu1 %v9696_v10 }
0x1616   :  { %8942 = vmatmul.mubr.msk.f32.vlgmr.msra.gmra.mrb[34].mxu1 %vm227_vm2, %v3060_v50 }
0x1617   :  { %8945 = vmatpush3.xpose.msk.msra.mxu1 %vm227_vm2, %v3140_v51  ;;  %8946 = vmatprep.mubr.msk.f32.mxu1 %vm9697_vm1, %v9696_v10 }
0x1618   :  { %8954 = vmatprep.subr.mxu1 %v9696_v10 }
0x161a   :  { %8947 = vmatmul.mubr.msk.f32.vlgmr.msra.gmra.mrb[36].mxu1 %vm227_vm2, %v3138_v52 }
0x161b   :  { %8956 = vmatprep.mubr.msk.f32.mxu1 %vm9697_vm1, %v9696_v10 }
0x1639   :  { %v2725_v53 = vpop.xlane.xlu1 %2724 }
0x163a   :  { %v2729_v56 = vsub.f32 %v2642_v55, %v2725_v53 }
0x163c   :  { %v2731_v57 = vmul.f32 1.442695, %v2729_v56 }
0x163e   :  { %9487 = vpow2.f32 %v2731_v57 }
0x1648   :  { %v9488_v58 = vpop.eup %9487 }
0x1649   :  { %v2735_v59 = vsel %vm227_vm2, %v9488_v58, 0.0 }
0x164a   :  { %2736 = vadd.xlane.f32.xlu0 %v2735_v59 }
0x1660   :  { %2745 = vrot.lane.b32.xlu0 %v10111_v45, %s9702_s17 }
0x1664   :  { %3313 = vrot.lane.b32.xlu0 %v10109_v43, %s9705_s18 }
0x1668   :  { %3474 = vrot.lane.b32.xlu0 %v10111_v45, %s9706_s19 }
0x166c   :  { %3552 = vrot.lane.b32.xlu0 %v10109_v43, %s9706_s19 }
0x1670   :  { %3472 = vrot.lane.b32.xlu0 %v10111_v45, %s9707_s21 }
0x16d7   :  { %v2737_v60 = vpop.xlane.xlu0 %2736 }
0x16d8   :  { %9489 = vrcp.f32 %v2737_v60 }
0x16db   :  { %v2746_v61 = vpop.permute.xlu0 %2745 }
0x16dc   :  { %8920 = vmatpush3.msra.mxu0 %v2746_v61 }
0x16dd   :  { %8929 = vmatprep.subr.mxu0 %v2236_v8 }
0x16df   :  { %v3314_v62 = vpop.permute.xlu0 %3313 }
0x16e0   :  { %8955 = vmatpush3.msra.mxu1 %v3314_v62 }
0x16e1   :  { %8964 = vmatprep.subr.mxu1 %v9696_v10 }
0x16e2   :  { %v9490_v63 = vpop.eup %9489 }
0x16e3   :  { %v2743_v0 = vmul.f32 %v9490_v63, %v9488_v58  ;;  %v3475_v19 = vpop.permute.xlu0 %3474 }
0x16e5   :  { %8922 = vmatmul.mubr.msk.f32.vlgmr.msra.gmra.mrb[22].mxu0 %vm227_vm2, %v2743_v0  ;;  %v2893_v1 = vpop.f32.mrb[32].mxu1 }
0x16e6   :  { %v8928_v2 = vpop.f32.mrb[33].mxu1  ;;  %8930 = vmatpush3.msra.mxu0 %v2236_v8 }
0x16e7   :  { %8934 = vmatprep.subr.mxu0 %v2235_v9  ;;  %v3553_v46 = vpop.permute.xlu0 %3552 }
0x16e9   :  { %v3133_v3 = vpop.f32.mrb[34].mxu1 }
0x16ea   :  { %v3134_v4 = vadd.f32 %v3133_v3, %v9898_v27  ;;  %v8943_v5 = vpop.f32.mrb[35].mxu1 }
0x16eb   :  { %v3473_v47 = vpop.permute.xlu0 %3472 }
0x16ec   :  { %v3215_v7 = vsel %vm227_vm2, %v3134_v4, -inf }
0x16ed   :  { %3216 = vmax.xlane.f32.xlu1 %v3215_v7  ;;  %v3211_v11 = vpop.f32.mrb[36].mxu1 }
0x16ee   :  { %v3212_v12 = vadd.f32 %v3211_v11, %v9901_v32  ;;  %v8948_v13 = vpop.f32.mrb[37].mxu1 }
0x16f0   :  { %v3218_v6 = vsel %vm227_vm2, %v3212_v12, -inf }
0x16f1   :  { %3219 = vmax.xlane.f32.xlu1 %v3218_v6 }
0x177a   :  { %v3217_v16 = vpop.xlane.xlu1 %3216 }
0x177b   :  { %v3221_v17 = vsub.f32 %v3134_v4, %v3217_v16  ;;  %v2238_v16 = vld [vmem:[#allocation5 + $0x38] sm:$0xff] }
0x177d   :  { %v3223_v18 = vmul.f32 1.442695, %v3221_v17 }
0x177e   :  { %v3220_v21 = vpop.xlane.xlu1 %3219 }
0x177f   :  { %9491 = vpow2.f32 %v3223_v18  ;;  %v3222_v22 = vsub.f32 %v3212_v12, %v3220_v21 }
0x1781   :  { %v3225_v23 = vmul.f32 1.442695, %v3222_v22 }
0x1783   :  { %9493 = vpow2.f32 %v3225_v23 }
0x1789   :  { %v9492_v24 = vpop.eup %9491 }
0x178a   :  { %v3227_v25 = vsel %vm227_vm2, %v9492_v24, 0.0 }
0x178b   :  { %3228 = vadd.xlane.f32.xlu1 %v3227_v25 }
0x178d   :  { %v9494_v30 = vpop.eup %9493 }
0x178e   :  { %v3230_v34 = vsel %vm227_vm2, %v9494_v30, 0.0 }
0x178f   :  { %3231 = vadd.xlane.f32.xlu1 %v3230_v34 }
0x17a0   :  { %3237 = vrot.lane.b32.xlu1 %v10111_v45, %s9705_s18 }
0x17a4   :  { %3550 = vrot.lane.b32.xlu1 %v10109_v43, %s9707_s21 }
0x17b8   :  { %v2817_v35 = vpop.f32.mrb[22].mxu0 }
0x17b9   :  { %v8923_v36 = vpop.f32.mrb[23].mxu0  ;;  %8931 = vmatprep.mubr.msk.f32.mxu0 %vm227_vm2, %v2817_v35 }
0x17ba   :  { %8932 = vmatmul.mubr.msk.f32.vlgmr.msra.gmra.mrb[24].mxu0 %vm227_vm2, %v2893_v1 }
0x17bb   :  { %8936 = vmatprep.mubr.msk.f32.mxu0 %vm227_vm2, %v10177_v26  ;;  %8935 = vmatpush3.msra.mxu0 %v2235_v9 }
0x17bc   :  { %8949 = vmatprep.subr.mxu0 %v9696_v10 }
0x17c2   :  { %8937 = vmatmul.mubr.msk.f32.vlgmr.msra.gmra.mrb[24].mxu0 %vm227_vm2, %v10167_v20 }
0x17c3   :  { %8951 = vmatprep.mubr.msk.f32.mxu0 %vm9697_vm1, %v9696_v10 }
0x1818   :  { %v3229_v37 = vpop.xlane.xlu1 %3228 }
0x1819   :  { %9495 = vrcp.f32 %v3229_v37 }
0x181c   :  { %v3232_v38 = vpop.xlane.xlu1 %3231 }
0x181d   :  { %9497 = vrcp.f32 %v3232_v38 }
0x1820   :  { %v3238_v40 = vpop.permute.xlu1 %3237 }
0x1821   :  { %8950 = vmatpush3.msra.mxu0 %v3238_v40 }
0x1822   :  { %8959 = vmatprep.subr.mxu0 %v2237_v39 }
0x1823   :  { %v9496_v55 = vpop.eup %9495 }
0x1824   :  { %v3235_v26 = vmul.f32 %v9496_v55, %v9492_v24  ;;  %v3551_v52 = vpop.permute.xlu1 %3550 }
0x1826   :  { %8952 = vmatmul.mubr.msk.f32.vlgmr.msra.gmra.mrb[26].mxu0 %vm227_vm2, %v3235_v26 }
0x1827   :  { %v9498_v44 = vpop.eup %9497  ;;  %8960 = vmatpush3.msra.mxu0 %v2237_v39 }
0x1828   :  { %v3236_v20 = vmul.f32 %v9498_v44, %v9494_v30  ;;  %8969 = vmatprep.subr.mxu0 %v9696_v10 }
0x182a   :  { %8957 = vmatmul.mubr.msk.f32.vlgmr.msra.gmra.mrb[38].mxu1 %vm227_vm2, %v3236_v20 }
0x182b   :  { %8965 = vmatpush3.xpose.msk.msra.mxu1 %vm227_vm2, %v3475_v19  ;;  %8966 = vmatprep.mubr.msk.f32.mxu1 %vm9697_vm1, %v9696_v10 }
0x182c   :  { %8974 = vmatprep.subr.mxu1 %v9696_v10 }
0x182e   :  { %8967 = vmatmul.mubr.msk.f32.vlgmr.msra.gmra.mrb[40].mxu1 %vm227_vm2, %v3473_v47 }
0x182f   :  { %8976 = vmatprep.mubr.msk.f32.mxu1 %vm9697_vm1, %v9696_v10 }
0x18f9   :  { %v3309_v48 = vpop.f32.mrb[26].mxu0 }
0x18fa   :  { %v8953_v49 = vpop.f32.mrb[27].mxu0  ;;  %8961 = vmatprep.mubr.msk.f32.mxu0 %vm227_vm2, %v3309_v48 }
0x18fd   :  { %v3385_v50 = vpop.f32.mrb[38].mxu1 }
0x18fe   :  { %v8958_v51 = vpop.f32.mrb[39].mxu1  ;;  %8962 = vmatmul.mubr.msk.f32.vlgmr.msra.gmra.mrb[24].mxu0 %vm227_vm2, %v3385_v50 }
0x18ff   :  { %8970 = vmatpush3.xpose.msk.msra.mxu0 %vm227_vm2, %v3553_v46  ;;  %8971 = vmatprep.mubr.msk.f32.mxu0 %vm9697_vm1, %v9696_v10  ;;  %v3933_v51 = vld [vmem:[#allocation7 + $0x28] sm:$0xff] }
0x1900   :  { %8979 = vmatprep.subr.mxu0 %v9696_v10 }
0x1901   :  { %v3546_v53 = vpop.f32.mrb[40].mxu1 }
0x1902   :  { %v3547_v56 = vadd.f32 %v3546_v53, %v9898_v27  ;;  %v8968_v57 = vpop.f32.mrb[41].mxu1  ;;  %8972 = vmatmul.mubr.msk.f32.vlgmr.msra.gmra.mrb[28].mxu0 %vm227_vm2, %v3551_v52  ;;  %v3934_v53 = vld [vmem:[#allocation7 + $0x30] sm:$0xff] }
0x1903   :  { %8981 = vmatprep.mubr.msk.f32.mxu0 %vm9697_vm1, %v9696_v10 }
0x1904   :  { %v3628_v58 = vsel %vm227_vm2, %v3547_v56, -inf }
0x1905   :  { %3629 = vmax.xlane.f32.xlu0 %v3628_v58  ;;  %v4160_v58 = vld [vmem:[#allocation3 + $0x40] sm:$0xff] }
0x1992   :  { %v3630_v59 = vpop.xlane.xlu0 %3629 }
0x1993   :  { %v3634_v60 = vsub.f32 %v3547_v56, %v3630_v59  ;;  %v3935_v56 = vld [vmem:[#allocation7 + $0x38] sm:$0xff]  ;;  %v4161_v59 = vld [vmem:[#allocation3 + $0x48] sm:$0xff] }
0x1994   :  { %v9324_v57 = vpack.c.bf16 %v3935_v56, %v3934_v53 }
0x1995   :  { %v3636_v61 = vmul.f32 1.442695, %v3634_v60  ;;  %v9336_v60 = vpack.c.bf16 %v4161_v59, %v4160_v58 }
0x1997   :  { %9499 = vpow2.f32 %v3636_v61  ;;  %v4024_v61 = vld [vmem:[#allocation8 + $0x20] sm:$0xff] }
0x19a1   :  { %v9500_v62 = vpop.eup %9499 }
0x19a2   :  { %v3640_v63 = vsel %vm227_vm2, %v9500_v62, 0.0 }
0x19a3   :  { %3641 = vadd.xlane.f32.xlu0 %v3640_v63 }
0x19d5   :  { %v3624_v0 = vpop.f32.mrb[28].mxu0 }
0x19d6   :  { %v3625_v1 = vadd.f32 %v3624_v0, %v9901_v32  ;;  %v8973_v2 = vpop.f32.mrb[29].mxu0 }
0x19d8   :  { %v3631_v3 = vsel %vm227_vm2, %v3625_v1, -inf }
0x19d9   :  { %3632 = vmax.xlane.f32.xlu1 %v3631_v3 }
0x19ea   :  { %3650 = vrot.lane.b32.xlu1 %v10111_v45, %s9708_s23 }
0x1a30   :  { %v3642_v4 = vpop.xlane.xlu0 %3641 }
0x1a31   :  { %9501 = vrcp.f32 %v3642_v4 }
0x1a3b   :  { %v9502_v7 = vpop.eup %9501 }
0x1a3c   :  { %v3648_v6 = vmul.f32 %v9502_v7, %v9500_v62  ;;  %v4025_v62 = vld [vmem:[#allocation8 + $0x28] sm:$0xff] }
0x1a3d   :  { %v9328_v63 = vpack.c.bf16 %v4025_v62, %v4024_v61 }
0x1a66   :  { %v3633_v5 = vpop.xlane.xlu1 %3632 }
0x1a67   :  { %v3635_v11 = vsub.f32 %v3625_v1, %v3633_v5 }
0x1a69   :  { %v3638_v12 = vmul.f32 1.442695, %v3635_v11 }
0x1a6a   :  { %v3651_v13 = vpop.permute.xlu1 %3650 }
0x1a6b   :  { %9503 = vpow2.f32 %v3638_v12  ;;  %8975 = vmatpush3.msra.mxu1 %v3651_v13 }
0x1a6c   :  { %8977 = vmatmul.mubr.msk.f32.vlgmr.msra.gmra.mrb[42].mxu1 %vm227_vm2, %v3648_v6 }
0x1a75   :  { %v9504_v8 = vpop.eup %9503 }
0x1a76   :  { %v3643_v9 = vsel %vm227_vm2, %v9504_v8, 0.0 }
0x1a77   :  { %3644 = vadd.xlane.f32.xlu0 %v3643_v9 }
0x1a8d   :  { %3726 = vrot.lane.b32.xlu0 %v10109_v43, %s9708_s23  ;;  %v10266_v43 = vld [vmem:[%s10758_s8 + $0x8] sm:$0x7f] }
0x1a8e   :  { %v3888_v30 = vrot.slane %v10266_v43, %v10037_v15  ;;  %v3922_v7 = vrot.slane %v10266_v43, %v10055_v31 }
0x1b04   :  { %v3645_v45 = vpop.xlane.xlu0 %3644 }
0x1b05   :  { %9505 = vrcp.f32 %v3645_v45  ;;  %v10283_v45 = vld [vmem:[%s10751_s1] sm:$0xff]  }
0x1b08   :  { %v3727_v17 = vpop.permute.xlu0 %3726 }
0x1b09   :  { %8980 = vmatpush3.msra.mxu0 %v3727_v17  ;;  %v4162_v17 = vld [vmem:[#allocation3 + $0x50] sm:$0xff] }
0x1b0a   :  { %8984 = vmatprep.subr.mxu0 %v2238_v16 }
0x1b0f   :  { %v9506_v18 = vpop.eup %9505 }
0x1b10   :  { %v3649_v21 = vmul.f32 %v9506_v18, %v9504_v8  ;;  %v3928_v8 = vrot.slane %v10266_v43, %v10058_v33  ;;  %v4163_v18 = vld [vmem:[#allocation3 + $0x58] sm:$0xff] }
0x1b12   :  { %8982 = vmatmul.mubr.msk.f32.vlgmr.msra.gmra.mrb[30].mxu0 %vm227_vm2, %v3649_v21 }
0x1b13   :  { %8985 = vmatpush3.msra.mxu0 %v2238_v16 }
0x1b14   :  { %9329 = vmatprep.subr.bf16.mxu0 %v9328_v63 }
0x1b3f   :  { %v3722_v22 = vpop.f32.mrb[42].mxu1 }
0x1b40   :  { %v8978_v23 = vpop.f32.mrb[43].mxu1  ;;  %8986 = vmatprep.mubr.msk.f32.mxu0 %vm227_vm2, %v3722_v22  ;;  %v8489_v22 = vunpack.c.l.bf16 %v10283_v45 }
0x1be5   :  { %v3798_v24 = vpop.f32.mrb[30].mxu0 }
0x1be6   :  { %v8983_v25 = vpop.f32.mrb[31].mxu0  ;;  %8987 = vmatmul.mubr.msk.f32.vlgmr.msra.gmra.mrb[24].mxu0 %vm227_vm2, %v3798_v24  ;;  %v9340_v24 = vpack.c.bf16 %v4163_v18, %v4162_v17 }
0x1be7   :  { %9331 = vmatpush3.bf16.msra.mxu0 %v9328_v63  ;;  %v8490_v25 = vunpack.c.h.bf16 %v10283_v45 }
0x1cb9   :  { %v8988_v34 = vpop.f32.mrb[24].mxu0 }
0x1cba   :  { %v3890_v35 = vadd.f32 %v8988_v34, %v3888_v30  ;;  %v3874_v36 = vpop.f32.mrb[25].mxu0  ;;  %v4027_v34 = vld [vmem:[#allocation8 + $0x38] sm:$0xff] }
0x1cbb   :  { %v3889_v37 = vadd.f32 %v3888_v30, %v3874_v36  ;;  %v4026_v30 = vld [vmem:[#allocation8 + $0x30] sm:$0xff]  ;;  %v3939_v36 = vrot.slane %v10266_v43, %v10068_v14 }
0x1cbc   :  { %v3892_v38 = vadd.f32 %v3890_v35, %v10098_v42  ;;  %v9332_v35 = vpack.c.bf16 %v4027_v34, %v4026_v30 }
0x1cbd   :  { %v3891_v39 = vadd.f32 %v3889_v37, %v10096_v41  ;;  %v3932_v41 = vld [vmem:[#allocation7 + $0x20] sm:$0xff] }
0x1cbe   :  { %v3896_v40 = vsel %vm138_vm0, %v3892_v38, 0.0  ;;  %v9320_v52 = vpack.c.bf16 %v3933_v51, %v3932_v41  ;;  %9333 = vmatprep.subr.bf16.mxu0 %v9332_v35 }
0x1cbf   :  { %3897 = vadd.xlane.f32.xlu0 %v3896_v40  ;;  %v3893_v19 = vsel %vm138_vm0, %v3891_v39, 0.0  ;;  %9335 = vmatpush3.bf16.msra.mxu0 %v9332_v35 }
0x1cc0   :  { %3894 = vadd.xlane.f32.xlu1 %v3893_v19  ;;  %9321 = vmatprep.subr.bf16.mxu1 %v9320_v52 }
0x1cc1   :  { %9323 = vmatpush3.bf16.msra.mxu1 %v9320_v52  ;;  %9022 = vmatprep.subr.mxu0 %v9696_v10 }
0x1cc2   :  { %9325 = vmatprep.subr.bf16.mxu1 %v9324_v57 }
0x1cc5   :  { %9327 = vmatpush3.bf16.msra.mxu1 %v9324_v57 }
0x1cc6   :  { %9337 = vmatprep.subr.bf16.mxu1 %v9336_v60 }
0x1d4c   :  { %v3898_v55 = vpop.xlane.xlu0 %3897 }
0x1d4d   :  { %v3900_v26 = vmul.f32 0.03125, %v3898_v55  ;;  %v3895_v44 = vpop.xlane.xlu1 %3894 }
0x1d4e   :  { %v3899_v46 = vmul.f32 0.03125, %v3895_v44 }
0x1d4f   :  { %v3902_v20 = vsub.f32 %v3892_v38, %v3900_v26  ;;  %v8399_v26 = vld [vmem:[%s10754_s4 + $0x2] ss:$0 sm:$0xff] }
0x1d50   :  { %v3901_v47 = vsub.f32 %v3891_v39, %v3899_v46 }
0x1d51   :  { %v3904_v48 = vmul.f32 %v3902_v20, %v3902_v20 }
0x1d52   :  { %v3903_v49 = vmul.f32 %v3901_v47, %v3901_v47 }
0x1d53   :  { %v3908_v50 = vsel %vm138_vm0, %v3904_v48, 0.0 }
0x1d54   :  { %3909 = vadd.xlane.f32.xlu0 %v3908_v50  ;;  %v3905_v42 = vsel %vm138_vm0, %v3903_v49, 0.0 }
0x1d55   :  { %3906 = vadd.xlane.f32.xlu1 %v3905_v42 }
0x1de1   :  { %v3910_v0 = vpop.xlane.xlu0 %3909 }
0x1de2   :  { %v3912_v1 = vmul.f32 0.03125, %v3910_v0  ;;  %v3907_v2 = vpop.xlane.xlu1 %3906 }
0x1de3   :  { %v3911_v3 = vmul.f32 0.03125, %v3907_v2 }
0x1de4   :  { %v3914_v4 = vadd.f32 1e-08, %v3912_v1 }
0x1de5   :  { %v3913_v5 = vadd.f32 1e-08, %v3911_v3 }
0x1de6   :  { %9507 = vrsqrt.f32 %v3914_v4 }
0x1de7   :  { %9509 = vrsqrt.f32 %v3913_v5 }
0x1df0   :  { %v9508_v11 = vpop.eup %9507 }
0x1df1   :  { %v9510_v12 = vpop.eup %9509  ;;  %v3918_v13 = vmul.f32 %v9508_v11, %v3902_v20 }
0x1df2   :  { %v3917_v6 = vmul.f32 %v9510_v12, %v3901_v47 }
0x1df3   :  { %v3924_v9 = vmul.f32 %v3922_v7, %v3918_v13 }
0x1df4   :  { %v3923_v16 = vmul.f32 %v3922_v7, %v3917_v6 }
0x1df5   :  { %v10288_v23 = vadd.f32 %v3928_v8, %v3924_v9 }
0x1df6   :  { %v10285_v21 = vadd.f32 %v3928_v8, %v3923_v16 }
0x1df8   :  { %8997 = vmatprep.mubr.msk.f32.mxu1 %vm138_vm0, %v10285_v21 }
0x1df9   :  { %8998 = vmatmul.mubr.msk.f32.vlgmr.msra.gmra.mrb[44].mxu1 %vm138_vm0, %v10288_v23 }
0x1dfa   :  { %9339 = vmatpush3.bf16.msra.mxu1 %v9336_v60  ;;  %9019 = vmatprep.mubr.msk.f32.mxu1 %vm138_vm0, %v8489_v22 }
0x1dfb   :  { %9341 = vmatprep.subr.bf16.mxu1 %v9340_v24 }
0x1dfe   :  { %9343 = vmatpush3.bf16.msra.mxu1 %v9340_v24 }
0x1dff   :  { %9027 = vmatprep.subr.mxu1 %v9696_v10 }
0x1e01   :  { %9020 = vmatmul.mubr.msk.f32.vlgmr.msra.gmra.mrb[46].mxu1 %vm138_vm0, %v8490_v25 }
0x1e02   :  { %9029 = vmatprep.mubr.msk.f32.mxu1 %vm9697_vm1, %v9696_v10 }
0x1ecc   :  { %v8999_v37 = vpop.f32.mrb[44].mxu1 }
0x1ecd   :  { %v4018_v38 = vadd.f32 %v8999_v37, %v3939_v36  ;;  %v4012_v39 = vpop.f32.mrb[45].mxu1 }
0x1ece   :  { %v4013_v40 = vadd.f32 %v4012_v39, %v3939_v36 }
0x1ecf   :  { %v4022_v55 = vmax.f32 %v4018_v38, 0.0 }
0x1ed0   :  { %v4021_v19 = vmax.f32 %v4013_v40, 0.0 }
0x1ed2   :  { %9008 = vmatprep.mubr.msk.f32.mxu0 %vm138_vm0, %v4021_v19 }
0x1ed3   :  { %9009 = vmatmul.mubr.msk.f32.vlgmr.msra.gmra.mrb[32].mxu0 %vm138_vm0, %v4022_v55 }
0x1ed4   :  { %v9021_v44 = vpop.f32.mrb[46].mxu1  ;;  %9024 = vmatprep.mubr.msk.f32.mxu0 %vm9697_vm1, %v9696_v10 }
0x1ed5   :  { %v10314_v46 = vadd.f32 %v9021_v44, %v8399_v26  ;;  %v4244_v20 = vpop.f32.mrb[47].mxu1 }
0x1ed6   :  { %v10316_v47 = vadd.f32 %v8399_v26, %v4244_v20 }
0x1ed7   :  { %4336 = vrot.lane.b32.xlu1 %v10314_v46, %s9698_s30 }
0x1ed8   :  { %4259 = vrot.lane.b32.xlu0 %v10316_v47, %s9698_s30 }
0x1f49   :  { %v4337_v48 = vpop.permute.xlu1 %4336 }
0x1f4a   :  { %9028 = vmatpush3.xpose.msk.msra.mxu1 %vm227_vm2, %v4337_v48  ;;  %v4260_v49 = vpop.permute.xlu0 %4259 }
0x1f4b   :  { %9023 = vmatpush3.xpose.msk.msra.mxu0 %vm227_vm2, %v4260_v49  ;;  %9037 = vmatprep.subr.mxu1 %v9696_v10 }
0x1f4c   :  { %9032 = vmatprep.subr.mxu0 %v9696_v10 }
0x1f4d   :  { %9030 = vmatmul.mubr.msk.f32.vlgmr.msra.gmra.mrb[48].mxu1 %vm227_vm2, %v10314_v46 }
0x1f4e   :  { %9025 = vmatmul.mubr.msk.f32.vlgmr.msra.gmra.mrb[34].mxu0 %vm227_vm2, %v10316_v47  ;;  %9039 = vmatprep.mubr.msk.f32.mxu1 %vm9697_vm1, %v9696_v10 }
0x1f4f   :  { %9034 = vmatprep.mubr.msk.f32.mxu0 %vm9697_vm1, %v9696_v10 }
0x1fa6   :  { %v10334_v50 = vpop.f32.mrb[32].mxu0 }
0x1fa7   :  { %v10336_v42 = vpop.f32.mrb[33].mxu0 }
0x2020   :  { %v4408_v41 = vpop.f32.mrb[48].mxu1 }
0x2021   :  { %v4409_v51 = vadd.f32 %v4408_v41, %v9901_v32  ;;  %v4331_v52 = vpop.f32.mrb[34].mxu0  ;;  %v9031_v53 = vpop.f32.mrb[49].mxu1 }
0x2022   :  { %v9026_v56 = vpop.f32.mrb[35].mxu0  ;;  %v4332_v58 = vadd.f32 %v4331_v52, %v9898_v27 }
0x2023   :  { %v4415_v57 = vsel %vm227_vm2, %v4409_v51, -inf }
0x2024   :  { %4416 = vmax.xlane.f32.xlu1 %v4415_v57  ;;  %v4412_v59 = vsel %vm227_vm2, %v4332_v58, -inf }
0x2035   :  { %4510 = vrot.lane.b32.xlu1 %v10314_v46, %s9699_s2 }
0x2039   :  { %4664 = vrot.lane.b32.xlu1 %v10314_v46, %s9701_s16 }
0x205d   :  { %4413 = vmax.xlane.f32.xlu1 %v4412_v59 }
0x206e   :  { %4588 = vrot.lane.b32.xlu1 %v10316_v47, %s9700_s15 }
0x2072   :  { %4586 = vrot.lane.b32.xlu1 %v10316_v47, %s9701_s16 }
0x2076   :  { %5080 = vrot.lane.b32.xlu1 %v10316_v47, %s9704_s22 }
0x20b1   :  { %v4417_v60 = vpop.xlane.xlu1 %4416 }
0x20b2   :  { %v4419_v61 = vsub.f32 %v4409_v51, %v4417_v60 }
0x20b4   :  { %v4422_v62 = vmul.f32 1.442695, %v4419_v61 }
0x20b5   :  { %v4511_v63 = vpop.permute.xlu1 %4510 }
0x20b6   :  { %9511 = vpow2.f32 %v4422_v62  ;;  %9038 = vmatpush3.msra.mxu1 %v4511_v63 }
0x20b7   :  { %9047 = vmatprep.subr.mxu1 %v9696_v10 }
0x20b9   :  { %v4665_v2 = vpop.permute.xlu1 %4664 }
0x20c0   :  { %v9512_v0 = vpop.eup %9511 }
0x20c1   :  { %v4427_v1 = vsel %vm227_vm2, %v9512_v0, 0.0 }
0x20c2   :  { %4428 = vadd.xlane.f32.xlu0 %v4427_v1 }
0x20d8   :  { %4666 = vrot.lane.b32.xlu0 %v10314_v46, %s9700_s15 }
0x20ea   :  { %v4414_v3 = vpop.xlane.xlu1 %4413 }
0x20eb   :  { %v4418_v4 = vsub.f32 %v4332_v58, %v4414_v3 }
0x20ed   :  { %v4420_v5 = vmul.f32 1.442695, %v4418_v4 }
0x20ee   :  { %v4589_v18 = vpop.permute.xlu1 %4588 }
0x20ef   :  { %9513 = vpow2.f32 %v4420_v5 }
0x20f2   :  { %v4587_v30 = vpop.permute.xlu1 %4586 }
0x20f6   :  { %v5081_v56 = vpop.permute.xlu1 %5080 }
0x20f9   :  { %v9514_v7 = vpop.eup %9513 }
0x20fa   :  { %v4424_v11 = vsel %vm227_vm2, %v9514_v7, 0.0 }
0x20fb   :  { %4425 = vadd.xlane.f32.xlu0 %v4424_v11 }
0x2111   :  { %4434 = vrot.lane.b32.xlu0 %v10316_v47, %s9699_s2 }
0x214f   :  { %v4429_v12 = vpop.xlane.xlu0 %4428 }
0x2150   :  { %9515 = vrcp.f32 %v4429_v12 }
0x2153   :  { %v4667_v8 = vpop.permute.xlu0 %4666 }
0x215a   :  { %v9516_v13 = vpop.eup %9515 }
0x215b   :  { %v4433_v6 = vmul.f32 %v9516_v13, %v9512_v0 }
0x215d   :  { %9040 = vmatmul.mubr.msk.f32.vlgmr.msra.gmra.mrb[50].mxu1 %vm227_vm2, %v4433_v6 }
0x215e   :  { %9048 = vmatpush3.xpose.msk.msra.mxu1 %vm227_vm2, %v4667_v8  ;;  %9049 = vmatprep.mubr.msk.f32.mxu1 %vm9697_vm1, %v9696_v10 }
0x215f   :  { %9057 = vmatprep.subr.mxu1 %v9696_v10 }
0x2161   :  { %9050 = vmatmul.mubr.msk.f32.vlgmr.msra.gmra.mrb[52].mxu1 %vm227_vm2, %v4665_v2 }
0x2162   :  { %9059 = vmatprep.mubr.msk.f32.mxu1 %vm9697_vm1, %v9696_v10 }
0x2188   :  { %v4426_v9 = vpop.xlane.xlu0 %4425 }
0x2189   :  { %9517 = vrcp.f32 %v4426_v9 }
0x218c   :  { %v4435_v16 = vpop.permute.xlu0 %4434 }
0x218d   :  { %9033 = vmatpush3.msra.mxu0 %v4435_v16 }
0x218e   :  { %9042 = vmatprep.subr.mxu0 %v9696_v10 }
0x2193   :  { %v9518_v17 = vpop.eup %9517 }
0x2194   :  { %v4432_v24 = vmul.f32 %v9518_v17, %v9514_v7 }
0x2196   :  { %9035 = vmatmul.mubr.msk.f32.vlgmr.msra.gmra.mrb[36].mxu0 %vm227_vm2, %v4432_v24 }
0x2197   :  { %9043 = vmatpush3.xpose.msk.msra.mxu0 %vm227_vm2, %v4589_v18  ;;  %9044 = vmatprep.mubr.msk.f32.mxu0 %vm9697_vm1, %v9696_v10 }
0x2198   :  { %9052 = vmatprep.subr.mxu0 %v9696_v10 }
0x219a   :  { %9045 = vmatmul.mubr.msk.f32.vlgmr.msra.gmra.mrb[38].mxu0 %vm227_vm2, %v4587_v30 }
0x219b   :  { %9054 = vmatprep.mubr.msk.f32.mxu0 %vm9697_vm1, %v9696_v10 }
0x2230   :  { %v10376_v34 = vpop.f32.mrb[50].mxu1 }
0x2231   :  { %v9041_v35 = vpop.f32.mrb[51].mxu1 }
0x2234   :  { %v4738_v36 = vpop.f32.mrb[52].mxu1 }
0x2235   :  { %v4739_v37 = vadd.f32 %v4738_v36, %v9901_v32  ;;  %v9051_v38 = vpop.f32.mrb[53].mxu1  ;;  %v4255_v36 = vld [vmem:[#allocation5 + $0x48] sm:$0xff] }
0x2237   :  { %v4745_v39 = vsel %vm227_vm2, %v4739_v37, -inf }
0x2238   :  { %4746 = vmax.xlane.f32.xlu0 %v4745_v39 }
0x224e   :  { %4840 = vrot.lane.b32.xlu0 %v10314_v46, %s9702_s17 }
0x2252   :  { %5078 = vrot.lane.b32.xlu0 %v10316_v47, %s9703_s3 }
0x2256   :  { %5156 = vrot.lane.b32.xlu0 %v10314_v46, %s9703_s3 }
0x2269   :  { %v10386_v40 = vpop.f32.mrb[36].mxu0 }
0x226a   :  { %v9036_v19 = vpop.f32.mrb[37].mxu0 }
0x226d   :  { %v4660_v55 = vpop.f32.mrb[38].mxu0 }
0x226e   :  { %v9046_v26 = vpop.f32.mrb[39].mxu0  ;;  %v4661_v52 = vadd.f32 %v4660_v55, %v9898_v27 }
0x2270   :  { %v4742_v53 = vsel %vm227_vm2, %v4661_v52, -inf }
0x22c5   :  { %v4747_v44 = vpop.xlane.xlu0 %4746 }
0x22c6   :  { %v4749_v20 = vsub.f32 %v4739_v37, %v4747_v44  ;;  %v4254_v37 = vld [vmem:[#allocation5 + $0x40] sm:$0xff] }
0x22c8   :  { %v4752_v48 = vmul.f32 1.442695, %v4749_v20 }
0x22c9   :  { %v4841_v49 = vpop.permute.xlu0 %4840 }
0x22ca   :  { %9519 = vpow2.f32 %v4752_v48  ;;  %9058 = vmatpush3.msra.mxu1 %v4841_v49 }
0x22cb   :  { %9072 = vmatprep.subr.mxu1 %v9696_v10 }
0x22cd   :  { %v5079_v60 = vpop.permute.xlu0 %5078 }
0x22d1   :  { %v5157_v62 = vpop.permute.xlu0 %5156 }
0x22d4   :  { %v9520_v41 = vpop.eup %9519 }
0x22d5   :  { %v4757_v51 = vsel %vm227_vm2, %v9520_v41, 0.0 }
0x22d6   :  { %4758 = vadd.xlane.f32.xlu1 %v4757_v51 }
0x22e7   :  { %5158 = vrot.lane.b32.xlu1 %v10314_v46, %s9704_s22 }
0x230b   :  { %4743 = vmax.xlane.f32.xlu1 %v4742_v53 }
0x2363   :  { %v4759_v57 = vpop.xlane.xlu1 %4758 }
0x2364   :  { %9521 = vrcp.f32 %v4759_v57  ;;  %v4256_v57 = vld [vmem:[#allocation5 + $0x50] sm:$0xff] }
0x2367   :  { %v5159_v61 = vpop.permute.xlu1 %5158 }
0x236e   :  { %v9522_v58 = vpop.eup %9521 }
0x236f   :  { %v4763_v59 = vmul.f32 %v9522_v58, %v9520_v41 }
0x2371   :  { %9060 = vmatmul.mubr.msk.f32.vlgmr.msra.gmra.mrb[54].mxu1 %vm227_vm2, %v4763_v59 }
0x2372   :  { %9073 = vmatpush3.xpose.msk.msra.mxu1 %vm227_vm2, %v5081_v56  ;;  %9074 = vmatprep.mubr.msk.f32.mxu1 %vm9697_vm1, %v9696_v10 }
0x2373   :  { %9077 = vmatprep.subr.mxu1 %v9696_v10 }
0x2375   :  { %9075 = vmatmul.mubr.msk.f32.vlgmr.msra.gmra.mrb[56].mxu1 %vm227_vm2, %v5079_v60 }
0x2376   :  { %9078 = vmatpush3.xpose.msk.msra.mxu1 %vm227_vm2, %v5159_v61  ;;  %9079 = vmatprep.mubr.msk.f32.mxu1 %vm9697_vm1, %v9696_v10 }
0x2377   :  { %9087 = vmatprep.subr.mxu1 %v9696_v10 }
0x2379   :  { %9080 = vmatmul.mubr.msk.f32.vlgmr.msra.gmra.mrb[58].mxu1 %vm227_vm2, %v5157_v62 }
0x237a   :  { %9089 = vmatprep.mubr.msk.f32.mxu1 %vm9697_vm1, %v9696_v10 }
0x2398   :  { %v4744_v63 = vpop.xlane.xlu1 %4743 }
0x2399   :  { %v4748_v0 = vsub.f32 %v4661_v52, %v4744_v63 }
0x239b   :  { %v4750_v1 = vmul.f32 1.442695, %v4748_v0 }
0x239d   :  { %9523 = vpow2.f32 %v4750_v1 }
0x23a7   :  { %v9524_v2 = vpop.eup %9523 }
0x23a8   :  { %v4754_v3 = vsel %vm227_vm2, %v9524_v2, 0.0 }
0x23a9   :  { %4755 = vadd.xlane.f32.xlu0 %v4754_v3 }
0x23bf   :  { %4764 = vrot.lane.b32.xlu0 %v10316_v47, %s9702_s17 }
0x23c3   :  { %5332 = vrot.lane.b32.xlu0 %v10314_v46, %s9705_s18 }
0x23c7   :  { %5493 = vrot.lane.b32.xlu0 %v10316_v47, %s9706_s19 }
0x23cb   :  { %5571 = vrot.lane.b32.xlu0 %v10314_v46, %s9706_s19 }
0x23cf   :  { %5491 = vrot.lane.b32.xlu0 %v10316_v47, %s9707_s21 }
0x2436   :  { %v4756_v4 = vpop.xlane.xlu0 %4755 }
0x2437   :  { %9525 = vrcp.f32 %v4756_v4 }
0x243a   :  { %v4765_v5 = vpop.permute.xlu0 %4764 }
0x243b   :  { %9053 = vmatpush3.msra.mxu0 %v4765_v5 }
0x243c   :  { %9062 = vmatprep.subr.mxu0 %v4255_v36 }
0x243e   :  { %v5333_v7 = vpop.permute.xlu0 %5332 }
0x243f   :  { %9088 = vmatpush3.msra.mxu1 %v5333_v7 }
0x2440   :  { %9097 = vmatprep.subr.mxu1 %v9696_v10 }
0x2441   :  { %v9526_v11 = vpop.eup %9525 }
0x2442   :  { %v4762_v12 = vmul.f32 %v9526_v11, %v9524_v2  ;;  %v5494_v59 = vpop.permute.xlu0 %5493 }
0x2444   :  { %9055 = vmatmul.mubr.msk.f32.vlgmr.msra.gmra.mrb[40].mxu0 %vm227_vm2, %v4762_v12  ;;  %v4912_v13 = vpop.f32.mrb[54].mxu1 }
0x2445   :  { %v9061_v6 = vpop.f32.mrb[55].mxu1  ;;  %9063 = vmatpush3.msra.mxu0 %v4255_v36 }
0x2446   :  { %9067 = vmatprep.subr.mxu0 %v4254_v37  ;;  %v5572_v62 = vpop.permute.xlu0 %5571 }
0x2448   :  { %v5152_v8 = vpop.f32.mrb[56].mxu1 }
0x2449   :  { %v5153_v9 = vadd.f32 %v5152_v8, %v9898_v27  ;;  %v9076_v16 = vpop.f32.mrb[57].mxu1 }
0x244a   :  { %v5492_v63 = vpop.permute.xlu0 %5491 }
0x244b   :  { %v5234_v17 = vsel %vm227_vm2, %v5153_v9, -inf }
0x244c   :  { %v5230_v18 = vpop.f32.mrb[58].mxu1  ;;  %5235 = vmax.xlane.f32.xlu1 %v5234_v17 }
0x244d   :  { %v5231_v24 = vadd.f32 %v5230_v18, %v9901_v32  ;;  %v9081_v30 = vpop.f32.mrb[59].mxu1 }
0x244f   :  { %v5237_v35 = vsel %vm227_vm2, %v5231_v24, -inf }
0x2450   :  { %5238 = vmax.xlane.f32.xlu1 %v5237_v35 }
0x24d9   :  { %v5236_v38 = vpop.xlane.xlu1 %5235 }
0x24da   :  { %v5240_v39 = vsub.f32 %v5153_v9, %v5236_v38 }
0x24dc   :  { %v5242_v19 = vmul.f32 1.442695, %v5240_v39 }
0x24dd   :  { %v5239_v55 = vpop.xlane.xlu1 %5238 }
0x24de   :  { %9527 = vpow2.f32 %v5242_v19  ;;  %v5241_v26 = vsub.f32 %v5231_v24, %v5239_v55 }
0x24e0   :  { %v5244_v44 = vmul.f32 1.442695, %v5241_v26 }
0x24e2   :  { %9529 = vpow2.f32 %v5244_v44 }
0x24e8   :  { %v9528_v20 = vpop.eup %9527 }
0x24e9   :  { %v5246_v48 = vsel %vm227_vm2, %v9528_v20, 0.0 }
0x24ea   :  { %5247 = vadd.xlane.f32.xlu1 %v5246_v48 }
0x24ec   :  { %v9530_v49 = vpop.eup %9529 }
0x24ed   :  { %v5249_v41 = vsel %vm227_vm2, %v9530_v49, 0.0 }
0x24ee   :  { %5250 = vadd.xlane.f32.xlu1 %v5249_v41 }
0x24ff   :  { %5256 = vrot.lane.b32.xlu1 %v10316_v47, %s9705_s18 }
0x2503   :  { %5569 = vrot.lane.b32.xlu1 %v10314_v46, %s9707_s21 }
0x2517   :  { %v4836_v51 = vpop.f32.mrb[40].mxu0 }
0x2518   :  { %v9056_v52 = vpop.f32.mrb[41].mxu0  ;;  %9064 = vmatprep.mubr.msk.f32.mxu0 %vm227_vm2, %v4836_v51 }
0x2519   :  { %9065 = vmatmul.mubr.msk.f32.vlgmr.msra.gmra.mrb[42].mxu0 %vm227_vm2, %v4912_v13 }
0x251a   :  { %9069 = vmatprep.mubr.msk.f32.mxu0 %vm227_vm2, %v10386_v40  ;;  %9068 = vmatpush3.msra.mxu0 %v4254_v37 }
0x251b   :  { %9082 = vmatprep.subr.mxu0 %v9696_v10 }
0x2521   :  { %9070 = vmatmul.mubr.msk.f32.vlgmr.msra.gmra.mrb[42].mxu0 %vm227_vm2, %v10376_v34 }
0x2522   :  { %9084 = vmatprep.mubr.msk.f32.mxu0 %vm9697_vm1, %v9696_v10 }
0x2577   :  { %v5248_v53 = vpop.xlane.xlu1 %5247 }
0x2578   :  { %9531 = vrcp.f32 %v5248_v53 }
0x257b   :  { %v5251_v56 = vpop.xlane.xlu1 %5250 }
0x257c   :  { %9533 = vrcp.f32 %v5251_v56 }
0x257f   :  { %v5257_v58 = vpop.permute.xlu1 %5256 }
0x2580   :  { %9083 = vmatpush3.msra.mxu0 %v5257_v58 }
0x2581   :  { %9092 = vmatprep.subr.mxu0 %v4256_v57 }
0x2582   :  { %v9532_v60 = vpop.eup %9531 }
0x2583   :  { %v5254_v40 = vmul.f32 %v9532_v60, %v9528_v20  ;;  %v5570_v4 = vpop.permute.xlu1 %5569  ;;  %v4257_v20 = vld [vmem:[#allocation5 + $0x58] sm:$0xff] }
0x2585   :  { %9085 = vmatmul.mubr.msk.f32.vlgmr.msra.gmra.mrb[44].mxu0 %vm227_vm2, %v5254_v40 }
0x2586   :  { %v9534_v61 = vpop.eup %9533  ;;  %9093 = vmatpush3.msra.mxu0 %v4256_v57 }
0x2587   :  { %v5255_v34 = vmul.f32 %v9534_v61, %v9530_v49  ;;  %9102 = vmatprep.subr.mxu0 %v9696_v10 }
0x2589   :  { %9090 = vmatmul.mubr.msk.f32.vlgmr.msra.gmra.mrb[60].mxu1 %vm227_vm2, %v5255_v34 }
0x258a   :  { %9098 = vmatpush3.xpose.msk.msra.mxu1 %vm227_vm2, %v5494_v59  ;;  %9099 = vmatprep.mubr.msk.f32.mxu1 %vm9697_vm1, %v9696_v10 }
0x258b   :  { %9107 = vmatprep.subr.mxu1 %v9696_v10 }
0x258d   :  { %9100 = vmatmul.mubr.msk.f32.vlgmr.msra.gmra.mrb[62].mxu1 %vm227_vm2, %v5492_v63 }
0x258e   :  { %9109 = vmatprep.mubr.msk.f32.mxu1 %vm9697_vm1, %v9696_v10 }
0x2658   :  { %v5328_v0 = vpop.f32.mrb[44].mxu0 }
0x2659   :  { %v9086_v1 = vpop.f32.mrb[45].mxu0  ;;  %9094 = vmatprep.mubr.msk.f32.mxu0 %vm227_vm2, %v5328_v0  ;;  %v4031_v0 = vrot.slane %v10266_v43, %v10077_v54 }
0x265c   :  { %v5404_v2 = vpop.f32.mrb[60].mxu1 }
0x265d   :  { %v9091_v3 = vpop.f32.mrb[61].mxu1  ;;  %9095 = vmatmul.mubr.msk.f32.vlgmr.msra.gmra.mrb[42].mxu0 %vm227_vm2, %v5404_v2 }
0x265e   :  { %9103 = vmatpush3.xpose.msk.msra.mxu0 %vm227_vm2, %v5572_v62  ;;  %9104 = vmatprep.mubr.msk.f32.mxu0 %vm9697_vm1, %v9696_v10 }
0x265f   :  { %9112 = vmatprep.subr.mxu0 %v9696_v10 }
0x2660   :  { %v5565_v5 = vpop.f32.mrb[62].mxu1 }
0x2661   :  { %v5566_v7 = vadd.f32 %v5565_v5, %v9898_v27  ;;  %v9101_v11 = vpop.f32.mrb[63].mxu1  ;;  %9105 = vmatmul.mubr.msk.f32.vlgmr.msra.gmra.mrb[46].mxu0 %vm227_vm2, %v5570_v4  ;;  %v4110_v5 = vadd.f32 %v10334_v50, %v4031_v0 }
0x2662   :  { %9114 = vmatprep.mubr.msk.f32.mxu0 %vm9697_vm1, %v9696_v10 }
0x2663   :  { %v5647_v12 = vsel %vm227_vm2, %v5566_v7, -inf }
0x2664   :  { %5648 = vmax.xlane.f32.xlu0 %v5647_v12  ;;  %v10490_v12 = vadd.f32 %v4110_v5, %v10288_v23  ;;  %v5952_v23 = vld [vmem:[#allocation7 + $0x48] sm:$0xff] }
0x2666   :  { %v4118_v50 = vsel %vm138_vm0, %v10490_v12, 0.0 }
0x26f1   :  { %v5649_v13 = vpop.xlane.xlu0 %5648 }
0x26f2   :  { %v5653_v6 = vsub.f32 %v5566_v7, %v5649_v13 }
0x26f4   :  { %v5655_v8 = vmul.f32 1.442695, %v5653_v6 }
0x26f6   :  { %9535 = vpow2.f32 %v5655_v8 }
0x2700   :  { %v9536_v9 = vpop.eup %9535 }
0x2701   :  { %v5659_v16 = vsel %vm227_vm2, %v9536_v9, 0.0 }
0x2702   :  { %5660 = vadd.xlane.f32.xlu0 %v5659_v16 }
0x2734   :  { %v5643_v17 = vpop.f32.mrb[46].mxu0 }
0x2735   :  { %v5644_v18 = vadd.f32 %v5643_v17, %v9901_v32  ;;  %v9106_v24 = vpop.f32.mrb[47].mxu0  ;;  %v5953_v17 = vld [vmem:[#allocation7 + $0x50] sm:$0xff] }
0x2736   :  { %v6043_v24 = vld [vmem:[#allocation8 + $0x40] sm:$0xff] }
0x2737   :  { %v5650_v30 = vsel %vm227_vm2, %v5644_v18, -inf }
0x2738   :  { %5651 = vmax.xlane.f32.xlu1 %v5650_v30  ;;  %v6044_v30 = vld [vmem:[#allocation8 + $0x48] sm:$0xff] }
0x2749   :  { %5669 = vrot.lane.b32.xlu1 %v10316_v47, %s9708_s23 }
0x278f   :  { %v5661_v35 = vpop.xlane.xlu0 %5660 }
0x2790   :  { %9537 = vrcp.f32 %v5661_v35  ;;  %v9352_v35 = vpack.c.bf16 %v6044_v30, %v6043_v24  ;;  %v6178_v24 = vld [vmem:[#allocation3 + $0x78] sm:$0xff] }
0x279a   :  { %v9538_v37 = vpop.eup %9537 }
0x279b   :  { %v5667_v19 = vmul.f32 %v9538_v37, %v9536_v9  ;;  %v5951_v9 = vld [vmem:[#allocation7 + $0x40] sm:$0xff] }
0x279c   :  { %v9344_v16 = vpack.c.bf16 %v5952_v23, %v5951_v9 }
0x27c5   :  { %v5652_v36 = vpop.xlane.xlu1 %5651 }
0x27c6   :  { %v5654_v38 = vsub.f32 %v5644_v18, %v5652_v36  ;;  %v5954_v18 = vld [vmem:[#allocation7 + $0x58] sm:$0xff] }
0x27c8   :  { %v5657_v39 = vmul.f32 1.442695, %v5654_v38 }
0x27c9   :  { %v5670_v55 = vpop.permute.xlu1 %5669 }
0x27ca   :  { %9539 = vpow2.f32 %v5657_v39  ;;  %9108 = vmatpush3.msra.mxu1 %v5670_v55 }
0x27cb   :  { %9110 = vmatmul.mubr.msk.f32.vlgmr.msra.gmra.mrb[64].mxu1 %vm227_vm2, %v5667_v19  ;;  %9345 = vmatprep.subr.bf16.mxu1 %v9344_v16 }
0x27cc   :  { %9347 = vmatpush3.bf16.msra.mxu1 %v9344_v16 }
0x27d4   :  { %v9540_v26 = vpop.eup %9539 }
0x27d5   :  { %v5662_v44 = vsel %vm227_vm2, %v9540_v26, 0.0 }
0x27d6   :  { %5663 = vadd.xlane.f32.xlu0 %v5662_v44 }
0x27ec   :  { %5745 = vrot.lane.b32.xlu0 %v10314_v46, %s9708_s23  ;;  %v10475_v46 = vld [vmem:[%s10758_s8 + $0x10] sm:$0x7f] }
0x27ed   :  { %v5907_v57 = vrot.slane %v10475_v46, %v10037_v15 }
0x2863   :  { %v5664_v47 = vpop.xlane.xlu0 %5663 }
0x2864   :  { %9541 = vrcp.f32 %v5664_v47 }
0x2867   :  { %v5746_v48 = vpop.permute.xlu0 %5745 }
0x2868   :  { %9113 = vmatpush3.msra.mxu0 %v5746_v48 }
0x2869   :  { %9117 = vmatprep.subr.mxu0 %v4257_v20 }
0x286e   :  { %v9542_v49 = vpop.eup %9541 }
0x286f   :  { %v5668_v41 = vmul.f32 %v9542_v49, %v9540_v26  ;;  %v5941_v26 = vrot.slane %v10475_v46, %v10055_v31  ;;  %v5947_v49 = vrot.slane %v10475_v46, %v10058_v33 }
0x2871   :  { %9115 = vmatmul.mubr.msk.f32.vlgmr.msra.gmra.mrb[48].mxu0 %vm227_vm2, %v5668_v41 }
0x2872   :  { %9118 = vmatpush3.msra.mxu0 %v4257_v20 }
0x2873   :  { %9353 = vmatprep.subr.bf16.mxu0 %v9352_v35 }
0x289e   :  { %v5741_v51 = vpop.f32.mrb[64].mxu1 }
0x289f   :  { %v9111_v52 = vpop.f32.mrb[65].mxu1  ;;  %9119 = vmatprep.mubr.msk.f32.mxu0 %vm227_vm2, %v5741_v51 }
0x2944   :  { %v5817_v53 = vpop.f32.mrb[48].mxu0 }
0x2945   :  { %v9116_v56 = vpop.f32.mrb[49].mxu0  ;;  %9120 = vmatmul.mubr.msk.f32.vlgmr.msra.gmra.mrb[42].mxu0 %vm227_vm2, %v5817_v53 }
0x2946   :  { %9355 = vmatpush3.bf16.msra.mxu0 %v9352_v35  ;;  %v6045_v56 = vld [vmem:[#allocation8 + $0x50] sm:$0xff] }
0x2a18   :  { %v9121_v58 = vpop.f32.mrb[42].mxu0 }
0x2a19   :  { %v5909_v59 = vadd.f32 %v9121_v58, %v5907_v57  ;;  %v5893_v60 = vpop.f32.mrb[43].mxu0 }
0x2a1a   :  { %v5908_v40 = vadd.f32 %v5907_v57, %v5893_v60  ;;  %v6046_v57 = vld [vmem:[#allocation8 + $0x58] sm:$0xff] }
0x2a1b   :  { %v5911_v61 = vadd.f32 %v8490_v25, %v5909_v59  ;;  %v4105_v25 = vadd.f32 %v10336_v42, %v4031_v0  ;;  %v9356_v58 = vpack.c.bf16 %v6046_v57, %v6045_v56  ;;  %v5958_v59 = vrot.slane %v10475_v46, %v10068_v14 }
0x2a1c   :  { %v5910_v62 = vadd.f32 %v8489_v22, %v5908_v40 }
0x2a1d   :  { %v5915_v34 = vsel %vm138_vm0, %v5911_v61, 0.0  ;;  %v10494_v6 = vadd.f32 %v4105_v25, %v10285_v21  ;;  %v9348_v21 = vpack.c.bf16 %v5954_v18, %v5953_v17  ;;  %9357 = vmatprep.subr.bf16.mxu0 %v9356_v58  ;;  %v6175_v17 = vld [vmem:[#allocation3 + $0x60] sm:$0xff]  ;;  %v6176_v18 = vld [vmem:[#allocation3 + $0x68] sm:$0xff] }
0x2a1e   :  { %5916 = vadd.xlane.f32.xlu0 %v5915_v34  ;;  %v5912_v63 = vsel %vm138_vm0, %v5910_v62, 0.0  ;;  %9359 = vmatpush3.bf16.msra.mxu0 %v9356_v58 }
0x2a1f   :  { %5913 = vadd.xlane.f32.xlu1 %v5912_v63  ;;  %v4115_v42 = vsel %vm138_vm0, %v10494_v6, 0.0  ;;  %9349 = vmatprep.subr.bf16.mxu1 %v9348_v21 }
0x2a20   :  { %9351 = vmatpush3.bf16.msra.mxu1 %v9348_v21  ;;  %v6177_v21 = vld [vmem:[#allocation3 + $0x70] sm:$0xff] }
0x2a21   :  { %v9364_v30 = vpack.c.bf16 %v6178_v24, %v6177_v21 }
0x2aab   :  { %v5917_v1 = vpop.xlane.xlu0 %5916 }
0x2aac   :  { %v5919_v2 = vmul.f32 0.03125, %v5917_v1  ;;  %v5914_v3 = vpop.xlane.xlu1 %5913 }
0x2aad   :  { %v5918_v4 = vmul.f32 0.03125, %v5914_v3  ;;  %v6050_v3 = vrot.slane %v10475_v46, %v10077_v54 }
0x2aae   :  { %v5921_v7 = vsub.f32 %v5911_v61, %v5919_v2 }
0x2aaf   :  { %v5920_v45 = vsub.f32 %v5910_v62, %v5918_v4 }
0x2ab0   :  { %v5923_v22 = vmul.f32 %v5921_v7, %v5921_v7 }
0x2ab1   :  { %v5922_v11 = vmul.f32 %v5920_v45, %v5920_v45 }
0x2ab2   :  { %v5927_v13 = vsel %vm138_vm0, %v5923_v22, 0.0 }
0x2ab3   :  { %5928 = vadd.xlane.f32.xlu0 %v5927_v13  ;;  %v5924_v8 = vsel %vm138_vm0, %v5922_v11, 0.0 }
0x2ab4   :  { %5925 = vadd.xlane.f32.xlu1 %v5924_v8 }
0x2ab7   :  { %4119 = vadd.xlane.f32.xlu0 %v4118_v50 }
0x2ab8   :  { %4116 = vadd.xlane.f32.xlu1 %v4115_v42 }
0x2b40   :  { %v5929_v36 = vpop.xlane.xlu0 %5928 }
0x2b41   :  { %v5931_v37 = vmul.f32 0.03125, %v5929_v36  ;;  %v5926_v38 = vpop.xlane.xlu1 %5925 }
0x2b42   :  { %v5930_v39 = vmul.f32 0.03125, %v5926_v38 }
0x2b43   :  { %v5933_v19 = vadd.f32 1e-08, %v5931_v37 }
0x2b44   :  { %v5932_v55 = vadd.f32 1e-08, %v5930_v39  ;;  %v4120_v0 = vpop.xlane.xlu0 %4119 }
0x2b45   :  { %9543 = vrsqrt.f32 %v5933_v19  ;;  %v4117_v1 = vpop.xlane.xlu1 %4116  ;;  %v4122_v2 = vmul.f32 0.03125, %v4120_v0 }
0x2b46   :  { %9545 = vrsqrt.f32 %v5932_v55  ;;  %v4121_v4 = vmul.f32 0.03125, %v4117_v1 }
0x2b48   :  { %v4123_v22 = vsub.f32 %v10494_v6, %v4121_v4  ;;  %v9360_v6 = vpack.c.bf16 %v6176_v18, %v6175_v17 }
0x2b4a   :  { %v4125_v23 = vmul.f32 %v4123_v22, %v4123_v22  ;;  %9369 = vmatprep.subr.bf16.mxu0 %v9360_v6  ;;  %9361 = vmatprep.subr.bf16.mxu1 %v9360_v6 }
0x2b4f   :  { %v9544_v44 = vpop.eup %9543 }
0x2b50   :  { %v9546_v47 = vpop.eup %9545  ;;  %v5937_v20 = vmul.f32 %v9544_v44, %v5921_v7  ;;  %v4124_v7 = vsub.f32 %v10490_v12, %v4122_v2  ;;  %v4127_v12 = vsel %vm138_vm0, %v4125_v23, 0.0 }
0x2b51   :  { %v5936_v48 = vmul.f32 %v9546_v47, %v5920_v45 }
0x2b52   :  { %v5943_v41 = vmul.f32 %v5941_v26, %v5937_v20  ;;  %v4126_v42 = vmul.f32 %v4124_v7, %v4124_v7 }
0x2b53   :  { %v5942_v51 = vmul.f32 %v5941_v26, %v5936_v48 }
0x2b54   :  { %v5949_v53 = vadd.f32 %v5947_v49, %v5943_v41  ;;  %v4130_v16 = vsel %vm138_vm0, %v4126_v42, 0.0 }
0x2b55   :  { %v5948_v52 = vadd.f32 %v5947_v49, %v5942_v51 }
0x2b57   :  { %9130 = vmatprep.mubr.msk.f32.mxu1 %vm138_vm0, %v5948_v52 }
0x2b58   :  { %9131 = vmatmul.mubr.msk.f32.vlgmr.msra.gmra.mrb[66].mxu1 %vm138_vm0, %v5949_v53 }
0x2b59   :  { %9363 = vmatpush3.bf16.msra.mxu1 %v9360_v6 }
0x2b5a   :  { %9365 = vmatprep.subr.bf16.mxu1 %v9364_v30 }
0x2b5d   :  { %9367 = vmatpush3.bf16.msra.mxu1 %v9364_v30 }
0x2b5e   :  { %9166 = vmatprep.subr.mxu1 %v9696_v10 }
0x2c2b   :  { %v9132_v60 = vpop.f32.mrb[66].mxu1 }
0x2c2c   :  { %v6037_v40 = vadd.f32 %v9132_v60, %v5958_v59  ;;  %v6031_v61 = vpop.f32.mrb[67].mxu1  ;;  %v9595_v60 = vld [vmem:[%s10758_s8 + $0x8] sm:$0x7f] }
0x2c2d   :  { %v6032_v62 = vadd.f32 %v6031_v61, %v5958_v59 }
0x2c2e   :  { %v6041_v63 = vmax.f32 %v6037_v40, 0.0  ;;  %v4150_v40 = vrot.slane %v9595_v60, %v10090_v29 }
0x2c2f   :  { %v6040_v34 = vmax.f32 %v6032_v62, 0.0 }
0x2c31   :  { %9141 = vmatprep.mubr.msk.f32.mxu0 %vm138_vm0, %v6040_v34 }
0x2c32   :  { %9142 = vmatmul.mubr.msk.f32.vlgmr.msra.gmra.mrb[50].mxu0 %vm138_vm0, %v6041_v63 }
0x2c33   :  { %9371 = vmatpush3.bf16.msra.mxu0 %v9360_v6 }
0x2c34   :  { %9373 = vmatprep.subr.bf16.mxu0 %v9364_v30 }
0x2c37   :  { %9375 = vmatpush3.bf16.msra.mxu0 %v9364_v30 }
0x2c38   :  { %9176 = vmatprep.subr.mxu0 %v9696_v10 }
0x2d05   :  { %v9143_v5 = vpop.f32.mrb[50].mxu0 }
0x2d06   :  { %v6129_v25 = vadd.f32 %v9143_v5, %v6050_v3  ;;  %v6123_v45 = vpop.f32.mrb[51].mxu0  ;;  %v6163_v5 = vrot.slane %v10475_v46, %v10087_v28 }
0x2d07   :  { %v6124_v11 = vadd.f32 %v6123_v45, %v6050_v3 }
0x2d08   :  { %v6133_v13 = vadd.f32 %v6129_v25, %v5949_v53  ;;  %v4144_v53 = vrot.slane %v10266_v43, %v10087_v28 }
0x2d09   :  { %v6132_v8 = vadd.f32 %v6124_v11, %v5948_v52  ;;  %v6169_v11 = vrot.slane %v10475_v46, %v10090_v29 }
0x2d0a   :  { %v6137_v50 = vsel %vm138_vm0, %v6133_v13, 0.0 }
0x2d0b   :  { %6138 = vadd.xlane.f32.xlu0 %v6137_v50  ;;  %v6134_v9 = vsel %vm138_vm0, %v6132_v8, 0.0 }
0x2d0c   :  { %6135 = vadd.xlane.f32.xlu1 %v6134_v9  ;;  %v8440_v9 = vld [vmem:[%s10754_s4 + $0x3] ss:$0 sm:$0xff] }
0x2d0f   :  { %4131 = vadd.xlane.f32.xlu0 %v4130_v16 }
0x2d10   :  { %4128 = vadd.xlane.f32.xlu1 %v4127_v12 }
0x2d98   :  { %v6139_v35 = vpop.xlane.xlu0 %6138 }
0x2d99   :  { %v6141_v36 = vmul.f32 0.03125, %v6139_v35  ;;  %v6136_v37 = vpop.xlane.xlu1 %6135 }
0x2d9a   :  { %v6140_v38 = vmul.f32 0.03125, %v6136_v37 }
0x2d9b   :  { %v6143_v39 = vsub.f32 %v6133_v13, %v6141_v36 }
0x2d9c   :  { %v6142_v19 = vsub.f32 %v6132_v8, %v6140_v38  ;;  %v4132_v55 = vpop.xlane.xlu0 %4131 }
0x2d9d   :  { %v4134_v26 = vmul.f32 0.03125, %v4132_v55  ;;  %v4129_v44 = vpop.xlane.xlu1 %4128  ;;  %v6145_v47 = vmul.f32 %v6143_v39, %v6143_v39 }
0x2d9e   :  { %v4133_v20 = vmul.f32 0.03125, %v4129_v44  ;;  %v6144_v48 = vmul.f32 %v6142_v19, %v6142_v19 }
0x2d9f   :  { %v4136_v49 = vadd.f32 1e-08, %v4134_v26  ;;  %v6149_v41 = vsel %vm138_vm0, %v6145_v47, 0.0 }
0x2da0   :  { %v4135_v51 = vadd.f32 1e-08, %v4133_v20  ;;  %6150 = vadd.xlane.f32.xlu0 %v6149_v41  ;;  %v6146_v52 = vsel %vm138_vm0, %v6144_v48, 0.0 }
0x2da1   :  { %9547 = vrsqrt.f32 %v4136_v49  ;;  %6147 = vadd.xlane.f32.xlu1 %v6146_v52 }
0x2da2   :  { %9549 = vrsqrt.f32 %v4135_v51 }
0x2dab   :  { %v9548_v56 = vpop.eup %9547 }
0x2dac   :  { %v9550_v57 = vpop.eup %9549  ;;  %v4140_v58 = vmul.f32 %v9548_v56, %v4124_v7 }
0x2dad   :  { %v4139_v59 = vmul.f32 %v9550_v57, %v4123_v22 }
0x2dae   :  { %v4146_v61 = vmul.f32 %v4144_v53, %v4140_v58 }
0x2daf   :  { %v4145_v62 = vmul.f32 %v4144_v53, %v4139_v59 }
0x2db0   :  { %v10531_v63 = vadd.f32 %v4150_v40, %v4146_v61 }
0x2db1   :  { %v10529_v34 = vadd.f32 %v4150_v40, %v4145_v62 }
0x2db3   :  { %9163 = vmatprep.mubr.msk.f32.mxu0 %vm138_vm0, %v10529_v34 }
0x2db4   :  { %9164 = vmatmul.mubr.msk.f32.vlgmr.msra.gmra.mrb[52].mxu0 %vm138_vm0, %v10531_v63 }
0x2db5   :  { %9178 = vmatprep.mubr.msk.f32.mxu0 %vm9697_vm1, %v9696_v10 }
0x2e2d   :  { %v6151_v43 = vpop.xlane.xlu0 %6150 }
0x2e2e   :  { %v6153_v0 = vmul.f32 0.03125, %v6151_v43  ;;  %v6148_v1 = vpop.xlane.xlu1 %6147 }
0x2e2f   :  { %v6152_v2 = vmul.f32 0.03125, %v6148_v1 }
0x2e30   :  { %v6155_v3 = vadd.f32 1e-08, %v6153_v0 }
0x2e31   :  { %v6154_v4 = vadd.f32 1e-08, %v6152_v2 }
0x2e32   :  { %9551 = vrsqrt.f32 %v6155_v3 }
0x2e33   :  { %9553 = vrsqrt.f32 %v6154_v4 }
0x2e3c   :  { %v9552_v7 = vpop.eup %9551 }
0x2e3d   :  { %v9554_v25 = vpop.eup %9553  ;;  %v6159_v45 = vmul.f32 %v9552_v7, %v6143_v39 }
0x2e3e   :  { %v6158_v22 = vmul.f32 %v9554_v25, %v6142_v19 }
0x2e3f   :  { %v6165_v13 = vmul.f32 %v6163_v5, %v6159_v45 }
0x2e40   :  { %v6164_v8 = vmul.f32 %v6163_v5, %v6158_v22 }
0x2e41   :  { %v6171_v42 = vadd.f32 %v6169_v11, %v6165_v13 }
0x2e42   :  { %v6170_v50 = vadd.f32 %v6169_v11, %v6164_v8 }
0x2e44   :  { %9152 = vmatprep.mubr.msk.f32.mxu1 %vm138_vm0, %v6170_v50 }
0x2e45   :  { %9153 = vmatmul.mubr.msk.f32.vlgmr.msra.gmra.mrb[68].mxu1 %vm138_vm0, %v6171_v42 }
0x2e46   :  { %9168 = vmatprep.mubr.msk.f32.mxu1 %vm9697_vm1, %v9696_v10 }
0x2e87   :  { %v9165_v23 = vpop.f32.mrb[52].mxu0 }
0x2e88   :  { %v10550_v16 = vadd.f32 %v9165_v23, %v8440_v9  ;;  %v6340_v12 = vpop.f32.mrb[53].mxu0 }
0x2e89   :  { %v10552_v46 = vadd.f32 %v8440_v9, %v6340_v12 }
0x2e8a   :  { %6433 = vrot.lane.b32.xlu0 %v10550_v16, %s9698_s30 }
0x2e8b   :  { %6355 = vrot.lane.b32.xlu1 %v10552_v46, %s9698_s30 }
0x2efc   :  { %v6434_v24 = vpop.permute.xlu0 %6433 }
0x2efd   :  { %v6356_v17 = vpop.permute.xlu1 %6355 }
0x2efe   :  { %9167 = vmatpush3.xpose.msk.msra.mxu1 %vm227_vm2, %v6356_v17 }
0x2eff   :  { %9171 = vmatprep.subr.mxu1 %v9696_v10 }
0x2f18   :  { %v9154_v18 = vpop.f32.mrb[68].mxu1 }
0x2f19   :  { %v6259_v6 = vpop.f32.mrb[69].mxu1  ;;  %v10567_v30 = vadd.f32 %v9154_v18, %v8440_v9 }
0x2f1a   :  { %v10560_v21 = vadd.f32 %v8440_v9, %v6259_v6 }
0x2f1c   :  { %9169 = vmatmul.mubr.msk.f32.vlgmr.msra.gmra.mrb[70].mxu1 %vm227_vm2, %v10560_v21 }
0x2f1d   :  { %9172 = vmatpush3.xpose.msk.msra.mxu1 %vm227_vm2, %v6434_v24  ;;  %9173 = vmatprep.mubr.msk.f32.mxu1 %vm9697_vm1, %v9696_v10 }
0x2f1e   :  { %9181 = vmatprep.subr.mxu1 %v9696_v10 }
0x2f20   :  { %9174 = vmatmul.mubr.msk.f32.vlgmr.msra.gmra.mrb[72].mxu1 %vm227_vm2, %v10567_v30 }
0x2f21   :  { %9183 = vmatprep.mubr.msk.f32.mxu1 %vm9697_vm1, %v9696_v10 }
0x2fef   :  { %v6428_v35 = vpop.f32.mrb[70].mxu1 }
0x2ff0   :  { %v9170_v36 = vpop.f32.mrb[71].mxu1  ;;  %v6429_v55 = vadd.f32 %v6428_v35, %v9898_v27 }
0x2ff2   :  { %v6510_v26 = vsel %vm227_vm2, %v6429_v55, -inf }
0x2ff3   :  { %v6506_v37 = vpop.f32.mrb[72].mxu1 }
0x2ff4   :  { %v6507_v38 = vadd.f32 %v6506_v37, %v9901_v32  ;;  %v9175_v39 = vpop.f32.mrb[73].mxu1 }
0x2ff6   :  { %v6513_v19 = vsel %vm227_vm2, %v6507_v38, -inf }
0x2ff7   :  { %6514 = vmax.xlane.f32.xlu1 %v6513_v19 }
0x3008   :  { %6608 = vrot.lane.b32.xlu1 %v10550_v16, %s9699_s2 }
0x300c   :  { %6762 = vrot.lane.b32.xlu1 %v10567_v30, %s9701_s16 }
0x3030   :  { %6511 = vmax.xlane.f32.xlu1 %v6510_v26 }
0x3041   :  { %6686 = vrot.lane.b32.xlu1 %v10552_v46, %s9700_s15 }
0x3045   :  { %6684 = vrot.lane.b32.xlu1 %v10560_v21, %s9701_s16 }
0x3049   :  { %7178 = vrot.lane.b32.xlu1 %v10552_v46, %s9704_s22 }
0x3084   :  { %v6515_v44 = vpop.xlane.xlu1 %6514 }
0x3085   :  { %v6517_v47 = vsub.f32 %v6507_v38, %v6515_v44 }
0x3087   :  { %v6520_v20 = vmul.f32 1.442695, %v6517_v47 }
0x3088   :  { %v6609_v48 = vpop.permute.xlu1 %6608 }
0x3089   :  { %9555 = vpow2.f32 %v6520_v20  ;;  %9182 = vmatpush3.msra.mxu1 %v6609_v48 }
0x308a   :  { %9191 = vmatprep.subr.mxu1 %v9696_v10 }
0x308c   :  { %v6763_v51 = vpop.permute.xlu1 %6762 }
0x3093   :  { %v9556_v49 = vpop.eup %9555 }
0x3094   :  { %v6525_v41 = vsel %vm227_vm2, %v9556_v49, 0.0 }
0x3095   :  { %6526 = vadd.xlane.f32.xlu0 %v6525_v41 }
0x30ab   :  { %6764 = vrot.lane.b32.xlu0 %v10550_v16, %s9700_s15 }
0x30bd   :  { %v6512_v52 = vpop.xlane.xlu1 %6511 }
0x30be   :  { %v6516_v53 = vsub.f32 %v6429_v55, %v6512_v52 }
0x30c0   :  { %v6518_v56 = vmul.f32 1.442695, %v6516_v53 }
0x30c1   :  { %v6687_v1 = vpop.permute.xlu1 %6686 }
0x30c2   :  { %9557 = vpow2.f32 %v6518_v56 }
0x30c5   :  { %v6685_v3 = vpop.permute.xlu1 %6684 }
0x30c9   :  { %v7179_v35 = vpop.permute.xlu1 %7178 }
0x30cc   :  { %v9558_v57 = vpop.eup %9557 }
0x30cd   :  { %v6522_v58 = vsel %vm227_vm2, %v9558_v57, 0.0 }
0x30ce   :  { %6523 = vadd.xlane.f32.xlu0 %v6522_v58 }
0x30e4   :  { %6532 = vrot.lane.b32.xlu0 %v10552_v46, %s9699_s2 }
0x3122   :  { %v6527_v59 = vpop.xlane.xlu0 %6526 }
0x3123   :  { %9559 = vrcp.f32 %v6527_v59 }
0x3126   :  { %v6765_v61 = vpop.permute.xlu0 %6764 }
0x312d   :  { %v9560_v60 = vpop.eup %9559 }
0x312e   :  { %v6531_v40 = vmul.f32 %v9560_v60, %v9556_v49 }
0x3130   :  { %9184 = vmatmul.mubr.msk.f32.vlgmr.msra.gmra.mrb[74].mxu1 %vm227_vm2, %v6531_v40 }
0x3131   :  { %9192 = vmatpush3.xpose.msk.msra.mxu1 %vm227_vm2, %v6765_v61  ;;  %9193 = vmatprep.mubr.msk.f32.mxu1 %vm9697_vm1, %v9696_v10 }
0x3132   :  { %9201 = vmatprep.subr.mxu1 %v9696_v10 }
0x3134   :  { %9194 = vmatmul.mubr.msk.f32.vlgmr.msra.gmra.mrb[76].mxu1 %vm227_vm2, %v6763_v51 }
0x3135   :  { %9203 = vmatprep.mubr.msk.f32.mxu1 %vm9697_vm1, %v9696_v10 }
0x315b   :  { %v6524_v62 = vpop.xlane.xlu0 %6523 }
0x315c   :  { %9561 = vrcp.f32 %v6524_v62 }
0x315f   :  { %v6533_v43 = vpop.permute.xlu0 %6532 }
0x3160   :  { %9177 = vmatpush3.msra.mxu0 %v6533_v43 }
0x3161   :  { %9186 = vmatprep.subr.mxu0 %v9696_v10 }
0x3166   :  { %v9562_v0 = vpop.eup %9561 }
0x3167   :  { %v6530_v2 = vmul.f32 %v9562_v0, %v9558_v57  ;;  %v6351_v0 = vld [vmem:[#allocation5 + $0x68] sm:$0xff] }
0x3169   :  { %9179 = vmatmul.mubr.msk.f32.vlgmr.msra.gmra.mrb[54].mxu0 %vm227_vm2, %v6530_v2 }
0x316a   :  { %9187 = vmatpush3.xpose.msk.msra.mxu0 %vm227_vm2, %v6687_v1  ;;  %9188 = vmatprep.mubr.msk.f32.mxu0 %vm9697_vm1, %v9696_v10  ;;  %v6350_v1 = vld [vmem:[#allocation5 + $0x60] sm:$0xff] }
0x316b   :  { %9196 = vmatprep.subr.mxu0 %v9696_v10 }
0x316d   :  { %9189 = vmatmul.mubr.msk.f32.vlgmr.msra.gmra.mrb[56].mxu0 %vm227_vm2, %v6685_v3 }
0x316e   :  { %9198 = vmatprep.mubr.msk.f32.mxu0 %vm9697_vm1, %v9696_v10 }
0x3203   :  { %v10612_v4 = vpop.f32.mrb[74].mxu1 }
0x3204   :  { %v9185_v5 = vpop.f32.mrb[75].mxu1 }
0x3207   :  { %v6836_v7 = vpop.f32.mrb[76].mxu1 }
0x3208   :  { %v6837_v25 = vadd.f32 %v6836_v7, %v9901_v32  ;;  %v9195_v45 = vpop.f32.mrb[77].mxu1 }
0x320a   :  { %v6843_v22 = vsel %vm227_vm2, %v6837_v25, -inf }
0x320b   :  { %6844 = vmax.xlane.f32.xlu0 %v6843_v22 }
0x3221   :  { %6938 = vrot.lane.b32.xlu0 %v10550_v16, %s9702_s17 }
0x3225   :  { %7176 = vrot.lane.b32.xlu0 %v10560_v21, %s9703_s3 }
0x3229   :  { %7254 = vrot.lane.b32.xlu0 %v10567_v30, %s9703_s3 }
0x323c   :  { %v10622_v11 = vpop.f32.mrb[54].mxu0 }
0x323d   :  { %v9180_v13 = vpop.f32.mrb[55].mxu0 }
0x3240   :  { %v6758_v8 = vpop.f32.mrb[56].mxu0 }
0x3241   :  { %v9190_v50 = vpop.f32.mrb[57].mxu0  ;;  %v6759_v6 = vadd.f32 %v6758_v8, %v9898_v27 }
0x3243   :  { %v6840_v24 = vsel %vm227_vm2, %v6759_v6, -inf }
0x3298   :  { %v6845_v42 = vpop.xlane.xlu0 %6844 }
0x3299   :  { %v6847_v9 = vsub.f32 %v6837_v25, %v6845_v42 }
0x329b   :  { %v6850_v23 = vmul.f32 1.442695, %v6847_v9 }
0x329c   :  { %v6939_v12 = vpop.permute.xlu0 %6938 }
0x329d   :  { %9563 = vpow2.f32 %v6850_v23  ;;  %9202 = vmatpush3.msra.mxu1 %v6939_v12  ;;  %v6352_v12 = vld [vmem:[#allocation5 + $0x70] sm:$0xff] }
0x329e   :  { %9216 = vmatprep.subr.mxu1 %v9696_v10 }
0x32a0   :  { %v7177_v39 = vpop.permute.xlu0 %7176 }
0x32a4   :  { %v7255_v55 = vpop.permute.xlu0 %7254 }
0x32a7   :  { %v9564_v17 = vpop.eup %9563 }
0x32a8   :  { %v6855_v18 = vsel %vm227_vm2, %v9564_v17, 0.0 }
0x32a9   :  { %6856 = vadd.xlane.f32.xlu1 %v6855_v18 }
0x32ba   :  { %7256 = vrot.lane.b32.xlu1 %v10550_v16, %s9704_s22 }
0x32de   :  { %6841 = vmax.xlane.f32.xlu1 %v6840_v24 }
0x3336   :  { %v6857_v36 = vpop.xlane.xlu1 %6856 }
0x3337   :  { %9565 = vrcp.f32 %v6857_v36 }
0x333a   :  { %v7257_v19 = vpop.permute.xlu1 %7256 }
0x3341   :  { %v9566_v37 = vpop.eup %9565 }
0x3342   :  { %v6861_v38 = vmul.f32 %v9566_v37, %v9564_v17 }
0x3344   :  { %9204 = vmatmul.mubr.msk.f32.vlgmr.msra.gmra.mrb[78].mxu1 %vm227_vm2, %v6861_v38 }
0x3345   :  { %9217 = vmatpush3.xpose.msk.msra.mxu1 %vm227_vm2, %v7179_v35  ;;  %9218 = vmatprep.mubr.msk.f32.mxu1 %vm9697_vm1, %v9696_v10 }
0x3346   :  { %9221 = vmatprep.subr.mxu1 %v9696_v10 }
0x3348   :  { %9219 = vmatmul.mubr.msk.f32.vlgmr.msra.gmra.mrb[80].mxu1 %vm227_vm2, %v7177_v39 }
0x3349   :  { %9222 = vmatpush3.xpose.msk.msra.mxu1 %vm227_vm2, %v7257_v19  ;;  %9223 = vmatprep.mubr.msk.f32.mxu1 %vm9697_vm1, %v9696_v10 }
0x334a   :  { %9231 = vmatprep.subr.mxu1 %v9696_v10 }
0x334c   :  { %9224 = vmatmul.mubr.msk.f32.vlgmr.msra.gmra.mrb[82].mxu1 %vm227_vm2, %v7255_v55 }
0x334d   :  { %9233 = vmatprep.mubr.msk.f32.mxu1 %vm9697_vm1, %v9696_v10 }
0x336b   :  { %v6842_v26 = vpop.xlane.xlu1 %6841 }
0x336c   :  { %v6846_v44 = vsub.f32 %v6759_v6, %v6842_v26 }
0x336e   :  { %v6848_v47 = vmul.f32 1.442695, %v6846_v44 }
0x3370   :  { %9567 = vpow2.f32 %v6848_v47 }
0x337a   :  { %v9568_v20 = vpop.eup %9567 }
0x337b   :  { %v6852_v48 = vsel %vm227_vm2, %v9568_v20, 0.0 }
0x337c   :  { %6853 = vadd.xlane.f32.xlu0 %v6852_v48 }
0x3392   :  { %6862 = vrot.lane.b32.xlu0 %v10552_v46, %s9702_s17 }
0x3396   :  { %7430 = vrot.lane.b32.xlu0 %v10550_v16, %s9705_s18 }
0x339a   :  { %7591 = vrot.lane.b32.xlu0 %v10552_v46, %s9706_s19 }
0x339e   :  { %7669 = vrot.lane.b32.xlu0 %v10550_v16, %s9706_s19 }
0x33a2   :  { %7589 = vrot.lane.b32.xlu0 %v10560_v21, %s9707_s21 }
0x3409   :  { %v6854_v49 = vpop.xlane.xlu0 %6853 }
0x340a   :  { %9569 = vrcp.f32 %v6854_v49 }
0x340d   :  { %v6863_v41 = vpop.permute.xlu0 %6862 }
0x340e   :  { %9197 = vmatpush3.msra.mxu0 %v6863_v41 }
0x340f   :  { %9206 = vmatprep.subr.mxu0 %v6351_v0 }
0x3411   :  { %v7431_v51 = vpop.permute.xlu0 %7430 }
0x3412   :  { %9232 = vmatpush3.msra.mxu1 %v7431_v51 }
0x3413   :  { %9241 = vmatprep.subr.mxu1 %v9696_v10 }
0x3414   :  { %v9570_v52 = vpop.eup %9569 }
0x3415   :  { %v6860_v53 = vmul.f32 %v9570_v52, %v9568_v20  ;;  %v7592_v18 = vpop.permute.xlu0 %7591 }
0x3417   :  { %9199 = vmatmul.mubr.msk.f32.vlgmr.msra.gmra.mrb[58].mxu0 %vm227_vm2, %v6860_v53  ;;  %v7010_v56 = vpop.f32.mrb[78].mxu1 }
0x3418   :  { %v9205_v57 = vpop.f32.mrb[79].mxu1  ;;  %9207 = vmatpush3.msra.mxu0 %v6351_v0 }
0x3419   :  { %9211 = vmatprep.subr.mxu0 %v6350_v1  ;;  %v7670_v35 = vpop.permute.xlu0 %7669 }
0x341b   :  { %v7250_v58 = vpop.f32.mrb[80].mxu1 }
0x341c   :  { %v7251_v59 = vadd.f32 %v7250_v58, %v9898_v27  ;;  %v9220_v60 = vpop.f32.mrb[81].mxu1 }
0x341d   :  { %v7590_v36 = vpop.permute.xlu0 %7589 }
0x341e   :  { %v7332_v21 = vsel %vm227_vm2, %v7251_v59, -inf }
0x341f   :  { %7333 = vmax.xlane.f32.xlu1 %v7332_v21  ;;  %v7328_v40 = vpop.f32.mrb[82].mxu1 }
0x3420   :  { %v7329_v61 = vadd.f32 %v7328_v40, %v9901_v32  ;;  %v9225_v62 = vpop.f32.mrb[83].mxu1 }
0x3422   :  { %v7335_v43 = vsel %vm227_vm2, %v7329_v61, -inf }
0x3423   :  { %7336 = vmax.xlane.f32.xlu1 %v7335_v43  ;;  %v6353_v43 = vld [vmem:[#allocation5 + $0x78] sm:$0xff] }
0x34ac   :  { %v7334_v2 = vpop.xlane.xlu1 %7333 }
0x34ad   :  { %v7338_v3 = vsub.f32 %v7251_v59, %v7334_v2 }
0x34af   :  { %v7340_v5 = vmul.f32 1.442695, %v7338_v3 }
0x34b0   :  { %v7337_v7 = vpop.xlane.xlu1 %7336 }
0x34b1   :  { %9571 = vpow2.f32 %v7340_v5  ;;  %v7339_v25 = vsub.f32 %v7329_v61, %v7337_v7 }
0x34b3   :  { %v7342_v45 = vmul.f32 1.442695, %v7339_v25 }
0x34b5   :  { %9573 = vpow2.f32 %v7342_v45 }
0x34bb   :  { %v9572_v22 = vpop.eup %9571 }
0x34bc   :  { %v7344_v13 = vsel %vm227_vm2, %v9572_v22, 0.0 }
0x34bd   :  { %7345 = vadd.xlane.f32.xlu1 %v7344_v13 }
0x34bf   :  { %v9574_v8 = vpop.eup %9573 }
0x34c0   :  { %v7347_v50 = vsel %vm227_vm2, %v9574_v8, 0.0 }
0x34c1   :  { %7348 = vadd.xlane.f32.xlu1 %v7347_v50 }
0x34d2   :  { %7354 = vrot.lane.b32.xlu1 %v10552_v46, %s9705_s18 }
0x34d6   :  { %7667 = vrot.lane.b32.xlu1 %v10567_v30, %s9707_s21 }
0x34ea   :  { %v6934_v42 = vpop.f32.mrb[58].mxu0 }
0x34eb   :  { %v9200_v9 = vpop.f32.mrb[59].mxu0  ;;  %9208 = vmatprep.mubr.msk.f32.mxu0 %vm227_vm2, %v6934_v42 }
0x34ec   :  { %9209 = vmatmul.mubr.msk.f32.vlgmr.msra.gmra.mrb[60].mxu0 %vm227_vm2, %v7010_v56 }
0x34ed   :  { %9213 = vmatprep.mubr.msk.f32.mxu0 %vm227_vm2, %v10622_v11  ;;  %9212 = vmatpush3.msra.mxu0 %v6350_v1 }
0x34ee   :  { %9226 = vmatprep.subr.mxu0 %v9696_v10 }
0x34f4   :  { %9214 = vmatmul.mubr.msk.f32.vlgmr.msra.gmra.mrb[60].mxu0 %vm227_vm2, %v10612_v4 }
0x34f5   :  { %9228 = vmatprep.mubr.msk.f32.mxu0 %vm9697_vm1, %v9696_v10 }
0x354a   :  { %v7346_v23 = vpop.xlane.xlu1 %7345 }
0x354b   :  { %9575 = vrcp.f32 %v7346_v23 }
0x354e   :  { %v7349_v30 = vpop.xlane.xlu1 %7348 }
0x354f   :  { %9577 = vrcp.f32 %v7349_v30 }
0x3552   :  { %v7355_v17 = vpop.permute.xlu1 %7354 }
0x3553   :  { %9227 = vmatpush3.msra.mxu0 %v7355_v17 }
0x3554   :  { %9236 = vmatprep.subr.mxu0 %v6352_v12 }
0x3555   :  { %v9576_v6 = vpop.eup %9575 }
0x3556   :  { %v7352_v11 = vmul.f32 %v9576_v6, %v9572_v22  ;;  %v7668_v55 = vpop.permute.xlu1 %7667 }
0x3558   :  { %9229 = vmatmul.mubr.msk.f32.vlgmr.msra.gmra.mrb[62].mxu0 %vm227_vm2, %v7352_v11 }
0x3559   :  { %v9578_v24 = vpop.eup %9577  ;;  %9237 = vmatpush3.msra.mxu0 %v6352_v12 }
0x355a   :  { %v7353_v4 = vmul.f32 %v9578_v24, %v9574_v8  ;;  %9246 = vmatprep.subr.mxu0 %v9696_v10 }
0x355c   :  { %9234 = vmatmul.mubr.msk.f32.vlgmr.msra.gmra.mrb[84].mxu1 %vm227_vm2, %v7353_v4 }
0x355d   :  { %9242 = vmatpush3.xpose.msk.msra.mxu1 %vm227_vm2, %v7592_v18  ;;  %9243 = vmatprep.mubr.msk.f32.mxu1 %vm9697_vm1, %v9696_v10 }
0x355e   :  { %9251 = vmatprep.subr.mxu1 %v9696_v10 }
0x3560   :  { %9244 = vmatmul.mubr.msk.f32.vlgmr.msra.gmra.mrb[86].mxu1 %vm227_vm2, %v7590_v36  ;;  %v8050_v36 = vld [vmem:[#allocation7 + $0x68] sm:$0xff] }
0x3561   :  { %9253 = vmatprep.mubr.msk.f32.mxu1 %vm9697_vm1, %v9696_v10 }
0x362b   :  { %v7426_v37 = vpop.f32.mrb[62].mxu0 }
0x362c   :  { %v9230_v38 = vpop.f32.mrb[63].mxu0  ;;  %9238 = vmatprep.mubr.msk.f32.mxu0 %vm227_vm2, %v7426_v37 }
0x362d   :  { %v8051_v38 = vld [vmem:[#allocation7 + $0x70] sm:$0xff] }
0x362f   :  { %v7502_v39 = vpop.f32.mrb[84].mxu1 }
0x3630   :  { %v9235_v19 = vpop.f32.mrb[85].mxu1  ;;  %9239 = vmatmul.mubr.msk.f32.vlgmr.msra.gmra.mrb[60].mxu0 %vm227_vm2, %v7502_v39  ;;  %v8052_v39 = vld [vmem:[#allocation7 + $0x78] sm:$0xff] }
0x3631   :  { %9247 = vmatpush3.xpose.msk.msra.mxu0 %vm227_vm2, %v7670_v35  ;;  %9248 = vmatprep.mubr.msk.f32.mxu0 %vm9697_vm1, %v9696_v10  ;;  %v9380_v19 = vpack.c.bf16 %v8052_v39, %v8051_v38 }
0x3632   :  { %9256 = vmatprep.subr.mxu0 %v9696_v10 }
0x3633   :  { %v7663_v26 = vpop.f32.mrb[86].mxu1 }
0x3634   :  { %v7664_v44 = vadd.f32 %v7663_v26, %v9898_v27  ;;  %v9245_v47 = vpop.f32.mrb[87].mxu1  ;;  %9249 = vmatmul.mubr.msk.f32.vlgmr.msra.gmra.mrb[64].mxu0 %vm227_vm2, %v7668_v55  ;;  %v8141_v55 = vld [vmem:[#allocation8 + $0x60] sm:$0xff]  ;;  %v8142_v26 = vld [vmem:[#allocation8 + $0x68] sm:$0xff] }
0x3635   :  { %9258 = vmatprep.mubr.msk.f32.mxu0 %vm9697_vm1, %v9696_v10 }
0x3636   :  { %v7745_v20 = vsel %vm227_vm2, %v7664_v44, -inf }
0x3637   :  { %7746 = vmax.xlane.f32.xlu0 %v7745_v20 }
0x36c4   :  { %v7747_v48 = vpop.xlane.xlu0 %7746 }
0x36c5   :  { %v7751_v49 = vsub.f32 %v7664_v44, %v7747_v48  ;;  %v9384_v44 = vpack.c.bf16 %v8142_v26, %v8141_v55  ;;  %v8481_v26 = vld [vmem:[%s10759_s9] ss:$0 sm:$0xff] }
0x36c7   :  { %v7753_v41 = vmul.f32 1.442695, %v7751_v49 }
0x36c9   :  { %9579 = vpow2.f32 %v7753_v41 }
0x36d3   :  { %v9580_v51 = vpop.eup %9579 }
0x36d4   :  { %v7757_v52 = vsel %vm227_vm2, %v9580_v51, 0.0 }
0x36d5   :  { %7758 = vadd.xlane.f32.xlu0 %v7757_v52 }
0x3707   :  { %v7741_v53 = vpop.f32.mrb[64].mxu0 }
0x3708   :  { %v7742_v27 = vadd.f32 %v7741_v53, %v9901_v32  ;;  %v9250_v56 = vpop.f32.mrb[65].mxu0 }
0x370a   :  { %v7748_v57 = vsel %vm227_vm2, %v7742_v27, -inf }
0x370b   :  { %7749 = vmax.xlane.f32.xlu1 %v7748_v57 }
0x371c   :  { %7767 = vrot.lane.b32.xlu1 %v10552_v46, %s9708_s23 }
0x3762   :  { %v7759_v10 = vpop.xlane.xlu0 %7758 }
0x3763   :  { %9581 = vrcp.f32 %v7759_v10 }
0x376d   :  { %v9582_v59 = vpop.eup %9581 }
0x376e   :  { %v7765_v40 = vmul.f32 %v9582_v59, %v9580_v51 }
0x3798   :  { %v7750_v58 = vpop.xlane.xlu1 %7749 }
0x3799   :  { %v7752_v60 = vsub.f32 %v7742_v27, %v7750_v58 }
0x379b   :  { %v7755_v21 = vmul.f32 1.442695, %v7752_v60 }
0x379c   :  { %v7768_v61 = vpop.permute.xlu1 %7767 }
0x379d   :  { %9583 = vpow2.f32 %v7755_v21  ;;  %9252 = vmatpush3.msra.mxu1 %v7768_v61  ;;  %v8144_v61 = vld [vmem:[#allocation8 + $0x78] sm:$0xff] }
0x379e   :  { %9254 = vmatmul.mubr.msk.f32.vlgmr.msra.gmra.mrb[88].mxu1 %vm227_vm2, %v7765_v40  ;;  %v8143_v40 = vld [vmem:[#allocation8 + $0x70] sm:$0xff] }
0x37a7   :  { %v9584_v32 = vpop.eup %9583 }
0x37a8   :  { %v7760_v62 = vsel %vm227_vm2, %v9584_v32, 0.0 }
0x37a9   :  { %7761 = vadd.xlane.f32.xlu0 %v7760_v62 }
0x37bf   :  { %7843 = vrot.lane.b32.xlu0 %v10550_v16, %s9708_s23  ;;  %v10711_v16 = vld [vmem:[%s10758_s8 + $0x18] sm:$0x7f] }
0x37c0   :  { %v8005_v45 = vrot.slane %v10711_v16, %v10037_v15  ;;  %v8039_v52 = vrot.slane %v10711_v16, %v10055_v31  ;;  %v8045_v10 = vrot.slane %v10711_v16, %v10058_v33  ;;  %v8056_v31 = vrot.slane %v10711_v16, %v10068_v14 }
0x3836   :  { %v7762_v46 = vpop.xlane.xlu0 %7761 }
0x3837   :  { %9585 = vrcp.f32 %v7762_v46 }
0x383a   :  { %v7844_v0 = vpop.permute.xlu0 %7843 }
0x383b   :  { %9257 = vmatpush3.msra.mxu0 %v7844_v0 }
0x383c   :  { %9261 = vmatprep.subr.mxu0 %v6353_v43 }
0x3841   :  { %v9586_v1 = vpop.eup %9585 }
0x3842   :  { %v7766_v2 = vmul.f32 %v9586_v1, %v9584_v32  ;;  %v9388_v32 = vpack.c.bf16 %v8144_v61, %v8143_v40 }
0x3844   :  { %9259 = vmatmul.mubr.msk.f32.vlgmr.msra.gmra.mrb[66].mxu0 %vm227_vm2, %v7766_v2  ;;  %v8148_v2 = vrot.slane %v10711_v16, %v10077_v54 }
0x3845   :  { %9262 = vmatpush3.msra.mxu0 %v6353_v43 }
0x3846   :  { %9385 = vmatprep.subr.bf16.mxu0 %v9384_v44 }
0x3871   :  { %v7839_v3 = vpop.f32.mrb[88].mxu1 }
0x3872   :  { %v9255_v5 = vpop.f32.mrb[89].mxu1  ;;  %9263 = vmatprep.mubr.msk.f32.mxu0 %vm227_vm2, %v7839_v3 }
0x3917   :  { %v7915_v7 = vpop.f32.mrb[66].mxu0 }
0x3918   :  { %v9260_v25 = vpop.f32.mrb[67].mxu0  ;;  %9264 = vmatmul.mubr.msk.f32.vlgmr.msra.gmra.mrb[60].mxu0 %vm227_vm2, %v7915_v7 }
0x3919   :  { %9387 = vmatpush3.bf16.msra.mxu0 %v9384_v44 }
0x391a   :  { %9389 = vmatprep.subr.bf16.mxu0 %v9388_v32 }
0x391d   :  { %9391 = vmatpush3.bf16.msra.mxu0 %v9388_v32 }
0x39eb   :  { %v9265_v22 = vpop.f32.mrb[60].mxu0 }
0x39ec   :  { %v8007_v13 = vadd.f32 %v9265_v22, %v8005_v45  ;;  %v7991_v8 = vpop.f32.mrb[61].mxu0 }
0x39ed   :  { %v8006_v50 = vadd.f32 %v8005_v45, %v7991_v8 }
0x39ee   :  { %v8009_v42 = vadd.f32 %v8007_v13, %v10531_v63 }
0x39ef   :  { %v8008_v9 = vadd.f32 %v8006_v50, %v10529_v34  ;;  %v8049_v34 = vld [vmem:[#allocation7 + $0x60] sm:$0xff] }
0x39f0   :  { %v8013_v23 = vsel %vm138_vm0, %v8009_v42, 0.0  ;;  %v9376_v37 = vpack.c.bf16 %v8050_v36, %v8049_v34 }
0x39f1   :  { %8014 = vadd.xlane.f32.xlu0 %v8013_v23  ;;  %v8010_v30 = vsel %vm138_vm0, %v8008_v9, 0.0 }
0x39f2   :  { %8011 = vadd.xlane.f32.xlu1 %v8010_v30  ;;  %9377 = vmatprep.subr.bf16.mxu1 %v9376_v37 }
0x39f3   :  { %9379 = vmatpush3.bf16.msra.mxu1 %v9376_v37  ;;  %v8267_v37 = vrot.slane %v10711_v16, %v10090_v29  ;;  %v8482_v29 = vld [vmem:[#allocation2] ss:$0 sm:$0xff] }
0x39f4   :  { %9381 = vmatprep.subr.bf16.mxu1 %v9380_v19 }
0x39f7   :  { %9383 = vmatpush3.bf16.msra.mxu1 %v9380_v19 }
0x3a7e   :  { %v8015_v12 = vpop.xlane.xlu0 %8014 }
0x3a7f   :  { %v8017_v17 = vmul.f32 0.03125, %v8015_v12  ;;  %v8012_v18 = vpop.xlane.xlu1 %8011 }
0x3a80   :  { %v8016_v6 = vmul.f32 0.03125, %v8012_v18 }
0x3a81   :  { %v8019_v11 = vsub.f32 %v8009_v42, %v8017_v17 }
0x3a82   :  { %v8018_v15 = vsub.f32 %v8008_v9, %v8016_v6 }
0x3a83   :  { %v8021_v24 = vmul.f32 %v8019_v11, %v8019_v11 }
0x3a84   :  { %v8020_v35 = vmul.f32 %v8018_v15, %v8018_v15 }
0x3a85   :  { %v8025_v4 = vsel %vm138_vm0, %v8021_v24, 0.0 }
0x3a86   :  { %8026 = vadd.xlane.f32.xlu0 %v8025_v4  ;;  %v8022_v63 = vsel %vm138_vm0, %v8020_v35, 0.0 }
0x3a87   :  { %8023 = vadd.xlane.f32.xlu1 %v8022_v63  ;;  %v8261_v63 = vrot.slane %v10711_v16, %v10087_v28 }
0x3b13   :  { %v8027_v47 = vpop.xlane.xlu0 %8026 }
0x3b14   :  { %v8029_v20 = vmul.f32 0.03125, %v8027_v47  ;;  %v8024_v48 = vpop.xlane.xlu1 %8023 }
0x3b15   :  { %v8028_v49 = vmul.f32 0.03125, %v8024_v48 }
0x3b16   :  { %v8031_v41 = vadd.f32 1e-08, %v8029_v20 }
0x3b17   :  { %v8030_v51 = vadd.f32 1e-08, %v8028_v49 }
0x3b18   :  { %9587 = vrsqrt.f32 %v8031_v41 }
0x3b19   :  { %9589 = vrsqrt.f32 %v8030_v51 }
0x3b22   :  { %v9588_v53 = vpop.eup %9587 }
0x3b23   :  { %v9590_v27 = vpop.eup %9589  ;;  %v8035_v56 = vmul.f32 %v9588_v53, %v8019_v11 }
0x3b24   :  { %v8034_v57 = vmul.f32 %v9590_v27, %v8018_v15 }
0x3b25   :  { %v8041_v58 = vmul.f32 %v8039_v52, %v8035_v56 }
0x3b26   :  { %v8040_v59 = vmul.f32 %v8039_v52, %v8034_v57 }
0x3b27   :  { %v8047_v21 = vadd.f32 %v8045_v10, %v8041_v58 }
0x3b28   :  { %v8046_v60 = vadd.f32 %v8045_v10, %v8040_v59 }
0x3b2a   :  { %9274 = vmatprep.mubr.msk.f32.mxu1 %vm138_vm0, %v8046_v60 }
0x3b2b   :  { %9275 = vmatmul.mubr.msk.f32.vlgmr.msra.gmra.mrb[90].mxu1 %vm138_vm0, %v8047_v21 }
0x3bfe   :  { %v9276_v62 = vpop.f32.mrb[90].mxu1 }
0x3bff   :  { %v8135_v46 = vadd.f32 %v9276_v62, %v8056_v31  ;;  %v8129_v43 = vpop.f32.mrb[91].mxu1 }
0x3c00   :  { %v8130_v33 = vadd.f32 %v8129_v43, %v8056_v31 }
0x3c01   :  { %v8139_v1 = vmax.f32 %v8135_v46, 0.0 }
0x3c02   :  { %v8138_v0 = vmax.f32 %v8130_v33, 0.0 }
0x3c04   :  { %9285 = vmatprep.mubr.msk.f32.mxu0 %vm138_vm0, %v8138_v0 }
0x3c05   :  { %9286 = vmatmul.mubr.msk.f32.vlgmr.msra.gmra.mrb[68].mxu0 %vm138_vm0, %v8139_v1 }
0x3cd8   :  { %v9287_v3 = vpop.f32.mrb[68].mxu0 }
0x3cd9   :  { %v8227_v5 = vadd.f32 %v9287_v3, %v8148_v2  ;;  %v8221_v7 = vpop.f32.mrb[69].mxu0 }
0x3cda   :  { %v8222_v25 = vadd.f32 %v8221_v7, %v8148_v2 }
0x3cdb   :  { %v8231_v45 = vadd.f32 %v8227_v5, %v8047_v21 }
0x3cdc   :  { %v8230_v22 = vadd.f32 %v8222_v25, %v8046_v60 }
0x3cdd   :  { %v8235_v14 = vsel %vm138_vm0, %v8231_v45, 0.0 }
0x3cde   :  { %8236 = vadd.xlane.f32.xlu1 %v8235_v14  ;;  %v8232_v13 = vsel %vm138_vm0, %v8230_v22, 0.0 }
0x3cdf   :  { %8233 = vadd.xlane.f32.xlu0 %v8232_v13 }
0x3d6b   :  { %v8237_v8 = vpop.xlane.xlu1 %8236 }
0x3d6c   :  { %v8239_v50 = vmul.f32 0.03125, %v8237_v8  ;;  %v8234_v42 = vpop.xlane.xlu0 %8233 }
0x3d6d   :  { %v8238_v9 = vmul.f32 0.03125, %v8234_v42 }
0x3d6e   :  { %v8241_v23 = vsub.f32 %v8231_v45, %v8239_v50 }
0x3d6f   :  { %v8240_v30 = vsub.f32 %v8230_v22, %v8238_v9 }
0x3d70   :  { %v8243_v12 = vmul.f32 %v8241_v23, %v8241_v23 }
0x3d71   :  { %v8242_v54 = vmul.f32 %v8240_v30, %v8240_v30 }
0x3d72   :  { %v8247_v17 = vsel %vm138_vm0, %v8243_v12, 0.0 }
0x3d73   :  { %8248 = vadd.xlane.f32.xlu1 %v8247_v17  ;;  %v8244_v18 = vsel %vm138_vm0, %v8242_v54, 0.0 }
0x3d74   :  { %8245 = vadd.xlane.f32.xlu0 %v8244_v18 }
0x3e00   :  { %v8249_v6 = vpop.xlane.xlu1 %8248 }
0x3e01   :  { %v8251_v11 = vmul.f32 0.03125, %v8249_v6  ;;  %v8246_v15 = vpop.xlane.xlu0 %8245 }
0x3e02   :  { %v8250_v24 = vmul.f32 0.03125, %v8246_v15 }
0x3e03   :  { %v8253_v35 = vadd.f32 1e-08, %v8251_v11 }
0x3e04   :  { %v8252_v4 = vadd.f32 1e-08, %v8250_v24 }
0x3e05   :  { %9591 = vrsqrt.f32 %v8253_v35 }
0x3e06   :  { %9593 = vrsqrt.f32 %v8252_v4 }
0x3e0f   :  { %v9592_v34 = vpop.eup %9591 }
0x3e10   :  { %v9594_v36 = vpop.eup %9593  ;;  %v8257_v38 = vmul.f32 %v9592_v34, %v8241_v23 }
0x3e11   :  { %v8256_v39 = vmul.f32 %v9594_v36, %v8240_v30 }
0x3e12   :  { %v8263_v19 = vmul.f32 %v8261_v63, %v8257_v38 }
0x3e13   :  { %v8262_v55 = vmul.f32 %v8261_v63, %v8256_v39 }
0x3e14   :  { %v8269_v44 = vadd.f32 %v8267_v37, %v8263_v19 }
0x3e15   :  { %v8268_v47 = vadd.f32 %v8267_v37, %v8262_v55 }
0x3e16   :  { %v8278_v20 = vmul.f32 %v8481_v26, %v8269_v44 }
0x3e17   :  { %v8277_v48 = vmul.f32 %v8481_v26, %v8268_v47 }
0x3e18   :  { %v8281_v28 = vrot.slane %v8278_v20, 7 }
0x3e19   :  { %v8285_v49 = vsel %vm8284_vm4, %v8277_v48, 0.0 }
0x3e1a   :  { %8286 = vadd.xlane.f32.xlu1 %v8285_v49  ;;  %v8289_v41 = vsel %vm8288_vm5, %v8281_v28, 0.0 }
0x3e1b   :  { %8290 = vadd.xlane.f32.xlu0 %v8289_v41 }
0x3ea7   :  { %v8287_v16 = vpop.xlane.xlu1 %8286 }
0x3ea8   :  { %v8299_v51 = vadd.f32 %v8482_v29, %v8287_v16  ;;  %v8291_v52 = vpop.xlane.xlu0 %8290 }
0x3ea9   :  { %v8300_v53 = vadd.f32 %v8482_v29, %v8291_v52 }
0x3eaa   :  { %8302 = vst.msk [vmem:[%s10761_s11 - $0x7] sm:$0x80] %vm8301_vm6, %v8299_v51 }
0x3eab   :  { %8304 = vst.msk [vmem:[%s10761_s11 + $0x1] sm:$0x1] %vm8303_vm7, %v8300_v53 }
0x3eac   :  { %8309 = vsyncpa [#allocation4], 1 }
0x3ead   :  { %8310 = vsyncpa [#allocation6], 1 }
0x3eae   :  { %8311 = vsyncpa [#allocation9], 1 }

</bundles_post_ra>
